<compile_context>
chip_gen: v7x
topology: tpu7x:2x2x1
jax: 0.10.0
libtpu: 0.0.40
codegen_flags: <defaults>
</compile_context>

<pallas_src>
import functools

import jax
import jax.numpy as jnp
from jax.experimental import pallas as pl
from jax.experimental.pallas import tpu as pltpu


# ---------------------------------------------------------------------------
# Tiling / budget helpers
# ---------------------------------------------------------------------------
@functools.lru_cache(maxsize=None)
def _vmem_limit_bytes():
    """Generation-aware VMEM budget: ~3/4 of physical capacity capped at
    100 MiB (v5e/v6e: 128 MiB physical, v7x: 64 MiB).  Falls back to 48 MiB
    if the hardware query is unavailable."""
    cap = 64 * 1024 * 1024
    try:
        info = pltpu.get_tpu_info()
        cap = int(getattr(info, "vmem_capacity_bytes", cap)) or cap
    except Exception:
        pass
    cap = max(32 * 1024 * 1024, min(cap, 128 * 1024 * 1024))
    return min((cap * 3) // 4, 100 * 1024 * 1024)


def _pick_tile(m, candidates, prefer_split=False, multiple=8):
    """Largest candidate tile dividing m (and a multiple of `multiple` for
    layout friendliness).  prefer_split additionally asks for >=2 grid blocks
    so both v7x TensorCores get work on parallel axes.  Falls back to the
    full dimension (single whole-array block) if nothing divides."""
    divs = [t for t in candidates if m % t == 0 and t % multiple == 0]
    if prefer_split:
        split = [t for t in divs if m // t >= 2]
        if split:
            return split[0]
    return divs[0] if divs else m


def _k_tile(k):
    """K tile for the matmul path: full K for small layers, 128-aligned tiles
    for large K so A/B blocks stay well inside the VMEM budget."""
    if k <= 2048:
        return k
    for t in (1024, 512, 256, 128):
        if k % t == 0:
            return t
    return k


def _dense_layout(m, c):
    """Lane-dense view of an (m, c) slab for element-wise kernels.

    Returns (rows, lanes, rep): slab viewed as (rows, lanes) with the
    per-channel vectors tiled `rep` times along lanes.  Avoids masked partial
    stores when c < 128; the reshape is a free row-major bitcast."""
    if c % 128 == 0:
        return m, c, 1
    if 128 % c == 0 and (m * c) % (8 * 128) == 0:
        return (m * c) // 128, 128, 128 // c
    return m, c, 1


# ---------------------------------------------------------------------------
# Pallas kernels
# ---------------------------------------------------------------------------
def _conv3x3_s1_kernel(*refs, h, w, cin, cout, affine):
    """Direct 3x3 conv (stride 1), one image per grid step.

    * Zeroes a padded f32 VMEM scratch and writes the interior, optionally
      applying the previous BatchNorm affine + ReLU (BN1 fused into conv2's
      input path; the zero padding stays exactly zero).
    * Gathers the 9 shifted taps into one (H*W, 9*Cin) bf16 slab and runs a
      single deep-K MXU matmul (K = 9*Cin) with f32 accumulation.
    * Emits per-grid-step partial BN sum / sum-of-squares so the batch grid
      axis can be marked "parallel" (v7x megacore)."""
    if affine:
        (x_ref, w_ref, s_ref, b_ref,
         y_ref, sum_ref, sq_ref, pad_ref, tap_ref) = refs
    else:
        x_ref, w_ref, y_ref, sum_ref, sq_ref, pad_ref, tap_ref = refs
        s_ref = b_ref = None

    # In-kernel zero padding.  The padded scratch is kept f32: unaligned
    # sublane slices of a packed bf16 buffer are riskier to lower, and the
    # fused-affine path wants f32 math anyway.
    # TODO(synk): switch the padded scratch to bf16 once packed unaligned
    # sublane slicing is verified on all target generations.
    pad_ref[...] = jnp.zeros_like(pad_ref)
    if affine:
        img = x_ref[0].astype(jnp.float32)
        pad_ref[1:h + 1, 1:w + 1, :] = jnp.maximum(
            img * s_ref[...] + b_ref[...], 0.0)
    else:
        pad_ref[1:h + 1, 1:w + 1, :] = x_ref[0].astype(jnp.float32)

    # Build the (H*W, 9*Cin) bf16 tap slab (exactly what the MXU consumes).
    for t in range(9):
        ki, kj = t // 3, t % 3
        tap_ref[:, t * cin:(t + 1) * cin] = (
            pad_ref[ki:ki + h, kj:kj + w, :]
            .reshape(h * w, cin).astype(jnp.bfloat16))

    # One deep-K MXU matmul, f32 accumulation.
    acc = jnp.dot(tap_ref[...], w_ref[...],
                  preferred_element_type=jnp.float32)

    y_ref[...] = acc.astype(y_ref.dtype)
    # Per-step partial BN statistics (reduced by a tiny XLA sum afterwards),
    # computed while the f32 accumulator is still resident in vregs/VMEM.
    sum_ref[...] = jnp.sum(acc, axis=0, keepdims=True).reshape(1, 1, cout)
    sq_ref[...] = jnp.sum(acc * acc, axis=0, keepdims=True).reshape(1, 1, cout)


def _mm_stats_kernel(a_ref, b_ref, o_ref, sum_ref, sq_ref, acc_ref):
    """(tm, tk) @ (tk, N) bf16 matmul with an f32 VMEM accumulator and fused
    per-(i-block) partial column stats (1x1 shortcut and strided fallback)."""
    k = pl.program_id(1)

    @pl.when(k == 0)
    def _():
        acc_ref[...] = jnp.zeros_like(acc_ref)

    acc_ref[...] += jnp.dot(a_ref[...], b_ref[...],
                            preferred_element_type=jnp.float32)

    @pl.when(k == pl.num_programs(1) - 1)
    def _():
        y = acc_ref[...]
        ncol = y.shape[-1]
        o_ref[...] = y.astype(o_ref.dtype)
        sum_ref[...] = jnp.sum(y, axis=0, keepdims=True).reshape(1, 1, ncol)
        sq_ref[...] = jnp.sum(y * y, axis=0, keepdims=True).reshape(1, 1, ncol)


def _residual_kernel(x_ref, s_ref, b_ref, r_ref, sr_ref, br_ref, o_ref):
    # out = relu( bn2(conv2) + bn_sc(shortcut) ); both affines fused, bf16 in.
    y = (x_ref[...].astype(jnp.float32) * s_ref[...] + b_ref[...]
         + r_ref[...].astype(jnp.float32) * sr_ref[...] + br_ref[...])
    o_ref[...] = jnp.maximum(y, 0.0)


# ---------------------------------------------------------------------------
# Pallas wrappers
# ---------------------------------------------------------------------------
def _pallas_conv3x3_direct(x_img, wk, scale, bias, n, h, w, cin, cout):
    """x_img: (N, H, W, Cin) bf16 (unpadded); wk: (9*Cin, Cout) bf16.
    scale/bias: optional (Cin,) f32 BN affine fused onto the conv input.
    Returns (raw conv output (N*H*W, Cout) bf16, col_sum, col_sumsq)."""
    hp, wp = h + 2, w + 2
    affine = scale is not None
    kernel = functools.partial(_conv3x3_s1_kernel,
                               h=h, w=w, cin=cin, cout=cout, affine=affine)
    in_specs = [pl.BlockSpec((1, h, w, cin), lambda i: (i, 0, 0, 0)),
                # TODO(synk): pipeline_mode=pl.Buffered(1) on this constant
                # weight block would save one weight copy of VMEM on v7x.
                pl.BlockSpec((9 * cin, cout), lambda i: (0, 0))]
    args = [x_img, wk]
    if affine:
        in_specs += [pl.BlockSpec((1, cin), lambda i: (0, 0)),
                     pl.BlockSpec((1, cin), lambda i: (0, 0))]
        args += [scale.reshape(1, cin).astype(jnp.float32),
                 bias.reshape(1, cin).astype(jnp.float32)]

    y, s, q = pl.pallas_call(
        kernel,
        out_shape=(jax.ShapeDtypeStruct((n * h * w, cout), jnp.bfloat16),
                   jax.ShapeDtypeStruct((n, 1, cout), jnp.float32),
                   jax.ShapeDtypeStruct((n, 1, cout), jnp.float32)),
        grid=(n,),
        in_specs=in_specs,
        out_specs=(pl.BlockSpec((h * w, cout), lambda i: (i, 0)),
                   pl.BlockSpec((1, 1, cout), lambda i: (i, 0, 0)),
                   pl.BlockSpec((1, 1, cout), lambda i: (i, 0, 0))),
        scratch_shapes=[pltpu.VMEM((hp, wp, cin), jnp.float32),
                        pltpu.VMEM((h * w, 9 * cin), jnp.bfloat16)],
        compiler_params=pltpu.CompilerParams(
            dimension_semantics=("parallel",),
            vmem_limit_bytes=_vmem_limit_bytes()),
    )(*args)
    # Reduce the per-step partial stats with a tiny XLA sum.
    return y, jnp.sum(s, axis=(0, 1)), jnp.sum(q, axis=(0, 1))


def pallas_matmul_bnstats(a, b):
    """a: (M, K) bf16, b: (K, N) bf16 -> (M, N) bf16 plus per-channel stats."""
    m, kdim = a.shape
    _, ncol = b.shape
    tm = _pick_tile(m, (2048, 1024, 512, 256, 128, 64, 32, 16),
                    prefer_split=True, multiple=16)
    tk = _k_tile(kdim)
    gi, gk = m // tm, kdim // tk
    y, s, q = pl.pallas_call(
        _mm_stats_kernel,
        out_shape=(jax.ShapeDtypeStruct((m, ncol), jnp.bfloat16),
                   jax.ShapeDtypeStruct((gi, 1, ncol), jnp.float32),
                   jax.ShapeDtypeStruct((gi, 1, ncol), jnp.float32)),
        grid=(gi, gk),
        in_specs=[pl.BlockSpec((tm, tk), lambda i, k: (i, k)),
                  pl.BlockSpec((tk, ncol), lambda i, k: (k, 0))],
        out_specs=(pl.BlockSpec((tm, ncol), lambda i, k: (i, 0)),
                   pl.BlockSpec((1, 1, ncol), lambda i, k: (i, 0, 0)),
                   pl.BlockSpec((1, 1, ncol), lambda i, k: (i, 0, 0))),
        scratch_shapes=[pltpu.VMEM((tm, ncol), jnp.float32)],
        compiler_params=pltpu.CompilerParams(
            dimension_semantics=("parallel", "arbitrary"),
            vmem_limit_bytes=_vmem_limit_bytes()),
    )(a, b)
    return y, jnp.sum(s, axis=(0, 1)), jnp.sum(q, axis=(0, 1))


def pallas_residual_bn_add_relu(x, scale, bias, res, rscale, rbias):
    """out = relu(x*scale+bias + res*rscale+rbias), per-channel affines fused,
    lane-dense (rows, 128) view, bf16 inputs, f32 output."""
    m, c = x.shape
    rows, lanes, rep = _dense_layout(m, c)
    xv = x.reshape(rows, lanes)
    rv = res.reshape(rows, lanes)

    def vec(v):
        return jnp.tile(v.astype(jnp.float32), rep).reshape(1, lanes)

    tm = _pick_tile(rows, (4096, 2048, 1024, 512, 256, 128, 64, 32, 16),
                    prefer_split=True, multiple=16)
    out = pl.pallas_call(
        _residual_kernel,
        out_shape=jax.ShapeDtypeStruct((rows, lanes), jnp.float32),
        grid=(rows // tm,),
        in_specs=[pl.BlockSpec((tm, lanes), lambda i: (i, 0)),
                  pl.BlockSpec((1, lanes), lambda i: (0, 0)),
                  pl.BlockSpec((1, lanes), lambda i: (0, 0)),
                  pl.BlockSpec((tm, lanes), lambda i: (i, 0)),
                  pl.BlockSpec((1, lanes), lambda i: (0, 0)),
                  pl.BlockSpec((1, lanes), lambda i: (0, 0))],
        out_specs=pl.BlockSpec((tm, lanes), lambda i: (i, 0)),
        compiler_params=pltpu.CompilerParams(
            dimension_semantics=("parallel",),
            vmem_limit_bytes=_vmem_limit_bytes()),
    )(xv, vec(scale), vec(bias), rv, vec(rscale), vec(rbias))
    return out.reshape(m, c)


# ---------------------------------------------------------------------------
# Glue: im2col fallback, BatchNorm scalar math, weight prep, forward
# ---------------------------------------------------------------------------
def _im2col_3x3(x_nhwc, stride):
    n, h, w, c = x_nhwc.shape
    ho = (h + 2 - 3) // stride + 1
    wo = (w + 2 - 3) // stride + 1
    xp = jnp.pad(x_nhwc, ((0, 0), (1, 1), (1, 1), (0, 0)))
    cols = []
    for ki in range(3):
        for kj in range(3):
            cols.append(xp[:, ki:ki + stride * (ho - 1) + 1:stride,
                           kj:kj + stride * (wo - 1) + 1:stride, :])
    patches = jnp.stack(cols, axis=3)                    # (N, Ho, Wo, 9, C)
    return patches.reshape(n * ho * wo, 9 * c), (n, ho, wo)


def _bn_scale_bias(col_sum, col_sumsq, count, gamma, beta, eps=1e-5):
    # Training-mode BatchNorm: biased variance over (N, H, W).
    mean = col_sum / count
    var = jnp.maximum(col_sumsq / count - mean * mean, 0.0)
    scale = gamma * jax.lax.rsqrt(var + eps)
    bias = beta - mean * scale
    return scale, bias


def prepare_params(raw):
    """One-time weight prep: OIHW f32 -> (9*Cin, Cout) bf16 kernel layout
    (hoisted out of the per-call forward path)."""
    p = dict(raw)
    cout, cin = raw["w1"].shape[0], raw["w1"].shape[1]
    p["w1"] = (jnp.transpose(raw["w1"], (2, 3, 1, 0))
               .reshape(9 * cin, cout).astype(jnp.bfloat16))
    p["w2"] = (jnp.transpose(raw["w2"], (2, 3, 1, 0))
               .reshape(9 * cout, cout).astype(jnp.bfloat16))
    if "wsc" in raw:
        p["wsc"] = (jnp.transpose(raw["wsc"], (2, 3, 1, 0))
                    .reshape(cin, cout).astype(jnp.bfloat16))
    return p


def residual_block_forward(x_nchw, params, stride):
    x = jnp.transpose(x_nchw, (0, 2, 3, 1)).astype(jnp.float32)   # -> NHWC
    n, h, w, cin = x.shape
    cout = params["g1"].shape[0]
    ho = (h - 1) // stride + 1
    wo = (w - 1) // stride + 1
    m = n * ho * wo
    x_bf16 = x.astype(jnp.bfloat16)

    # --- conv1 (stride s): raw bf16 output + fused per-channel BN stats ---
    if stride == 1 and (h * w) % 8 == 0:
        c1, s1, q1 = _pallas_conv3x3_direct(
            x_bf16, params["w1"], None, None, n, h, w, cin, cout)
    else:
        # TODO(synk): strided-tap direct-conv kernel; stride != 1 still goes
        # through an HBM im2col slab + the Pallas matmul kernel.
        patches, _ = _im2col_3x3(x_bf16, stride)
        c1, s1, q1 = pallas_matmul_bnstats(patches, params["w1"])
    sc1, bi1 = _bn_scale_bias(s1, q1, m, params["g1"], params["b1"])

    # --- conv2 (stride 1): BN1 affine + ReLU fused into its input path ---
    # TODO(synk): conv2 assumes (Ho*Wo) % 8 == 0 (true here); add an im2col
    # fallback for odd spatial sizes.
    c1_img = c1.reshape(n, ho, wo, cout)                  # free bitcast
    c2, s2, q2 = _pallas_conv3x3_direct(
        c1_img, params["w2"], sc1, bi1, n, ho, wo, cout, cout)
    sc2, bi2 = _bn_scale_bias(s2, q2, m, params["g2"], params["b2"])

    # --- shortcut ---
    if stride != 1 or cin != cout:
        # TODO(synk): the stride-2 shortcut still uses an XLA strided gather.
        xs = x_bf16[:, ::stride, ::stride, :].reshape(m, cin)
        csc, ss, qs = pallas_matmul_bnstats(xs, params["wsc"])
        scs, bis = _bn_scale_bias(ss, qs, m, params["gsc"], params["bsc"])
        shortcut = csc
    else:
        shortcut = x_bf16.reshape(m, cout)
        scs = jnp.ones((cout,), jnp.float32)
        bis = jnp.zeros((cout,), jnp.float32)

    # --- fused: BN2 affine + shortcut BN affine + add + ReLU ---
    out = pallas_residual_bn_add_relu(c2, sc2, bi2, shortcut, scs, bis)
    return jnp.transpose(out.reshape(n, ho, wo, cout), (0, 3, 1, 2))  # NCHW


# ---------------------------------------------------------------------------
# Pure-JAX reference (for correctness check)
# ---------------------------------------------------------------------------
def reference_forward(x, params, stride):
    def conv(x_, w, st, pad):
        return jax.lax.conv_general_dilated(
            x_, w, (st, st), [(pad, pad), (pad, pad)],
            dimension_numbers=("NCHW", "OIHW", "NCHW"))

    def bn(x_, g, b, eps=1e-5):
        mean = x_.mean(axis=(0, 2, 3), keepdims=True)
        var = x_.var(axis=(0, 2, 3), keepdims=True)   # biased (training BN)
        xn = (x_ - mean) * jax.lax.rsqrt(var + eps)
        return xn * g[None, :, None, None] + b[None, :, None, None]

    cin, cout = x.shape[1], params["w1"].shape[0]
    y = conv(x, params["w1"], stride, 1)
    y = jax.nn.relu(bn(y, params["g1"], params["b1"]))
    y = conv(y, params["w2"], 1, 1)
    y = bn(y, params["g2"], params["b2"])
    if stride != 1 or cin != cout:
        s = conv(x, params["wsc"], stride, 0)
        s = bn(s, params["gsc"], params["bsc"])
    else:
        s = x
    return jax.nn.relu(y + s)


# ---------------------------------------------------------------------------
# Main
# ---------------------------------------------------------------------------
if __name__ == "__main__":
    N, CIN, COUT, H, W, STRIDE = 2, 4, 8, 16, 16, 1   # cin != cout -> 1x1 shortcut

    ks = jax.random.split(jax.random.PRNGKey(0), 10)
    params = {
        "w1": 0.1 * jax.random.normal(ks[0], (COUT, CIN, 3, 3), jnp.float32),
        "g1": 1.0 + 0.1 * jax.random.normal(ks[1], (COUT,), jnp.float32),
        "b1": 0.1 * jax.random.normal(ks[2], (COUT,), jnp.float32),
        "w2": 0.1 * jax.random.normal(ks[3], (COUT, COUT, 3, 3), jnp.float32),
        "g2": 1.0 + 0.1 * jax.random.normal(ks[4], (COUT,), jnp.float32),
        "b2": 0.1 * jax.random.normal(ks[5], (COUT,), jnp.float32),
        "wsc": 0.1 * jax.random.normal(ks[6], (COUT, CIN, 1, 1), jnp.float32),
        "gsc": 1.0 + 0.1 * jax.random.normal(ks[7], (COUT,), jnp.float32),
        "bsc": 0.1 * jax.random.normal(ks[8], (COUT,), jnp.float32),
    }
    x = jax.random.normal(ks[9], (N, CIN, H, W), jnp.float32)

    kparams = prepare_params(params)   # weight layout / bf16 prep hoisted out
    fwd = jax.jit(functools.partial(residual_block_forward, stride=STRIDE))
    ref_fn = jax.jit(functools.partial(reference_forward, stride=STRIDE))

    out = jax.block_until_ready(fwd(x, kparams))
    ref = jax.block_until_ready(ref_fn(x, params))

    assert out.shape == ref.shape, (out.shape, ref.shape)
    max_err = float(jnp.max(jnp.abs(out - ref)))
    mean_err = float(jnp.mean(jnp.abs(out - ref)))
    # bf16 MXU inputs + bf16 intermediate slabs (f32 accumulation / stats)
    # -> wider tolerance than an all-f32 pipeline.
    assert max_err < 1e-1, f"max abs error {max_err}"
    assert mean_err < 2e-2, f"mean abs error {mean_err}"
    print("KERNEL_OK")
</pallas_src>

<mosaic_0001>
module attributes {stable_mosaic.version = 11 : i64} {
  func.func @_mm_stats_kernel(%arg0: i32, %arg1: i32, %arg2: memref<256x4xbf16, #tpu.memory_space<vmem>>, %arg3: memref<4x8xbf16, #tpu.memory_space<vmem>>, %arg4: memref<256x8xbf16, #tpu.memory_space<vmem>>, %arg5: memref<1x1x8xf32, #tpu.memory_space<vmem>>, %arg6: memref<1x1x8xf32, #tpu.memory_space<vmem>>, %arg7: memref<256x8xf32, #tpu.memory_space<vmem>>) attributes {dimension_semantics = [#tpu.dimension_semantics<parallel>, #tpu.dimension_semantics<arbitrary>], iteration_bounds = array<i64: 2, 1>, scalar_prefetch = 0 : i64, scratch_operands = 1 : i64, tpu.core_type = #tpu.core_type<tc>, window_params = [{transform_indices = @transform_0, window_bounds = array<i64: 256, 4>}, {transform_indices = @transform_1, window_bounds = array<i64: 4, 8>}, {transform_indices = @transform_2, window_bounds = array<i64: 256, 8>}, {transform_indices = @transform_3, window_bounds = array<i64: 1, 1, 8>}, {transform_indices = @transform_4, window_bounds = array<i64: 1, 1, 8>}]} {
    %c0_i32 = arith.constant 0 : i32
    %0 = arith.cmpi eq, %arg1, %c0_i32 : i32
    %1 = arith.extui %0 : i1 to i32
    %c0_i32_0 = arith.constant 0 : i32
    %2 = arith.cmpi ne, %1, %c0_i32_0 : i32
    scf.if %2 {
      %cst_10 = arith.constant 0.000000e+00 : f32
      %12 = vector.broadcast %cst_10 : f32 to vector<256x8xf32>
      %c0_11 = arith.constant 0 : index
      %c0_12 = arith.constant 0 : index
      %13 = vector.load %arg7[%c0_11, %c0_12] : memref<256x8xf32, #tpu.memory_space<vmem>>, vector<256x8xf32>
      tpu.vector_store %arg7[%c0_11, %c0_12], %12 {strides = array<i32>} : memref<256x8xf32, #tpu.memory_space<vmem>>, vector<256x8xf32>,
    } else {
    }
    %c0 = arith.constant 0 : index
    %c0_1 = arith.constant 0 : index
    %3 = vector.load %arg7[%c0, %c0_1] : memref<256x8xf32, #tpu.memory_space<vmem>>, vector<256x8xf32>
    %c0_2 = arith.constant 0 : index
    %c0_3 = arith.constant 0 : index
    %4 = vector.load %arg2[%c0_2, %c0_3] : memref<256x4xbf16, #tpu.memory_space<vmem>>, vector<256x4xbf16>
    %c0_4 = arith.constant 0 : index
    %c0_5 = arith.constant 0 : index
    %5 = vector.load %arg3[%c0_4, %c0_5] : memref<4x8xbf16, #tpu.memory_space<vmem>>, vector<4x8xbf16>
    %cst = arith.constant dense<0.000000e+00> : vector<256x8xf32>
    %6 = tpu.matmul %4, %5, %cst {dimension_numbers = #tpu.dot_dimension_numbers<[1], [0], [0], [1], [0, 0, 1, 1], [], []>} : vector<256x4xbf16>, vector<4x8xbf16>, vector<256x8xf32> -> vector<256x8xf32>
    %7 = arith.addf %3, %6 : vector<256x8xf32>
    %c0_6 = arith.constant 0 : index
    %c0_7 = arith.constant 0 : index
    %8 = vector.load %arg7[%c0_6, %c0_7] : memref<256x8xf32, #tpu.memory_space<vmem>>, vector<256x8xf32>
    tpu.vector_store %arg7[%c0_6, %c0_7], %7 {strides = array<i32>} : memref<256x8xf32, #tpu.memory_space<vmem>>, vector<256x8xf32>,
    %c0_i32_8 = arith.constant 0 : i32
    %9 = arith.cmpi eq, %arg1, %c0_i32_8 : i32
    %10 = arith.extui %9 : i1 to i32
    %c0_i32_9 = arith.constant 0 : i32
    %11 = arith.cmpi ne, %10, %c0_i32_9 : i32
    scf.if %11 {
      %c0_10 = arith.constant 0 : index
      %c0_11 = arith.constant 0 : index
      %12 = vector.load %arg7[%c0_10, %c0_11] : memref<256x8xf32, #tpu.memory_space<vmem>>, vector<256x8xf32>
      %13 = arith.truncf %12 : vector<256x8xf32> to vector<256x8xbf16>
      %c0_12 = arith.constant 0 : index
      %c0_13 = arith.constant 0 : index
      %14 = vector.load %arg4[%c0_12, %c0_13] : memref<256x8xbf16, #tpu.memory_space<vmem>>, vector<256x8xbf16>
      tpu.vector_store %arg4[%c0_12, %c0_13], %13 {strides = array<i32>} : memref<256x8xbf16, #tpu.memory_space<vmem>>, vector<256x8xbf16>,
      %cst_14 = arith.constant dense<0.000000e+00> : vector<8xf32>
      %15 = vector.multi_reduction <add>, %12, %cst_14 [0] : vector<256x8xf32> to vector<8xf32>
      %16 = vector.shape_cast %15 : vector<8xf32> to vector<1x8xf32>
      %17 = vector.shape_cast %16 : vector<1x8xf32> to vector<1x1x8xf32>
      %c0_15 = arith.constant 0 : index
      %c0_16 = arith.constant 0 : index
      %c0_17 = arith.constant 0 : index
      %18 = vector.load %arg5[%c0_15, %c0_16, %c0_17] : memref<1x1x8xf32, #tpu.memory_space<vmem>>, vector<1x1x8xf32>
      tpu.vector_store %arg5[%c0_15, %c0_16, %c0_17], %17 {strides = array<i32>} : memref<1x1x8xf32, #tpu.memory_space<vmem>>, vector<1x1x8xf32>,
      %19 = arith.mulf %12, %12 : vector<256x8xf32>
      %cst_18 = arith.constant dense<0.000000e+00> : vector<8xf32>
      %20 = vector.multi_reduction <add>, %19, %cst_18 [0] : vector<256x8xf32> to vector<8xf32>
      %21 = vector.shape_cast %20 : vector<8xf32> to vector<1x8xf32>
      %22 = vector.shape_cast %21 : vector<1x8xf32> to vector<1x1x8xf32>
      %c0_19 = arith.constant 0 : index
      %c0_20 = arith.constant 0 : index
      %c0_21 = arith.constant 0 : index
      %23 = vector.load %arg6[%c0_19, %c0_20, %c0_21] : memref<1x1x8xf32, #tpu.memory_space<vmem>>, vector<1x1x8xf32>
      tpu.vector_store %arg6[%c0_19, %c0_20, %c0_21], %22 {strides = array<i32>} : memref<1x1x8xf32, #tpu.memory_space<vmem>>, vector<1x1x8xf32>,
    } else {
    }
    return
  }
  func.func @transform_0(%arg0: i32, %arg1: i32) -> (i32, i32) {
    %c0_i32 = arith.constant 0 : i32
    return %arg0, %arg1 : i32, i32
  }
  func.func @transform_1(%arg0: i32, %arg1: i32) -> (i32, i32) {
    %c0_i32 = arith.constant 0 : i32
    %c0_i32_0 = arith.constant 0 : i32
    return %arg1, %c0_i32 : i32, i32
  }
  func.func @transform_2(%arg0: i32, %arg1: i32) -> (i32, i32) {
    %c0_i32 = arith.constant 0 : i32
    %c0_i32_0 = arith.constant 0 : i32
    return %arg0, %c0_i32 : i32, i32
  }
  func.func @transform_3(%arg0: i32, %arg1: i32) -> (i32, i32, i32) {
    %c0_i32 = arith.constant 0 : i32
    %c0_i32_0 = arith.constant 0 : i32
    %c0_i32_1 = arith.constant 0 : i32
    return %arg0, %c0_i32, %c0_i32_0 : i32, i32, i32
  }
  func.func @transform_4(%arg0: i32, %arg1: i32) -> (i32, i32, i32) {
    %c0_i32 = arith.constant 0 : i32
    %c0_i32_0 = arith.constant 0 : i32
    %c0_i32_1 = arith.constant 0 : i32
    return %arg0, %c0_i32, %c0_i32_0 : i32, i32, i32
  }
}

module attributes {stable_mosaic.version = 11 : i64} {
  func.func @_conv3x3_s1_kernel(%arg0: i32, %arg1: memref<1x16x16x4xbf16, #tpu.memory_space<vmem>>, %arg2: memref<36x8xbf16, #tpu.memory_space<vmem>>, %arg3: memref<256x8xbf16, #tpu.memory_space<vmem>>, %arg4: memref<1x1x8xf32, #tpu.memory_space<vmem>>, %arg5: memref<1x1x8xf32, #tpu.memory_space<vmem>>, %arg6: memref<18x18x4xf32, #tpu.memory_space<vmem>>, %arg7: memref<256x36xbf16, #tpu.memory_space<vmem>>) attributes {dimension_semantics = [#tpu.dimension_semantics<parallel>], iteration_bounds = array<i64: 2>, scalar_prefetch = 0 : i64, scratch_operands = 2 : i64, tpu.core_type = #tpu.core_type<tc>, window_params = [{transform_indices = @transform_0, window_bounds = array<i64: 1, 16, 16, 4>}, {pipeline_mode = #tpu.pipeline_mode<synchronous>, transform_indices = @transform_1, window_bounds = array<i64: 36, 8>}, {transform_indices = @transform_2, window_bounds = array<i64: 256, 8>}, {transform_indices = @transform_3, window_bounds = array<i64: 1, 1, 8>}, {transform_indices = @transform_4, window_bounds = array<i64: 1, 1, 8>}]} {
    %cst = arith.constant 0.000000e+00 : f32
    %0 = vector.broadcast %cst : f32 to vector<18x18x4xf32>
    %c0 = arith.constant 0 : index
    %c0_0 = arith.constant 0 : index
    %c0_1 = arith.constant 0 : index
    %1 = vector.load %arg6[%c0, %c0_0, %c0_1] : memref<18x18x4xf32, #tpu.memory_space<vmem>>, vector<18x18x4xf32>
    tpu.vector_store %arg6[%c0, %c0_0, %c0_1], %0 {strides = array<i32>} : memref<18x18x4xf32, #tpu.memory_space<vmem>>, vector<18x18x4xf32>,
    %c0_2 = arith.constant 0 : index
    %c0_3 = arith.constant 0 : index
    %c0_4 = arith.constant 0 : index
    %c0_5 = arith.constant 0 : index
    %2 = vector.load %arg1[%c0_2, %c0_3, %c0_4, %c0_5] : memref<1x16x16x4xbf16, #tpu.memory_space<vmem>>, vector<1x16x16x4xbf16>
    %3 = vector.shape_cast %2 : vector<1x16x16x4xbf16> to vector<16x16x4xbf16>
    %4 = arith.extf %3 : vector<16x16x4xbf16> to vector<16x16x4xf32>
    %c1 = arith.constant 1 : index
    %c1_6 = arith.constant 1 : index
    %c0_7 = arith.constant 0 : index
    %5 = vector.load %arg6[%c1, %c1_6, %c0_7] : memref<18x18x4xf32, #tpu.memory_space<vmem>>, vector<16x16x4xf32>
    tpu.vector_store %arg6[%c1, %c1_6, %c0_7], %4 {strides = array<i32>} : memref<18x18x4xf32, #tpu.memory_space<vmem>>, vector<16x16x4xf32>,
    %c0_8 = arith.constant 0 : index
    %c0_9 = arith.constant 0 : index
    %c0_10 = arith.constant 0 : index
    %6 = vector.load %arg6[%c0_8, %c0_9, %c0_10] : memref<18x18x4xf32, #tpu.memory_space<vmem>>, vector<16x16x4xf32>
    %7 = vector.shape_cast %6 : vector<16x16x4xf32> to vector<256x4xf32>
    %8 = arith.truncf %7 : vector<256x4xf32> to vector<256x4xbf16>
    %c0_11 = arith.constant 0 : index
    %c0_12 = arith.constant 0 : index
    %9 = vector.load %arg7[%c0_11, %c0_12] : memref<256x36xbf16, #tpu.memory_space<vmem>>, vector<256x4xbf16>
    tpu.vector_store %arg7[%c0_11, %c0_12], %8 {strides = array<i32>} : memref<256x36xbf16, #tpu.memory_space<vmem>>, vector<256x4xbf16>,
    %c0_13 = arith.constant 0 : index
    %c1_14 = arith.constant 1 : index
    %c0_15 = arith.constant 0 : index
    %10 = vector.load %arg6[%c0_13, %c1_14, %c0_15] : memref<18x18x4xf32, #tpu.memory_space<vmem>>, vector<16x16x4xf32>
    %11 = vector.shape_cast %10 : vector<16x16x4xf32> to vector<256x4xf32>
    %12 = arith.truncf %11 : vector<256x4xf32> to vector<256x4xbf16>
    %c0_16 = arith.constant 0 : index
    %c4 = arith.constant 4 : index
    %13 = vector.load %arg7[%c0_16, %c4] : memref<256x36xbf16, #tpu.memory_space<vmem>>, vector<256x4xbf16>
    tpu.vector_store %arg7[%c0_16, %c4], %12 {strides = array<i32>} : memref<256x36xbf16, #tpu.memory_space<vmem>>, vector<256x4xbf16>,
    %c0_17 = arith.constant 0 : index
    %c2 = arith.constant 2 : index
    %c0_18 = arith.constant 0 : index
    %14 = vector.load %arg6[%c0_17, %c2, %c0_18] : memref<18x18x4xf32, #tpu.memory_space<vmem>>, vector<16x16x4xf32>
    %15 = vector.shape_cast %14 : vector<16x16x4xf32> to vector<256x4xf32>
    %16 = arith.truncf %15 : vector<256x4xf32> to vector<256x4xbf16>
    %c0_19 = arith.constant 0 : index
    %c8 = arith.constant 8 : index
    %17 = vector.load %arg7[%c0_19, %c8] : memref<256x36xbf16, #tpu.memory_space<vmem>>, vector<256x4xbf16>
    tpu.vector_store %arg7[%c0_19, %c8], %16 {strides = array<i32>} : memref<256x36xbf16, #tpu.memory_space<vmem>>, vector<256x4xbf16>,
    %c1_20 = arith.constant 1 : index
    %c0_21 = arith.constant 0 : index
    %c0_22 = arith.constant 0 : index
    %18 = vector.load %arg6[%c1_20, %c0_21, %c0_22] : memref<18x18x4xf32, #tpu.memory_space<vmem>>, vector<16x16x4xf32>
    %19 = vector.shape_cast %18 : vector<16x16x4xf32> to vector<256x4xf32>
    %20 = arith.truncf %19 : vector<256x4xf32> to vector<256x4xbf16>
    %c0_23 = arith.constant 0 : index
    %c12 = arith.constant 12 : index
    %21 = vector.load %arg7[%c0_23, %c12] : memref<256x36xbf16, #tpu.memory_space<vmem>>, vector<256x4xbf16>
    tpu.vector_store %arg7[%c0_23, %c12], %20 {strides = array<i32>} : memref<256x36xbf16, #tpu.memory_space<vmem>>, vector<256x4xbf16>,
    %c1_24 = arith.constant 1 : index
    %c1_25 = arith.constant 1 : index
    %c0_26 = arith.constant 0 : index
    %22 = vector.load %arg6[%c1_24, %c1_25, %c0_26] : memref<18x18x4xf32, #tpu.memory_space<vmem>>, vector<16x16x4xf32>
    %23 = vector.shape_cast %22 : vector<16x16x4xf32> to vector<256x4xf32>
    %24 = arith.truncf %23 : vector<256x4xf32> to vector<256x4xbf16>
    %c0_27 = arith.constant 0 : index
    %c16 = arith.constant 16 : index
    %25 = vector.load %arg7[%c0_27, %c16] : memref<256x36xbf16, #tpu.memory_space<vmem>>, vector<256x4xbf16>
    tpu.vector_store %arg7[%c0_27, %c16], %24 {strides = array<i32>} : memref<256x36xbf16, #tpu.memory_space<vmem>>, vector<256x4xbf16>,
    %c1_28 = arith.constant 1 : index
    %c2_29 = arith.constant 2 : index
    %c0_30 = arith.constant 0 : index
    %26 = vector.load %arg6[%c1_28, %c2_29, %c0_30] : memref<18x18x4xf32, #tpu.memory_space<vmem>>, vector<16x16x4xf32>
    %27 = vector.shape_cast %26 : vector<16x16x4xf32> to vector<256x4xf32>
    %28 = arith.truncf %27 : vector<256x4xf32> to vector<256x4xbf16>
    %c0_31 = arith.constant 0 : index
    %c20 = arith.constant 20 : index
    %29 = vector.load %arg7[%c0_31, %c20] : memref<256x36xbf16, #tpu.memory_space<vmem>>, vector<256x4xbf16>
    tpu.vector_store %arg7[%c0_31, %c20], %28 {strides = array<i32>} : memref<256x36xbf16, #tpu.memory_space<vmem>>, vector<256x4xbf16>,
    %c2_32 = arith.constant 2 : index
    %c0_33 = arith.constant 0 : index
    %c0_34 = arith.constant 0 : index
    %30 = vector.load %arg6[%c2_32, %c0_33, %c0_34] : memref<18x18x4xf32, #tpu.memory_space<vmem>>, vector<16x16x4xf32>
    %31 = vector.shape_cast %30 : vector<16x16x4xf32> to vector<256x4xf32>
    %32 = arith.truncf %31 : vector<256x4xf32> to vector<256x4xbf16>
    %c0_35 = arith.constant 0 : index
    %c24 = arith.constant 24 : index
    %33 = vector.load %arg7[%c0_35, %c24] : memref<256x36xbf16, #tpu.memory_space<vmem>>, vector<256x4xbf16>
    tpu.vector_store %arg7[%c0_35, %c24], %32 {strides = array<i32>} : memref<256x36xbf16, #tpu.memory_space<vmem>>, vector<256x4xbf16>,
    %c2_36 = arith.constant 2 : index
    %c1_37 = arith.constant 1 : index
    %c0_38 = arith.constant 0 : index
    %34 = vector.load %arg6[%c2_36, %c1_37, %c0_38] : memref<18x18x4xf32, #tpu.memory_space<vmem>>, vector<16x16x4xf32>
    %35 = vector.shape_cast %34 : vector<16x16x4xf32> to vector<256x4xf32>
    %36 = arith.truncf %35 : vector<256x4xf32> to vector<256x4xbf16>
    %c0_39 = arith.constant 0 : index
    %c28 = arith.constant 28 : index
    %37 = vector.load %arg7[%c0_39, %c28] : memref<256x36xbf16, #tpu.memory_space<vmem>>, vector<256x4xbf16>
    tpu.vector_store %arg7[%c0_39, %c28], %36 {strides = array<i32>} : memref<256x36xbf16, #tpu.memory_space<vmem>>, vector<256x4xbf16>,
    %c2_40 = arith.constant 2 : index
    %c2_41 = arith.constant 2 : index
    %c0_42 = arith.constant 0 : index
    %38 = vector.load %arg6[%c2_40, %c2_41, %c0_42] : memref<18x18x4xf32, #tpu.memory_space<vmem>>, vector<16x16x4xf32>
    %39 = vector.shape_cast %38 : vector<16x16x4xf32> to vector<256x4xf32>
    %40 = arith.truncf %39 : vector<256x4xf32> to vector<256x4xbf16>
    %c0_43 = arith.constant 0 : index
    %c32 = arith.constant 32 : index
    %41 = vector.load %arg7[%c0_43, %c32] : memref<256x36xbf16, #tpu.memory_space<vmem>>, vector<256x4xbf16>
    tpu.vector_store %arg7[%c0_43, %c32], %40 {strides = array<i32>} : memref<256x36xbf16, #tpu.memory_space<vmem>>, vector<256x4xbf16>,
    %c0_44 = arith.constant 0 : index
    %c0_45 = arith.constant 0 : index
    %42 = vector.load %arg7[%c0_44, %c0_45] : memref<256x36xbf16, #tpu.memory_space<vmem>>, vector<256x36xbf16>
    %c0_46 = arith.constant 0 : index
    %c0_47 = arith.constant 0 : index
    %43 = vector.load %arg2[%c0_46, %c0_47] : memref<36x8xbf16, #tpu.memory_space<vmem>>, vector<36x8xbf16>
    %cst_48 = arith.constant dense<0.000000e+00> : vector<256x8xf32>
    %44 = tpu.matmul %42, %43, %cst_48 {dimension_numbers = #tpu.dot_dimension_numbers<[1], [0], [0], [1], [0, 0, 1, 1], [], []>} : vector<256x36xbf16>, vector<36x8xbf16>, vector<256x8xf32> -> vector<256x8xf32>
    %45 = arith.truncf %44 : vector<256x8xf32> to vector<256x8xbf16>
    %c0_49 = arith.constant 0 : index
    %c0_50 = arith.constant 0 : index
    %46 = vector.load %arg3[%c0_49, %c0_50] : memref<256x8xbf16, #tpu.memory_space<vmem>>, vector<256x8xbf16>
    tpu.vector_store %arg3[%c0_49, %c0_50], %45 {strides = array<i32>} : memref<256x8xbf16, #tpu.memory_space<vmem>>, vector<256x8xbf16>,
    %cst_51 = arith.constant dense<0.000000e+00> : vector<8xf32>
    %47 = vector.multi_reduction <add>, %44, %cst_51 [0] : vector<256x8xf32> to vector<8xf32>
    %48 = vector.shape_cast %47 : vector<8xf32> to vector<1x8xf32>
    %49 = vector.shape_cast %48 : vector<1x8xf32> to vector<1x1x8xf32>
    %c0_52 = arith.constant 0 : index
    %c0_53 = arith.constant 0 : index
    %c0_54 = arith.constant 0 : index
    %50 = vector.load %arg4[%c0_52, %c0_53, %c0_54] : memref<1x1x8xf32, #tpu.memory_space<vmem>>, vector<1x1x8xf32>
    tpu.vector_store %arg4[%c0_52, %c0_53, %c0_54], %49 {strides = array<i32>} : memref<1x1x8xf32, #tpu.memory_space<vmem>>, vector<1x1x8xf32>,
    %51 = arith.mulf %44, %44 : vector<256x8xf32>
    %cst_55 = arith.constant dense<0.000000e+00> : vector<8xf32>
    %52 = vector.multi_reduction <add>, %51, %cst_55 [0] : vector<256x8xf32> to vector<8xf32>
    %53 = vector.shape_cast %52 : vector<8xf32> to vector<1x8xf32>
    %54 = vector.shape_cast %53 : vector<1x8xf32> to vector<1x1x8xf32>
    %c0_56 = arith.constant 0 : index
    %c0_57 = arith.constant 0 : index
    %c0_58 = arith.constant 0 : index
    %55 = vector.load %arg5[%c0_56, %c0_57, %c0_58] : memref<1x1x8xf32, #tpu.memory_space<vmem>>, vector<1x1x8xf32>
    tpu.vector_store %arg5[%c0_56, %c0_57, %c0_58], %54 {strides = array<i32>} : memref<1x1x8xf32, #tpu.memory_space<vmem>>, vector<1x1x8xf32>,
    return
  }
  func.func @transform_0(%arg0: i32) -> (i32, i32, i32, i32) {
    %c0_i32 = arith.constant 0 : i32
    %c0_i32_0 = arith.constant 0 : i32
    %c0_i32_1 = arith.constant 0 : i32
    %c0_i32_2 = arith.constant 0 : i32
    return %arg0, %c0_i32, %c0_i32_0, %c0_i32_1 : i32, i32, i32, i32
  }
  func.func @transform_1(%arg0: i32) -> (i32, i32) {
    %c0_i32 = arith.constant 0 : i32
    %c0_i32_0 = arith.constant 0 : i32
    %c0_i32_1 = arith.constant 0 : i32
    return %c0_i32, %c0_i32_0 : i32, i32
  }
  func.func @transform_2(%arg0: i32) -> (i32, i32) {
    %c0_i32 = arith.constant 0 : i32
    %c0_i32_0 = arith.constant 0 : i32
    return %arg0, %c0_i32 : i32, i32
  }
  func.func @transform_3(%arg0: i32) -> (i32, i32, i32) {
    %c0_i32 = arith.constant 0 : i32
    %c0_i32_0 = arith.constant 0 : i32
    %c0_i32_1 = arith.constant 0 : i32
    return %arg0, %c0_i32, %c0_i32_0 : i32, i32, i32
  }
  func.func @transform_4(%arg0: i32) -> (i32, i32, i32) {
    %c0_i32 = arith.constant 0 : i32
    %c0_i32_0 = arith.constant 0 : i32
    %c0_i32_1 = arith.constant 0 : i32
    return %arg0, %c0_i32, %c0_i32_0 : i32, i32, i32
  }
}

module attributes {stable_mosaic.version = 11 : i64} {
  func.func @_conv3x3_s1_kernel(%arg0: i32, %arg1: memref<1x16x16x8xbf16, #tpu.memory_space<vmem>>, %arg2: memref<72x8xbf16, #tpu.memory_space<vmem>>, %arg3: memref<1x8xf32, #tpu.memory_space<vmem>>, %arg4: memref<1x8xf32, #tpu.memory_space<vmem>>, %arg5: memref<256x8xbf16, #tpu.memory_space<vmem>>, %arg6: memref<1x1x8xf32, #tpu.memory_space<vmem>>, %arg7: memref<1x1x8xf32, #tpu.memory_space<vmem>>, %arg8: memref<18x18x8xf32, #tpu.memory_space<vmem>>, %arg9: memref<256x72xbf16, #tpu.memory_space<vmem>>) attributes {dimension_semantics = [#tpu.dimension_semantics<parallel>], iteration_bounds = array<i64: 2>, scalar_prefetch = 0 : i64, scratch_operands = 2 : i64, tpu.core_type = #tpu.core_type<tc>, window_params = [{transform_indices = @transform_0, window_bounds = array<i64: 1, 16, 16, 8>}, {pipeline_mode = #tpu.pipeline_mode<synchronous>, transform_indices = @transform_1, window_bounds = array<i64: 72, 8>}, {pipeline_mode = #tpu.pipeline_mode<synchronous>, transform_indices = @transform_2, window_bounds = array<i64: 1, 8>}, {pipeline_mode = #tpu.pipeline_mode<synchronous>, transform_indices = @transform_3, window_bounds = array<i64: 1, 8>}, {transform_indices = @transform_4, window_bounds = array<i64: 256, 8>}, {transform_indices = @transform_5, window_bounds = array<i64: 1, 1, 8>}, {transform_indices = @transform_6, window_bounds = array<i64: 1, 1, 8>}]} {
    %cst = arith.constant 0.000000e+00 : f32
    %0 = vector.broadcast %cst : f32 to vector<18x18x8xf32>
    %c0 = arith.constant 0 : index
    %c0_0 = arith.constant 0 : index
    %c0_1 = arith.constant 0 : index
    %1 = vector.load %arg8[%c0, %c0_0, %c0_1] : memref<18x18x8xf32, #tpu.memory_space<vmem>>, vector<18x18x8xf32>
    tpu.vector_store %arg8[%c0, %c0_0, %c0_1], %0 {strides = array<i32>} : memref<18x18x8xf32, #tpu.memory_space<vmem>>, vector<18x18x8xf32>,
    %c0_2 = arith.constant 0 : index
    %c0_3 = arith.constant 0 : index
    %c0_4 = arith.constant 0 : index
    %c0_5 = arith.constant 0 : index
    %2 = vector.load %arg1[%c0_2, %c0_3, %c0_4, %c0_5] : memref<1x16x16x8xbf16, #tpu.memory_space<vmem>>, vector<1x16x16x8xbf16>
    %3 = vector.shape_cast %2 : vector<1x16x16x8xbf16> to vector<16x16x8xbf16>
    %4 = arith.extf %3 : vector<16x16x8xbf16> to vector<16x16x8xf32>
    %c0_6 = arith.constant 0 : index
    %c0_7 = arith.constant 0 : index
    %5 = vector.load %arg3[%c0_6, %c0_7] : memref<1x8xf32, #tpu.memory_space<vmem>>, vector<1x8xf32>
    %6 = vector.shape_cast %5 : vector<1x8xf32> to vector<1x1x8xf32>
    %7 = vector.broadcast %6 : vector<1x1x8xf32> to vector<16x16x8xf32>
    %8 = arith.mulf %4, %7 : vector<16x16x8xf32>
    %c0_8 = arith.constant 0 : index
    %c0_9 = arith.constant 0 : index
    %9 = vector.load %arg4[%c0_8, %c0_9] : memref<1x8xf32, #tpu.memory_space<vmem>>, vector<1x8xf32>
    %10 = vector.shape_cast %9 : vector<1x8xf32> to vector<1x1x8xf32>
    %11 = vector.broadcast %10 : vector<1x1x8xf32> to vector<16x16x8xf32>
    %12 = arith.addf %8, %11 : vector<16x16x8xf32>
    %cst_10 = arith.constant 0.000000e+00 : f32
    %13 = vector.broadcast %cst_10 : f32 to vector<16x16x8xf32>
    %14 = arith.maximumf %12, %13 : vector<16x16x8xf32>
    %c1 = arith.constant 1 : index
    %c1_11 = arith.constant 1 : index
    %c0_12 = arith.constant 0 : index
    %15 = vector.load %arg8[%c1, %c1_11, %c0_12] : memref<18x18x8xf32, #tpu.memory_space<vmem>>, vector<16x16x8xf32>
    tpu.vector_store %arg8[%c1, %c1_11, %c0_12], %14 {strides = array<i32>} : memref<18x18x8xf32, #tpu.memory_space<vmem>>, vector<16x16x8xf32>,
    %c0_13 = arith.constant 0 : index
    %c0_14 = arith.constant 0 : index
    %c0_15 = arith.constant 0 : index
    %16 = vector.load %arg8[%c0_13, %c0_14, %c0_15] : memref<18x18x8xf32, #tpu.memory_space<vmem>>, vector<16x16x8xf32>
    %17 = vector.shape_cast %16 : vector<16x16x8xf32> to vector<256x8xf32>
    %18 = arith.truncf %17 : vector<256x8xf32> to vector<256x8xbf16>
    %c0_16 = arith.constant 0 : index
    %c0_17 = arith.constant 0 : index
    %19 = vector.load %arg9[%c0_16, %c0_17] : memref<256x72xbf16, #tpu.memory_space<vmem>>, vector<256x8xbf16>
    tpu.vector_store %arg9[%c0_16, %c0_17], %18 {strides = array<i32>} : memref<256x72xbf16, #tpu.memory_space<vmem>>, vector<256x8xbf16>,
    %c0_18 = arith.constant 0 : index
    %c1_19 = arith.constant 1 : index
    %c0_20 = arith.constant 0 : index
    %20 = vector.load %arg8[%c0_18, %c1_19, %c0_20] : memref<18x18x8xf32, #tpu.memory_space<vmem>>, vector<16x16x8xf32>
    %21 = vector.shape_cast %20 : vector<16x16x8xf32> to vector<256x8xf32>
    %22 = arith.truncf %21 : vector<256x8xf32> to vector<256x8xbf16>
    %c0_21 = arith.constant 0 : index
    %c8 = arith.constant 8 : index
    %23 = vector.load %arg9[%c0_21, %c8] : memref<256x72xbf16, #tpu.memory_space<vmem>>, vector<256x8xbf16>
    tpu.vector_store %arg9[%c0_21, %c8], %22 {strides = array<i32>} : memref<256x72xbf16, #tpu.memory_space<vmem>>, vector<256x8xbf16>,
    %c0_22 = arith.constant 0 : index
    %c2 = arith.constant 2 : index
    %c0_23 = arith.constant 0 : index
    %24 = vector.load %arg8[%c0_22, %c2, %c0_23] : memref<18x18x8xf32, #tpu.memory_space<vmem>>, vector<16x16x8xf32>
    %25 = vector.shape_cast %24 : vector<16x16x8xf32> to vector<256x8xf32>
    %26 = arith.truncf %25 : vector<256x8xf32> to vector<256x8xbf16>
    %c0_24 = arith.constant 0 : index
    %c16 = arith.constant 16 : index
    %27 = vector.load %arg9[%c0_24, %c16] : memref<256x72xbf16, #tpu.memory_space<vmem>>, vector<256x8xbf16>
    tpu.vector_store %arg9[%c0_24, %c16], %26 {strides = array<i32>} : memref<256x72xbf16, #tpu.memory_space<vmem>>, vector<256x8xbf16>,
    %c1_25 = arith.constant 1 : index
    %c0_26 = arith.constant 0 : index
    %c0_27 = arith.constant 0 : index
    %28 = vector.load %arg8[%c1_25, %c0_26, %c0_27] : memref<18x18x8xf32, #tpu.memory_space<vmem>>, vector<16x16x8xf32>
    %29 = vector.shape_cast %28 : vector<16x16x8xf32> to vector<256x8xf32>
    %30 = arith.truncf %29 : vector<256x8xf32> to vector<256x8xbf16>
    %c0_28 = arith.constant 0 : index
    %c24 = arith.constant 24 : index
    %31 = vector.load %arg9[%c0_28, %c24] : memref<256x72xbf16, #tpu.memory_space<vmem>>, vector<256x8xbf16>
    tpu.vector_store %arg9[%c0_28, %c24], %30 {strides = array<i32>} : memref<256x72xbf16, #tpu.memory_space<vmem>>, vector<256x8xbf16>,
    %c1_29 = arith.constant 1 : index
    %c1_30 = arith.constant 1 : index
    %c0_31 = arith.constant 0 : index
    %32 = vector.load %arg8[%c1_29, %c1_30, %c0_31] : memref<18x18x8xf32, #tpu.memory_space<vmem>>, vector<16x16x8xf32>
    %33 = vector.shape_cast %32 : vector<16x16x8xf32> to vector<256x8xf32>
    %34 = arith.truncf %33 : vector<256x8xf32> to vector<256x8xbf16>
    %c0_32 = arith.constant 0 : index
    %c32 = arith.constant 32 : index
    %35 = vector.load %arg9[%c0_32, %c32] : memref<256x72xbf16, #tpu.memory_space<vmem>>, vector<256x8xbf16>
    tpu.vector_store %arg9[%c0_32, %c32], %34 {strides = array<i32>} : memref<256x72xbf16, #tpu.memory_space<vmem>>, vector<256x8xbf16>,
    %c1_33 = arith.constant 1 : index
    %c2_34 = arith.constant 2 : index
    %c0_35 = arith.constant 0 : index
    %36 = vector.load %arg8[%c1_33, %c2_34, %c0_35] : memref<18x18x8xf32, #tpu.memory_space<vmem>>, vector<16x16x8xf32>
    %37 = vector.shape_cast %36 : vector<16x16x8xf32> to vector<256x8xf32>
    %38 = arith.truncf %37 : vector<256x8xf32> to vector<256x8xbf16>
    %c0_36 = arith.constant 0 : index
    %c40 = arith.constant 40 : index
    %39 = vector.load %arg9[%c0_36, %c40] : memref<256x72xbf16, #tpu.memory_space<vmem>>, vector<256x8xbf16>
    tpu.vector_store %arg9[%c0_36, %c40], %38 {strides = array<i32>} : memref<256x72xbf16, #tpu.memory_space<vmem>>, vector<256x8xbf16>,
    %c2_37 = arith.constant 2 : index
    %c0_38 = arith.constant 0 : index
    %c0_39 = arith.constant 0 : index
    %40 = vector.load %arg8[%c2_37, %c0_38, %c0_39] : memref<18x18x8xf32, #tpu.memory_space<vmem>>, vector<16x16x8xf32>
    %41 = vector.shape_cast %40 : vector<16x16x8xf32> to vector<256x8xf32>
    %42 = arith.truncf %41 : vector<256x8xf32> to vector<256x8xbf16>
    %c0_40 = arith.constant 0 : index
    %c48 = arith.constant 48 : index
    %43 = vector.load %arg9[%c0_40, %c48] : memref<256x72xbf16, #tpu.memory_space<vmem>>, vector<256x8xbf16>
    tpu.vector_store %arg9[%c0_40, %c48], %42 {strides = array<i32>} : memref<256x72xbf16, #tpu.memory_space<vmem>>, vector<256x8xbf16>,
    %c2_41 = arith.constant 2 : index
    %c1_42 = arith.constant 1 : index
    %c0_43 = arith.constant 0 : index
    %44 = vector.load %arg8[%c2_41, %c1_42, %c0_43] : memref<18x18x8xf32, #tpu.memory_space<vmem>>, vector<16x16x8xf32>
    %45 = vector.shape_cast %44 : vector<16x16x8xf32> to vector<256x8xf32>
    %46 = arith.truncf %45 : vector<256x8xf32> to vector<256x8xbf16>
    %c0_44 = arith.constant 0 : index
    %c56 = arith.constant 56 : index
    %47 = vector.load %arg9[%c0_44, %c56] : memref<256x72xbf16, #tpu.memory_space<vmem>>, vector<256x8xbf16>
    tpu.vector_store %arg9[%c0_44, %c56], %46 {strides = array<i32>} : memref<256x72xbf16, #tpu.memory_space<vmem>>, vector<256x8xbf16>,
    %c2_45 = arith.constant 2 : index
    %c2_46 = arith.constant 2 : index
    %c0_47 = arith.constant 0 : index
    %48 = vector.load %arg8[%c2_45, %c2_46, %c0_47] : memref<18x18x8xf32, #tpu.memory_space<vmem>>, vector<16x16x8xf32>
    %49 = vector.shape_cast %48 : vector<16x16x8xf32> to vector<256x8xf32>
    %50 = arith.truncf %49 : vector<256x8xf32> to vector<256x8xbf16>
    %c0_48 = arith.constant 0 : index
    %c64 = arith.constant 64 : index
    %51 = vector.load %arg9[%c0_48, %c64] : memref<256x72xbf16, #tpu.memory_space<vmem>>, vector<256x8xbf16>
    tpu.vector_store %arg9[%c0_48, %c64], %50 {strides = array<i32>} : memref<256x72xbf16, #tpu.memory_space<vmem>>, vector<256x8xbf16>,
    %c0_49 = arith.constant 0 : index
    %c0_50 = arith.constant 0 : index
    %52 = vector.load %arg9[%c0_49, %c0_50] : memref<256x72xbf16, #tpu.memory_space<vmem>>, vector<256x72xbf16>
    %c0_51 = arith.constant 0 : index
    %c0_52 = arith.constant 0 : index
    %53 = vector.load %arg2[%c0_51, %c0_52] : memref<72x8xbf16, #tpu.memory_space<vmem>>, vector<72x8xbf16>
    %cst_53 = arith.constant dense<0.000000e+00> : vector<256x8xf32>
    %54 = tpu.matmul %52, %53, %cst_53 {dimension_numbers = #tpu.dot_dimension_numbers<[1], [0], [0], [1], [0, 0, 1, 1], [], []>} : vector<256x72xbf16>, vector<72x8xbf16>, vector<256x8xf32> -> vector<256x8xf32>
    %55 = arith.truncf %54 : vector<256x8xf32> to vector<256x8xbf16>
    %c0_54 = arith.constant 0 : index
    %c0_55 = arith.constant 0 : index
    %56 = vector.load %arg5[%c0_54, %c0_55] : memref<256x8xbf16, #tpu.memory_space<vmem>>, vector<256x8xbf16>
    tpu.vector_store %arg5[%c0_54, %c0_55], %55 {strides = array<i32>} : memref<256x8xbf16, #tpu.memory_space<vmem>>, vector<256x8xbf16>,
    %cst_56 = arith.constant dense<0.000000e+00> : vector<8xf32>
    %57 = vector.multi_reduction <add>, %54, %cst_56 [0] : vector<256x8xf32> to vector<8xf32>
    %58 = vector.shape_cast %57 : vector<8xf32> to vector<1x8xf32>
    %59 = vector.shape_cast %58 : vector<1x8xf32> to vector<1x1x8xf32>
    %c0_57 = arith.constant 0 : index
    %c0_58 = arith.constant 0 : index
    %c0_59 = arith.constant 0 : index
    %60 = vector.load %arg6[%c0_57, %c0_58, %c0_59] : memref<1x1x8xf32, #tpu.memory_space<vmem>>, vector<1x1x8xf32>
    tpu.vector_store %arg6[%c0_57, %c0_58, %c0_59], %59 {strides = array<i32>} : memref<1x1x8xf32, #tpu.memory_space<vmem>>, vector<1x1x8xf32>,
    %61 = arith.mulf %54, %54 : vector<256x8xf32>
    %cst_60 = arith.constant dense<0.000000e+00> : vector<8xf32>
    %62 = vector.multi_reduction <add>, %61, %cst_60 [0] : vector<256x8xf32> to vector<8xf32>
    %63 = vector.shape_cast %62 : vector<8xf32> to vector<1x8xf32>
    %64 = vector.shape_cast %63 : vector<1x8xf32> to vector<1x1x8xf32>
    %c0_61 = arith.constant 0 : index
    %c0_62 = arith.constant 0 : index
    %c0_63 = arith.constant 0 : index
    %65 = vector.load %arg7[%c0_61, %c0_62, %c0_63] : memref<1x1x8xf32, #tpu.memory_space<vmem>>, vector<1x1x8xf32>
    tpu.vector_store %arg7[%c0_61, %c0_62, %c0_63], %64 {strides = array<i32>} : memref<1x1x8xf32, #tpu.memory_space<vmem>>, vector<1x1x8xf32>,
    return
  }
  func.func @transform_0(%arg0: i32) -> (i32, i32, i32, i32) {
    %c0_i32 = arith.constant 0 : i32
    %c0_i32_0 = arith.constant 0 : i32
    %c0_i32_1 = arith.constant 0 : i32
    %c0_i32_2 = arith.constant 0 : i32
    return %arg0, %c0_i32, %c0_i32_0, %c0_i32_1 : i32, i32, i32, i32
  }
  func.func @transform_1(%arg0: i32) -> (i32, i32) {
    %c0_i32 = arith.constant 0 : i32
    %c0_i32_0 = arith.constant 0 : i32
    %c0_i32_1 = arith.constant 0 : i32
    return %c0_i32, %c0_i32_0 : i32, i32
  }
  func.func @transform_2(%arg0: i32) -> (i32, i32) {
    %c0_i32 = arith.constant 0 : i32
    %c0_i32_0 = arith.constant 0 : i32
    %c0_i32_1 = arith.constant 0 : i32
    return %c0_i32, %c0_i32_0 : i32, i32
  }
  func.func @transform_3(%arg0: i32) -> (i32, i32) {
    %c0_i32 = arith.constant 0 : i32
    %c0_i32_0 = arith.constant 0 : i32
    %c0_i32_1 = arith.constant 0 : i32
    return %c0_i32, %c0_i32_0 : i32, i32
  }
  func.func @transform_4(%arg0: i32) -> (i32, i32) {
    %c0_i32 = arith.constant 0 : i32
    %c0_i32_0 = arith.constant 0 : i32
    return %arg0, %c0_i32 : i32, i32
  }
  func.func @transform_5(%arg0: i32) -> (i32, i32, i32) {
    %c0_i32 = arith.constant 0 : i32
    %c0_i32_0 = arith.constant 0 : i32
    %c0_i32_1 = arith.constant 0 : i32
    return %arg0, %c0_i32, %c0_i32_0 : i32, i32, i32
  }
  func.func @transform_6(%arg0: i32) -> (i32, i32, i32) {
    %c0_i32 = arith.constant 0 : i32
    %c0_i32_0 = arith.constant 0 : i32
    %c0_i32_1 = arith.constant 0 : i32
    return %arg0, %c0_i32, %c0_i32_0 : i32, i32, i32
  }
}

module attributes {stable_mosaic.version = 11 : i64} {
  func.func @_residual_kernel(%arg0: i32, %arg1: memref<16x128xbf16, #tpu.memory_space<vmem>>, %arg2: memref<1x128xf32, #tpu.memory_space<vmem>>, %arg3: memref<1x128xf32, #tpu.memory_space<vmem>>, %arg4: memref<16x128xbf16, #tpu.memory_space<vmem>>, %arg5: memref<1x128xf32, #tpu.memory_space<vmem>>, %arg6: memref<1x128xf32, #tpu.memory_space<vmem>>, %arg7: memref<16x128xf32, #tpu.memory_space<vmem>>) attributes {dimension_semantics = [#tpu.dimension_semantics<parallel>], iteration_bounds = array<i64: 2>, scalar_prefetch = 0 : i64, scratch_operands = 0 : i64, tpu.core_type = #tpu.core_type<tc>, window_params = [{transform_indices = @transform_0, window_bounds = array<i64: 16, 128>}, {pipeline_mode = #tpu.pipeline_mode<synchronous>, transform_indices = @transform_1, window_bounds = array<i64: 1, 128>}, {pipeline_mode = #tpu.pipeline_mode<synchronous>, transform_indices = @transform_2, window_bounds = array<i64: 1, 128>}, {transform_indices = @transform_3, window_bounds = array<i64: 16, 128>}, {pipeline_mode = #tpu.pipeline_mode<synchronous>, transform_indices = @transform_4, window_bounds = array<i64: 1, 128>}, {pipeline_mode = #tpu.pipeline_mode<synchronous>, transform_indices = @transform_5, window_bounds = array<i64: 1, 128>}, {transform_indices = @transform_6, window_bounds = array<i64: 16, 128>}]} {
    %c0 = arith.constant 0 : index
    %c0_0 = arith.constant 0 : index
    %0 = vector.load %arg1[%c0, %c0_0] : memref<16x128xbf16, #tpu.memory_space<vmem>>, vector<16x128xbf16>
    %1 = arith.extf %0 : vector<16x128xbf16> to vector<16x128xf32>
    %c0_1 = arith.constant 0 : index
    %c0_2 = arith.constant 0 : index
    %2 = vector.load %arg2[%c0_1, %c0_2] : memref<1x128xf32, #tpu.memory_space<vmem>>, vector<1x128xf32>
    %3 = vector.broadcast %2 : vector<1x128xf32> to vector<16x128xf32>
    %4 = arith.mulf %1, %3 : vector<16x128xf32>
    %c0_3 = arith.constant 0 : index
    %c0_4 = arith.constant 0 : index
    %5 = vector.load %arg3[%c0_3, %c0_4] : memref<1x128xf32, #tpu.memory_space<vmem>>, vector<1x128xf32>
    %6 = vector.broadcast %5 : vector<1x128xf32> to vector<16x128xf32>
    %7 = arith.addf %4, %6 : vector<16x128xf32>
    %c0_5 = arith.constant 0 : index
    %c0_6 = arith.constant 0 : index
    %8 = vector.load %arg4[%c0_5, %c0_6] : memref<16x128xbf16, #tpu.memory_space<vmem>>, vector<16x128xbf16>
    %9 = arith.extf %8 : vector<16x128xbf16> to vector<16x128xf32>
    %c0_7 = arith.constant 0 : index
    %c0_8 = arith.constant 0 : index
    %10 = vector.load %arg5[%c0_7, %c0_8] : memref<1x128xf32, #tpu.memory_space<vmem>>, vector<1x128xf32>
    %11 = vector.broadcast %10 : vector<1x128xf32> to vector<16x128xf32>
    %12 = arith.mulf %9, %11 : vector<16x128xf32>
    %13 = arith.addf %7, %12 : vector<16x128xf32>
    %c0_9 = arith.constant 0 : index
    %c0_10 = arith.constant 0 : index
    %14 = vector.load %arg6[%c0_9, %c0_10] : memref<1x128xf32, #tpu.memory_space<vmem>>, vector<1x128xf32>
    %15 = vector.broadcast %14 : vector<1x128xf32> to vector<16x128xf32>
    %16 = arith.addf %13, %15 : vector<16x128xf32>
    %cst = arith.constant 0.000000e+00 : f32
    %17 = vector.broadcast %cst : f32 to vector<16x128xf32>
    %18 = arith.maximumf %16, %17 : vector<16x128xf32>
    %c0_11 = arith.constant 0 : index
    %c0_12 = arith.constant 0 : index
    %19 = vector.load %arg7[%c0_11, %c0_12] : memref<16x128xf32, #tpu.memory_space<vmem>>, vector<16x128xf32>
    tpu.vector_store %arg7[%c0_11, %c0_12], %18 {strides = array<i32>} : memref<16x128xf32, #tpu.memory_space<vmem>>, vector<16x128xf32>,
    return
  }
  func.func @transform_0(%arg0: i32) -> (i32, i32) {
    %c0_i32 = arith.constant 0 : i32
    %c0_i32_0 = arith.constant 0 : i32
    return %arg0, %c0_i32 : i32, i32
  }
  func.func @transform_1(%arg0: i32) -> (i32, i32) {
    %c0_i32 = arith.constant 0 : i32
    %c0_i32_0 = arith.constant 0 : i32
    %c0_i32_1 = arith.constant 0 : i32
    return %c0_i32, %c0_i32_0 : i32, i32
  }
  func.func @transform_2(%arg0: i32) -> (i32, i32) {
    %c0_i32 = arith.constant 0 : i32
    %c0_i32_0 = arith.constant 0 : i32
    %c0_i32_1 = arith.constant 0 : i32
    return %c0_i32, %c0_i32_0 : i32, i32
  }
  func.func @transform_3(%arg0: i32) -> (i32, i32) {
    %c0_i32 = arith.constant 0 : i32
    %c0_i32_0 = arith.constant 0 : i32
    return %arg0, %c0_i32 : i32, i32
  }
  func.func @transform_4(%arg0: i32) -> (i32, i32) {
    %c0_i32 = arith.constant 0 : i32
    %c0_i32_0 = arith.constant 0 : i32
    %c0_i32_1 = arith.constant 0 : i32
    return %c0_i32, %c0_i32_0 : i32, i32
  }
  func.func @transform_5(%arg0: i32) -> (i32, i32) {
    %c0_i32 = arith.constant 0 : i32
    %c0_i32_0 = arith.constant 0 : i32
    %c0_i32_1 = arith.constant 0 : i32
    return %c0_i32, %c0_i32_0 : i32, i32
  }
  func.func @transform_6(%arg0: i32) -> (i32, i32) {
    %c0_i32 = arith.constant 0 : i32
    %c0_i32_0 = arith.constant 0 : i32
    return %arg0, %c0_i32 : i32, i32
  }
}

</mosaic_0001>

<bundles_post_ra>
// kernel: tile.28
= control target key start
LH: loop header
LB: loop body
LE: loop exit
PB: predicated region body
PF: predicated region fallthrough
CT: control target
= control target key end

     0   :  { %s28_s0 = inlined_call_operand.vmem [shape: f32[8], index: 0, kind: input, shape index: {}]   ;;  %s29_s1 = inlined_call_operand.vmem [shape: f32[16,8], index: 1, kind: output, shape index: {}]  }
   0x1   :  { %v4_v0 = vld [vmem:[%s28_s0] ss:$0 sm:$0xff] }
   0x2   :  { %5 = vst [vmem:[%s29_s1] sm:$0xff] %v4_v0  ;;  %8 = vst [vmem:[%s29_s1 + $0x8] sm:$0xff] %v4_v0 }

// kernel: tile.29
= control target key start
LH: loop header
LB: loop body
LE: loop exit
PB: predicated region body
PF: predicated region fallthrough
CT: control target
= control target key end

     0   :  { %s131_s10 = smov 120   ;;  %s132_s11 = smov 104   ;;  %vm3_vm0 = vcmask 64512   ;;  %vm9_vm1 = vcmask 1048512   ;;  %vm15_vm2 = vcmask 982912   ;;  %vm21_vm3 = vcmask 917312   ;;  %s207_s0 = inlined_call_operand.vmem [shape: f32[16,8], index: 0, kind: input, shape index: {}]   ;;  %s208_s1 = inlined_call_operand.vmem [shape: f32[1,128], index: 1, kind: output, shape index: {}]  }
   0x1   :  { %v101_v0 = vld [vmem:[%s207_s0 + $0xf] sm:$0x1]   ;;  %v103_v1 = vld [vmem:[%s207_s0 + $0xd] sm:$0x1]   ;;  %v102_v2 = vld [vmem:[%s207_s0 + $0xe] sm:$0x1]  }
   0x2   :  { %7 = vrot.lane.b32.xlu0 %v101_v0, %s131_s10  ;;  %19 = vrot.lane.b32.xlu1 %v103_v1, %s132_s11  ;;  %v104_v3 = vld [vmem:[%s207_s0 + $0xc] sm:$0x1]   ;;  %s133_s16 = smov 112   ;;  %s134_s17 = smov 96   ;;  %v105_v4 = vld [vmem:[%s207_s0 + $0xb] sm:$0x1]  }
   0x3   :  { %v106_v5 = vld [vmem:[%s207_s0 + $0xa] sm:$0x1]   ;;  %v2_v6 = vld [vmem:[%s207_s0] sm:$0x1]   ;;  %s135_s24 = smov 88   ;;  %s136_s25 = smov 80  }
   0x4   :  { %4 = vst.msk [vmem:[#allocation0] sm:$0x1] %vm3_vm0, %v2_v6   ;;  %v107_v7 = vld [vmem:[%s207_s0 + $0x9] sm:$0x1]   ;;  %v108_v8 = vld [vmem:[%s207_s0 + $0x8] sm:$0x1]  }
   0x5   :  { %s137_s30 = smov 72   ;;  %s138_s2 = smov 64   ;;  %v109_v9 = vld [vmem:[%s207_s0 + $0x7] sm:$0x1]   ;;  %v110_v10 = vld [vmem:[%s207_s0 + $0x6] sm:$0x1]  }
   0x6   :  { %13 = vrot.lane.b32.xlu0 %v102_v2, %s133_s16  ;;  %25 = vrot.lane.b32.xlu1 %v104_v3, %s134_s17  ;;  %s139_s7 = smov 56   ;;  %s140_s8 = smov 48   ;;  %v111_v11 = vld [vmem:[%s207_s0 + $0x5] sm:$0x1]   ;;  %v112_v12 = vld [vmem:[%s207_s0 + $0x4] sm:$0x1]  }
   0x7   :  { %s141_s13 = smov 40   ;;  %s142_s14 = smov 32   ;;  %v113_v13 = vld [vmem:[%s207_s0 + $0x3] sm:$0x1]   ;;  %v114_v14 = vld [vmem:[%s207_s0 + $0x2] sm:$0x1]  }
   0x8   :  { %s143_s19 = smov 24   ;;  %s144_s20 = smov 16   ;;  %v115_v15 = vld [vmem:[%s207_s0 + $0x1] sm:$0x1]   ;;  %vm27_vm4 = vcmask 851712   ;;  %vm33_vm5 = vcmask 786112  }
   0x9   :  { %s145_s0 = smov 8   ;;  %vm39_vm6 = vcmask 720512   ;;  %vm45_vm7 = vcmask 654912   ;;  %vm51_vm8 = vcmask 589312   ;;  %vm57_vm9 = vcmask 523712  }
   0xa   :  { %31 = vrot.lane.b32.xlu0 %v105_v4, %s135_s24  ;;  %37 = vrot.lane.b32.xlu1 %v106_v5, %s136_s25  ;;  %vm63_vm10 = vcmask 458112   ;;  %vm69_vm11 = vcmask 392512   ;;  %vm75_vm12 = vcmask 326912   ;;  %vm81_vm13 = vcmask 261312  }
   0xb   :  { %vm87_vm14 = vcmask 195712   ;;  %vm93_vm15 = vcmask 130112  }
   0xe   :  { %43 = vrot.lane.b32.xlu0 %v107_v7, %s137_s30  ;;  %49 = vrot.lane.b32.xlu1 %v108_v8, %s138_s2 }
  0x12   :  { %55 = vrot.lane.b32.xlu0 %v109_v9, %s139_s7  ;;  %61 = vrot.lane.b32.xlu1 %v110_v10, %s140_s8 }
  0x16   :  { %67 = vrot.lane.b32.xlu0 %v111_v11, %s141_s13  ;;  %73 = vrot.lane.b32.xlu1 %v112_v12, %s142_s14 }
  0x1a   :  { %79 = vrot.lane.b32.xlu0 %v113_v13, %s143_s19  ;;  %85 = vrot.lane.b32.xlu1 %v114_v14, %s144_s20 }
  0x1e   :  { %91 = vrot.lane.b32.xlu0 %v115_v15, %s145_s0 }
  0x74   :  { %v8_v16 = vpop.permute.xlu0 %7   ;;  %v20_v17 = vpop.permute.xlu1 %19  }
  0x75   :  { %10 = vst.msk [vmem:[#allocation0] sm:$0x1] %vm9_vm1, %v8_v16  }
  0x78   :  { %v14_v18 = vpop.permute.xlu0 %13   ;;  %v26_v19 = vpop.permute.xlu1 %25  }
  0x79   :  { %16 = vst.msk [vmem:[#allocation0] sm:$0x1] %vm15_vm2, %v14_v18  }
  0x7a   :  { %22 = vst.msk [vmem:[#allocation0] sm:$0x1] %vm21_vm3, %v20_v17  }
  0x7b   :  { %28 = vst.msk [vmem:[#allocation0] sm:$0x1] %vm27_vm4, %v26_v19  }
  0x7c   :  { %v32_v20 = vpop.permute.xlu0 %31   ;;  %v38_v21 = vpop.permute.xlu1 %37  }
  0x7d   :  { %34 = vst.msk [vmem:[#allocation0] sm:$0x1] %vm33_vm5, %v32_v20  }
  0x7e   :  { %40 = vst.msk [vmem:[#allocation0] sm:$0x1] %vm39_vm6, %v38_v21  }
  0x80   :  { %v44_v22 = vpop.permute.xlu0 %43   ;;  %v50_v23 = vpop.permute.xlu1 %49  }
  0x81   :  { %46 = vst.msk [vmem:[#allocation0] sm:$0x1] %vm45_vm7, %v44_v22  }
  0x82   :  { %52 = vst.msk [vmem:[#allocation0] sm:$0x1] %vm51_vm8, %v50_v23  }
  0x84   :  { %v56_v24 = vpop.permute.xlu0 %55   ;;  %v62_v25 = vpop.permute.xlu1 %61  }
  0x85   :  { %58 = vst.msk [vmem:[#allocation0] sm:$0x1] %vm57_vm9, %v56_v24  }
  0x86   :  { %64 = vst.msk [vmem:[#allocation0] sm:$0x1] %vm63_vm10, %v62_v25  }
  0x88   :  { %v68_v26 = vpop.permute.xlu0 %67   ;;  %v74_v27 = vpop.permute.xlu1 %73  }
  0x89   :  { %70 = vst.msk [vmem:[#allocation0] sm:$0x1] %vm69_vm11, %v68_v26  }
  0x8a   :  { %76 = vst.msk [vmem:[#allocation0] sm:$0x1] %vm75_vm12, %v74_v27  }
  0x8c   :  { %v80_v28 = vpop.permute.xlu0 %79   ;;  %v86_v29 = vpop.permute.xlu1 %85  }
  0x8d   :  { %82 = vst.msk [vmem:[#allocation0] sm:$0x1] %vm81_vm13, %v80_v28  }
  0x8e   :  { %88 = vst.msk [vmem:[#allocation0] sm:$0x1] %vm87_vm14, %v86_v29  }
  0x90   :  { %v92_v30 = vpop.permute.xlu0 %91  }
  0x91   :  { %94 = vst.msk [vmem:[#allocation0] sm:$0x1] %vm93_vm15, %v92_v30  }
  0x98   :  { %v98_v31 = vld [vmem:[#allocation0] sm:$0x1] }
  0x99   :  { %100 = vst [vmem:[%s208_s1] sm:$0x1] %v98_v31 }

// kernel: residual_block_forward.6
= control target key start
LH: loop header
LB: loop body
LE: loop exit
PB: predicated region body
PF: predicated region fallthrough
CT: control target
= control target key end

     0   :  { %s1476_s15 = smov 0   ;;  %s1478_s16 = smov 0   ;;  %s1840_s0 = inlined_call_operand.vmem [shape: bf16[512,4], index: 0, kind: input, shape index: {}]   ;;  %s1841_s1 = inlined_call_operand.vmem [shape: bf16[4,8], index: 1, kind: input, shape index: {}]   ;;  %s1842_s2 = inlined_call_operand.vmem [shape: bf16[512,8], index: 2, kind: output, shape index: {0}]   ;;  %s1843_s3 = inlined_call_operand.vmem [shape: f32[2,1,8], index: 3, kind: output, shape index: {1}]   ;;  %s1844_s4 = inlined_call_operand.vmem [shape: f32[2,1,8], index: 4, kind: output, shape index: {2}]  }
   0x1   :  { %s1480_s17 = smov 0  }
   0x2 LB: > { %s27_s18 = sadd.s32 1, %s1444_s16  ;;  %p1227_p0 = scmp.ge.s32.totalorder %s1448_s17, 1  ;;  %s1448_s17 = sphi %s1480_s17, %s15_s17   ;;  %s1444_s16 = sphi %s1478_s16, %s1847_s16   ;;  %s1440_s15 = sphi %s1476_s15, %s1846_s15  }
   0x3   : > { %p29_p1 = scmp.ge.s32.totalorder %s27_s18, 2  ;;  %p194_p2 = scmp.lt.s32.totalorder %s1448_s17, 3 }
   0x5   : > { %s1849_s18 = smov (%p29_p1, %s27_s18), 0  ;;  %p195_p3 = pnand %p1227_p0, %p194_p2 }
   0x6   : > { %v360_v0 = vld [vmem:[%s1841_s1] sm:$0x3] (!%p195_p3)  ;;  %vm490_vm0 = vcmask (!%p195_p3), 1041408   ;;  %s1228_s21 = sshll.u32 (!%p195_p3), %s1440_s15, 5  ;;  %vm263_vm1 = vcmask (!%p195_p3), 64512   ;;  %v1450_v2 = vmov (!%p195_p3), 0.0  }
   0x7   : > { %198 = sbr.rel (%p195_p3) target bundleno = 326 (0x146), region = 28  ;;  %1383 = vmatprep.subr.msk.bf16.mxu0 (!%p195_p3), %vm490_vm0, %v360_v0  ;;  %v492_v1 = vsel (!%p195_p3), %vm490_vm0, %v360_v0, 0  ;;  %p1502_p4 = scmp.lt.s32.totalorder (!%p195_p3), %s1228_s21, 63  ;;  %1384 = vmatprep.subr.msk.bf16.mxu1 (!%p195_p3), %vm490_vm0, %v360_v0  ;;  %266 = vst.msk [vmem:[#allocation2 + $0x10] sm:$0xff] (!%p195_p3), %vm263_vm1, %v1450_v2  ;;  %264 = vst.msk [vmem:[#allocation2] sm:$0xff] (!%p195_p3), %vm263_vm1, %v1450_v2  ;;  %vm441_vm2 = vcmask (!%p195_p3), 31744  }
   0x8   : > { %1348 = vmatpush3.bf16.msra.mxu0 (!%p195_p3), %v492_v1  ;;  %1382 = vmatpush3.bf16.msra.mxu1 (!%p195_p3), %v492_v1  ;;  %265 = vst.msk [vmem:[#allocation2 + $0x8] sm:$0xff] (!%p195_p3), %vm263_vm1, %v1450_v2  ;;  %267 = vst.msk [vmem:[#allocation2 + $0x18] sm:$0xff] (!%p195_p3), %vm263_vm1, %v1450_v2  ;;  %vm883_vm3 = vcmask (!%p195_p3), 60416   ;;  %p252_p5 = scmp.lt.s32.totalorder (!%p195_p3), %s1440_s15, 1  ;;  %vm985_vm4 = vcmask (!%p195_p3), 57344  }
   0x9   : > { %268 = vst.msk [vmem:[#allocation2 + $0x20] sm:$0xff] (!%p195_p3), %vm263_vm1, %v1450_v2  ;;  %269 = vst.msk [vmem:[#allocation2 + $0x28] sm:$0xff] (!%p195_p3), %vm263_vm1, %v1450_v2 }
   0xa   : > { %270 = vst.msk [vmem:[#allocation2 + $0x30] sm:$0xff] (!%p195_p3), %vm263_vm1, %v1450_v2  ;;  %271 = vst.msk [vmem:[#allocation2 + $0x38] sm:$0xff] (!%p195_p3), %vm263_vm1, %v1450_v2 }
   0xb   : > { %272 = vst.msk [vmem:[#allocation2 + $0x40] sm:$0xff] (!%p195_p3), %vm263_vm1, %v1450_v2  ;;  %273 = vst.msk [vmem:[#allocation2 + $0x48] sm:$0xff] (!%p195_p3), %vm263_vm1, %v1450_v2 }
   0xc   : > { %274 = vst.msk [vmem:[#allocation2 + $0x50] sm:$0xff] (!%p195_p3), %vm263_vm1, %v1450_v2  ;;  %275 = vst.msk [vmem:[#allocation2 + $0x58] sm:$0xff] (!%p195_p3), %vm263_vm1, %v1450_v2 }
   0xd   : > { %276 = vst.msk [vmem:[#allocation2 + $0x60] sm:$0xff] (!%p195_p3), %vm263_vm1, %v1450_v2  ;;  %277 = vst.msk [vmem:[#allocation2 + $0x68] sm:$0xff] (!%p195_p3), %vm263_vm1, %v1450_v2 }
   0xe   : > { %278 = vst.msk [vmem:[#allocation2 + $0x70] sm:$0xff] %vm263_vm1, %v1450_v2  ;;  %279 = vst.msk [vmem:[#allocation2 + $0x78] sm:$0xff] %vm263_vm1, %v1450_v2  ;;  %s1851_s21 = smov (!%p1502_p4, %s1228_s21), 63  ;;  %v298_v19 = vld [vmem:[#allocation2 + $0x10] sm:$0xff]  ;;  %v296_v20 = vld [vmem:[#allocation2] sm:$0xff]  ;;  %s1853_s15 = smov (!%p252_p5, %s1440_s15), 1 }
   0xf   : > { %280 = vst.msk [vmem:[#allocation2 + $0x80] sm:$0xff] %vm263_vm1, %v1450_v2  ;;  %281 = vst.msk [vmem:[#allocation2 + $0x88] sm:$0xff] %vm263_vm1, %v1450_v2  ;;  %s1229_s23 = sshll.u32 %s1851_s21, 2  ;;  %v299_v22 = vld [vmem:[#allocation2 + $0x18] sm:$0xff]  ;;  %v297_v25 = vld [vmem:[#allocation2 + $0x8] sm:$0xff]  ;;  %s254_s6 = scalar_lea.vmem %s1843_s3, %s1853_s15 }
  0x10   : > { %282 = vst.msk [vmem:[#allocation2 + $0x90] sm:$0xff] %vm263_vm1, %v1450_v2  ;;  %283 = vst.msk [vmem:[#allocation2 + $0x98] sm:$0xff] %vm263_vm1, %v1450_v2  ;;  %s1550_s26 = scalar_lea.vmem %s1840_s0, %s1229_s23  ;;  %v300_v33 = vld [vmem:[#allocation2 + $0x20] sm:$0xff]  ;;  %v301_v40 = vld [vmem:[#allocation2 + $0x28] sm:$0xff]  ;;  %s1593_s29 = scalar_lea.vmem %s1842_s2, %s1229_s23 }
  0x11   : > { %284 = vst.msk [vmem:[#allocation2 + $0xa0] sm:$0xff] %vm263_vm1, %v1450_v2  ;;  %285 = vst.msk [vmem:[#allocation2 + $0xa8] sm:$0xff] %vm263_vm1, %v1450_v2  ;;  %v1410_v3 = vld [vmem:[%s1550_s26] sm:$0xff]   ;;  %v1411_v4 = vld [vmem:[%s1550_s26 + $0x8] sm:$0xff]   ;;  %s257_s9 = scalar_lea.vmem %s1844_s4, %s1853_s15 }
  0x12   : > { %286 = vst.msk [vmem:[#allocation2 + $0xb0] sm:$0xff] %vm263_vm1, %v1450_v2  ;;  %287 = vst.msk [vmem:[#allocation2 + $0xb8] sm:$0xff] %vm263_vm1, %v1450_v2  ;;  %1349 = vmatprep.mubr.msk.bf16.mxu0 %vm441_vm2, %v1410_v3  ;;  %v1412_v5 = vld [vmem:[%s1550_s26 + $0x10] sm:$0xff]   ;;  %v1413_v6 = vld [vmem:[%s1550_s26 + $0x18] sm:$0xff]  }
  0x13   : > { %288 = vst.msk [vmem:[#allocation2 + $0xc0] sm:$0xff] %vm263_vm1, %v1450_v2  ;;  %289 = vst.msk [vmem:[#allocation2 + $0xc8] sm:$0xff] %vm263_vm1, %v1450_v2  ;;  %1350 = vmatmul.mubr.msk.bf16.vlgmr.msra.gmra.mrb[0].mxu0 %vm441_vm2, %v1411_v4  ;;  %v1414_v7 = vld [vmem:[%s1550_s26 + $0x20] sm:$0xff]   ;;  %v1419_v9 = vld [vmem:[%s1550_s26 + $0x48] sm:$0xff]  }
  0x14   : > { %290 = vst.msk [vmem:[#allocation2 + $0xd0] sm:$0xff] %vm263_vm1, %v1450_v2  ;;  %291 = vst.msk [vmem:[#allocation2 + $0xd8] sm:$0xff] %vm263_vm1, %v1450_v2  ;;  %1353 = vmatprep.mubr.msk.bf16.mxu0 %vm441_vm2, %v1412_v5  ;;  %v1418_v8 = vld [vmem:[%s1550_s26 + $0x40] sm:$0xff]   ;;  %v1420_v10 = vld [vmem:[%s1550_s26 + $0x50] sm:$0xff]  }
  0x15   : > { %292 = vst.msk [vmem:[#allocation2 + $0xe0] sm:$0xff] %vm263_vm1, %v1450_v2  ;;  %293 = vst.msk [vmem:[#allocation2 + $0xe8] sm:$0xff] %vm263_vm1, %v1450_v2  ;;  %1365 = vmatprep.mubr.msk.bf16.mxu1 %vm441_vm2, %v1418_v8  ;;  %v1415_v11 = vld [vmem:[%s1550_s26 + $0x28] sm:$0xff]   ;;  %v1421_v12 = vld [vmem:[%s1550_s26 + $0x58] sm:$0xff]  }
  0x16   : > { %294 = vst.msk [vmem:[#allocation2 + $0xf0] sm:$0xff] %vm263_vm1, %v1450_v2  ;;  %295 = vst.msk [vmem:[#allocation2 + $0xf8] sm:$0xff] %vm263_vm1, %v1450_v2  ;;  %1366 = vmatmul.mubr.msk.bf16.vlgmr.msra.gmra.mrb[0].mxu1 %vm441_vm2, %v1419_v9  ;;  %v1416_v13 = vld [vmem:[%s1550_s26 + $0x30] sm:$0xff]   ;;  %v1422_v14 = vld [vmem:[%s1550_s26 + $0x60] sm:$0xff]  }
  0x17   : > { %1369 = vmatprep.mubr.msk.bf16.mxu1 %vm441_vm2, %v1420_v10  ;;  %v1417_v15 = vld [vmem:[%s1550_s26 + $0x38] sm:$0xff]   ;;  %v1423_v16 = vld [vmem:[%s1550_s26 + $0x68] sm:$0xff]   ;;  %v1424_v17 = vld [vmem:[%s1550_s26 + $0x70] sm:$0xff]  }
  0x18   : > { %v1425_v18 = vld [vmem:[%s1550_s26 + $0x78] sm:$0xff]   ;;  %v302_v31 = vld [vmem:[#allocation2 + $0x30] sm:$0xff]  ;;  %v312_v34 = vld [vmem:[#allocation2 + $0x80] sm:$0xff] }
  0x19   : > { %v314_v32 = vld [vmem:[#allocation2 + $0x90] sm:$0xff]  ;;  %v303_v36 = vld [vmem:[#allocation2 + $0x38] sm:$0xff]  ;;  %v313_v58 = vld [vmem:[#allocation2 + $0x88] sm:$0xff] }
  0x1a   : > { %v315_v57 = vld [vmem:[#allocation2 + $0x98] sm:$0xff]  ;;  %v306_v2 = vld [vmem:[#allocation2 + $0x50] sm:$0xff]  ;;  %v316_v9 = vld [vmem:[#allocation2 + $0xa0] sm:$0xff] }
  0x1b   : > { %1354 = vmatmul.mubr.msk.bf16.gmra.mrb[4].mxu0 %vm441_vm2, %v1413_v6  ;;  %v318_v3 = vld [vmem:[#allocation2 + $0xb0] sm:$0xff]  ;;  %v304_v6 = vld [vmem:[#allocation2 + $0x40] sm:$0xff] }
  0x1c   : > { %1357 = vmatprep.mubr.msk.bf16.mxu0 %vm441_vm2, %v1414_v7 }
  0x1e   : > { %1370 = vmatmul.mubr.msk.bf16.gmra.mrb[4].mxu1 %vm441_vm2, %v1421_v12 }
  0x1f   : > { %1373 = vmatprep.mubr.msk.bf16.mxu1 %vm441_vm2, %v1422_v14 }
  0x23   : > { %1358 = vmatmul.mubr.msk.bf16.gmra.mrb[8].mxu0 %vm441_vm2, %v1415_v11 }
  0x24   : > { %1361 = vmatprep.mubr.msk.bf16.mxu0 %vm441_vm2, %v1416_v13 }
  0x26   : > { %1374 = vmatmul.mubr.msk.bf16.gmra.mrb[8].mxu1 %vm441_vm2, %v1423_v16 }
  0x27   : > { %1377 = vmatprep.mubr.msk.bf16.mxu1 %vm441_vm2, %v1424_v17 }
  0x2b   : > { %1362 = vmatmul.mubr.msk.bf16.gmra.mrb[12].mxu0 %vm441_vm2, %v1417_v15 }
  0x2e   : > { %1378 = vmatmul.mubr.msk.bf16.gmra.mrb[12].mxu1 %vm441_vm2, %v1425_v18 }
  0xe6   : > { %v1351_v21 = vpop.f32.mrb[0].mxu0 }
  0xe7   : > { %v657_v23 = vadd.f32 %v1351_v21, %v298_v19  ;;  %v528_v24 = vpop.f32.mrb[1].mxu0 }
  0xe8   : > { %v655_v26 = vadd.f32 %v528_v24, %v296_v20  ;;  %v1352_v27 = vpop.f32.mrb[2].mxu0 }
  0xe9   : > { %690 = vst.msk [vmem:[#allocation2 + $0x10] sm:$0xff] %vm263_vm1, %v657_v23  ;;  %v658_v28 = vadd.f32 %v1352_v27, %v299_v22  ;;  %v531_v29 = vpop.f32.mrb[3].mxu0  ;;  %v1367_v37 = vpop.f32.mrb[0].mxu1 }
  0xea   : > { %688 = vst.msk [vmem:[#allocation2] sm:$0xff] %vm263_vm1, %v655_v26  ;;  %v656_v30 = vadd.f32 %v531_v29, %v297_v25  ;;  %v673_v41 = vadd.f32 %v1367_v37, %v314_v32  ;;  %v592_v42 = vpop.f32.mrb[1].mxu1 }
  0xeb   : > { %691 = vst.msk [vmem:[#allocation2 + $0x18] sm:$0xff] %vm263_vm1, %v658_v28  ;;  %v671_v46 = vadd.f32 %v592_v42, %v312_v34  ;;  %v1368_v47 = vpop.f32.mrb[2].mxu1 }
  0xec   : > { %689 = vst.msk [vmem:[#allocation2 + $0x8] sm:$0xff] %vm263_vm1, %v656_v30  ;;  %706 = vst.msk [vmem:[#allocation2 + $0x90] sm:$0xff] %vm263_vm1, %v673_v41  ;;  %v595_v52 = vpop.f32.mrb[3].mxu1  ;;  %v674_v7 = vadd.f32 %v1368_v47, %v315_v57 }
  0xed   : > { %704 = vst.msk [vmem:[#allocation2 + $0x80] sm:$0xff] %vm263_vm1, %v671_v46  ;;  %v672_v8 = vadd.f32 %v595_v52, %v313_v58 }
  0xee   : > { %v1355_v35 = vpop.f32.mrb[4].mxu0  ;;  %707 = vst.msk [vmem:[#allocation2 + $0x98] sm:$0xff] %vm263_vm1, %v674_v7 }
  0xef   : > { %v661_v38 = vadd.f32 %v1355_v35, %v302_v31  ;;  %v544_v39 = vpop.f32.mrb[5].mxu0  ;;  %705 = vst.msk [vmem:[#allocation2 + $0x88] sm:$0xff] %vm263_vm1, %v672_v8 }
  0xf0   : > { %v725_v43 = vld [vmem:[#allocation2 + $0x10] sm:$0xff]  ;;  %v659_v44 = vadd.f32 %v544_v39, %v300_v33  ;;  %v1356_v45 = vpop.f32.mrb[6].mxu0  ;;  %v307_v39 = vld [vmem:[#allocation2 + $0x58] sm:$0xff] }
  0xf1   : > { %v1300_v48 = vpack.c.bf16 %v725_v43, %v725_v43  ;;  %v723_v49 = vld [vmem:[#allocation2] sm:$0xff]  ;;  %694 = vst.msk [vmem:[#allocation2 + $0x30] sm:$0xff] %vm263_vm1, %v661_v38  ;;  %v662_v50 = vadd.f32 %v1356_v45, %v303_v36  ;;  %v547_v51 = vpop.f32.mrb[7].mxu0  ;;  %v989_v59 = vmul.f32 %v725_v43, %v725_v43  ;;  %v919_v10 = vsel %vm263_vm1, %v725_v43, 0.0  ;;  %v1371_v14 = vpop.f32.mrb[4].mxu1  ;;  %v305_v43 = vld [vmem:[#allocation2 + $0x48] sm:$0xff] }
  0xf2   : > { %v1298_v53 = vpack.c.bf16 %v723_v49, %v723_v49  ;;  %v987_v54 = vmul.f32 %v723_v49, %v723_v49  ;;  %v726_v55 = vld [vmem:[#allocation2 + $0x18] sm:$0xff]  ;;  %692 = vst.msk [vmem:[#allocation2 + $0x20] sm:$0xff] %vm263_vm1, %v659_v44  ;;  %v660_v56 = vadd.f32 %v547_v51, %v301_v40  ;;  %v916_v62 = vsel %vm263_vm1, %v723_v49, 0.0  ;;  %v608_v20 = vpop.f32.mrb[5].mxu1  ;;  %v310_v49 = vld [vmem:[#allocation2 + $0x70] sm:$0xff] }
  0xf3   : > { %886 = vst.msk [vmem:[%s1593_s29 + $0x8] sm:$0xf] %vm883_vm3, %v1300_v48  ;;  %v1301_v60 = vpack.c.bf16 %v726_v55, %v726_v55  ;;  %v724_v61 = vld [vmem:[#allocation2 + $0x8] sm:$0xff]  ;;  %v990_v4 = vmul.f32 %v726_v55, %v726_v55  ;;  %v677_v19 = vadd.f32 %v1371_v14, %v318_v3  ;;  %v1022_v21 = vsel %vm263_vm1, %v989_v59, 0.0  ;;  %v1617_v26 = vpop.f32.mrb[6].mxu1  ;;  %v1630_v44 = vld [vmem:[#allocation2 + $0x90] sm:$0xff] }
  0xf4   : > { %695 = vst.msk [vmem:[#allocation2 + $0x38] sm:$0xff] %vm263_vm1, %v662_v50  ;;  %v1299_v63 = vpack.c.bf16 %v724_v61, %v724_v61  ;;  %v917_v0 = vsel %vm263_vm1, %v724_v61, 0.0  ;;  %v988_v1 = vmul.f32 %v724_v61, %v724_v61  ;;  %693 = vst.msk [vmem:[#allocation2 + $0x28] sm:$0xff] %vm263_vm1, %v660_v56  ;;  %v1019_v11 = vsel %vm263_vm1, %v987_v54, 0.0  ;;  %v1623_v33 = vpop.f32.mrb[7].mxu1  ;;  %v308_v54 = vld [vmem:[#allocation2 + $0x60] sm:$0xff] }
  0xf5   : > { %884 = vst.msk [vmem:[%s1593_s29] sm:$0xf] %vm883_vm3, %v1298_v53  ;;  %887 = vst.msk [vmem:[%s1593_s29 + $0xc] sm:$0xf] %vm883_vm3, %v1301_v60  ;;  %v918_v5 = vadd.f32 %v917_v0, %v916_v62  ;;  %v675_v25 = vadd.f32 %v608_v20, %v316_v9  ;;  %v921_v27 = vsel %vm263_vm1, %v726_v55, 0.0  ;;  %v1024_v28 = vsel %vm263_vm1, %v990_v4, 0.0 }
  0xf6   : > { %885 = vst.msk [vmem:[%s1593_s29 + $0x4] sm:$0xf] %vm883_vm3, %v1299_v63  ;;  %v1020_v12 = vsel %vm263_vm1, %v988_v1, 0.0  ;;  %v1359_v13 = vpop.f32.mrb[8].mxu0  ;;  %v1638_v55 = vld [vmem:[#allocation2 + $0x80] sm:$0xff]  ;;  %v311_v59 = vld [vmem:[#allocation2 + $0x78] sm:$0xff]  ;;  %v1316_v60 = vpack.c.bf16 %v1630_v44, %v1630_v44 }
  0xf7   : > { %v920_v15 = vadd.f32 %v919_v10, %v918_v5  ;;  %v1021_v16 = vadd.f32 %v1020_v12, %v1019_v11  ;;  %v665_v17 = vadd.f32 %v1359_v13, %v306_v2  ;;  %v560_v18 = vpop.f32.mrb[9].mxu0  ;;  %710 = vst.msk [vmem:[#allocation2 + $0xb0] sm:$0xff] %vm263_vm1, %v677_v19  ;;  %708 = vst.msk [vmem:[#allocation2 + $0xa0] sm:$0xff] %vm263_vm1, %v675_v25  ;;  %v309_v9 = vld [vmem:[#allocation2 + $0x68] sm:$0xff] }
  0xf8   : > { %v729_v22 = vld [vmem:[#allocation2 + $0x30] sm:$0xff]  ;;  %v663_v23 = vadd.f32 %v560_v18, %v304_v6  ;;  %v1360_v24 = vpop.f32.mrb[10].mxu0  ;;  %902 = vst.msk [vmem:[%s1593_s29 + $0x48] sm:$0xf] %vm883_vm3, %v1316_v60  ;;  %v1314_v10 = vpack.c.bf16 %v1638_v55, %v1638_v55 }
  0xf9   : > { %v1023_v29 = vadd.f32 %v1022_v21, %v1021_v16  ;;  %v1304_v30 = vpack.c.bf16 %v729_v22, %v729_v22  ;;  %v727_v31 = vld [vmem:[#allocation2 + $0x20] sm:$0xff]  ;;  %698 = vst.msk [vmem:[#allocation2 + $0x50] sm:$0xff] %vm263_vm1, %v665_v17  ;;  %v563_v32 = vpop.f32.mrb[11].mxu0  ;;  %v922_v35 = vadd.f32 %v921_v27, %v920_v15  ;;  %v993_v45 = vmul.f32 %v729_v22, %v729_v22  ;;  %v1644_v61 = vpop.f32.mrb[8].mxu1 }
  0xfa   : > { %v1302_v34 = vpack.c.bf16 %v727_v31, %v727_v31  ;;  %v923_v36 = vsel %vm263_vm1, %v727_v31, 0.0  ;;  %v991_v37 = vmul.f32 %v727_v31, %v727_v31  ;;  %696 = vst.msk [vmem:[#allocation2 + $0x40] sm:$0xff] %vm263_vm1, %v663_v23  ;;  %v666_v53 = vadd.f32 %v1360_v24, %v307_v39  ;;  %v1649_v3 = vpop.f32.mrb[9].mxu1  ;;  %v1667_v23 = vld [vmem:[#allocation2 + $0x98] sm:$0xff] }
  0xfb   : > { %v730_v38 = vld [vmem:[#allocation2 + $0x38] sm:$0xff]  ;;  %890 = vst.msk [vmem:[%s1593_s29 + $0x18] sm:$0xf] %vm883_vm3, %v1304_v30  ;;  %v1025_v40 = vadd.f32 %v1024_v28, %v1023_v29  ;;  %v728_v42 = vld [vmem:[#allocation2 + $0x28] sm:$0xff]  ;;  %v924_v46 = vadd.f32 %v923_v36, %v922_v35  ;;  %v664_v57 = vadd.f32 %v563_v32, %v305_v43  ;;  %v927_v62 = vsel %vm263_vm1, %v729_v22, 0.0  ;;  %v1656_v11 = vpop.f32.mrb[10].mxu1 }
  0xfc   : > { %v1305_v41 = vpack.c.bf16 %v730_v38, %v730_v38  ;;  %888 = vst.msk [vmem:[%s1593_s29 + $0x10] sm:$0xf] %vm883_vm3, %v1302_v34  ;;  %v1026_v47 = vsel %vm263_vm1, %v991_v37, 0.0  ;;  %v1303_v48 = vpack.c.bf16 %v728_v42, %v728_v42  ;;  %v925_v51 = vsel %vm263_vm1, %v728_v42, 0.0  ;;  %v1661_v18 = vpop.f32.mrb[11].mxu1  ;;  %v1673_v28 = vld [vmem:[#allocation2 + $0x88] sm:$0xff] }
  0xfd   : > { %v1027_v50 = vadd.f32 %v1026_v47, %v1025_v40  ;;  %v992_v52 = vmul.f32 %v728_v42, %v728_v42  ;;  %v926_v56 = vadd.f32 %v925_v51, %v924_v46  ;;  %v994_v63 = vmul.f32 %v730_v38, %v730_v38  ;;  %699 = vst.msk [vmem:[#allocation2 + $0x58] sm:$0xff] %vm263_vm1, %v666_v53 }
  0xfe   : > { %891 = vst.msk [vmem:[%s1593_s29 + $0x1c] sm:$0xf] %vm883_vm3, %v1305_v41  ;;  %889 = vst.msk [vmem:[%s1593_s29 + $0x14] sm:$0xf] %vm883_vm3, %v1303_v48  ;;  %v1363_v58 = vpop.f32.mrb[12].mxu0  ;;  %v1030_v12 = vsel %vm263_vm1, %v993_v45, 0.0  ;;  %v1317_v32 = vpack.c.bf16 %v1667_v23, %v1667_v23  ;;  %v1315_v35 = vpack.c.bf16 %v1673_v28, %v1673_v28 }
  0xff   : > { %v1028_v0 = vsel %vm263_vm1, %v992_v52, 0.0  ;;  %v669_v1 = vadd.f32 %v1363_v58, %v310_v49  ;;  %v576_v2 = vpop.f32.mrb[13].mxu0  ;;  %v928_v4 = vadd.f32 %v927_v62, %v926_v56  ;;  %697 = vst.msk [vmem:[#allocation2 + $0x48] sm:$0xff] %vm263_vm1, %v664_v57  ;;  %v929_v13 = vsel %vm263_vm1, %v730_v38, 0.0 }
 0x100   : > { %v1029_v5 = vadd.f32 %v1028_v0, %v1027_v50  ;;  %v733_v6 = vld [vmem:[#allocation2 + $0x50] sm:$0xff]  ;;  %v667_v7 = vadd.f32 %v576_v2, %v308_v54  ;;  %v1364_v8 = vpop.f32.mrb[14].mxu0  ;;  %900 = vst.msk [vmem:[%s1593_s29 + $0x40] sm:$0xf] %vm883_vm3, %v1314_v10  ;;  %v1032_v24 = vsel %vm263_vm1, %v994_v63, 0.0  ;;  %v1714_v10 = vld [vmem:[#allocation2 + $0xa0] sm:$0xff] }
 0x101   : > { %v1308_v14 = vpack.c.bf16 %v733_v6, %v733_v6  ;;  %v731_v15 = vld [vmem:[#allocation2 + $0x40] sm:$0xff]  ;;  %702 = vst.msk [vmem:[#allocation2 + $0x70] sm:$0xff] %vm263_vm1, %v669_v1  ;;  %v670_v16 = vadd.f32 %v1364_v8, %v311_v59  ;;  %v579_v17 = vpop.f32.mrb[15].mxu0  ;;  %v930_v21 = vadd.f32 %v929_v13, %v928_v4  ;;  %v1683_v36 = vpop.f32.mrb[12].mxu1  ;;  %v997_v41 = vmul.f32 %v733_v6, %v733_v6  ;;  %v1704_v63 = vld [vmem:[#allocation2 + $0xb0] sm:$0xff] }
 0x102   : > { %v1031_v19 = vadd.f32 %v1030_v12, %v1029_v5  ;;  %v1306_v20 = vpack.c.bf16 %v731_v15, %v731_v15  ;;  %v931_v22 = vsel %vm263_vm1, %v731_v15, 0.0  ;;  %700 = vst.msk [vmem:[#allocation2 + $0x60] sm:$0xff] %vm263_vm1, %v667_v7  ;;  %v995_v25 = vmul.f32 %v731_v15, %v731_v15  ;;  %v1687_v40 = vpop.f32.mrb[13].mxu1 }
 0x103   : > { %894 = vst.msk [vmem:[%s1593_s29 + $0x28] sm:$0xf] %vm883_vm3, %v1308_v14  ;;  %v668_v27 = vadd.f32 %v579_v17, %v309_v9  ;;  %v932_v30 = vadd.f32 %v931_v22, %v930_v21  ;;  %903 = vst.msk [vmem:[%s1593_s29 + $0x4c] sm:$0xf] %vm883_vm3, %v1317_v32  ;;  %v1692_v47 = vpop.f32.mrb[14].mxu1  ;;  %v935_v53 = vsel %vm263_vm1, %v733_v6, 0.0  ;;  %v1320_v15 = vpack.c.bf16 %v1704_v63, %v1704_v63 }
 0x104   : > { %703 = vst.msk [vmem:[#allocation2 + $0x78] sm:$0xff] %vm263_vm1, %v670_v16  ;;  %v1033_v29 = vadd.f32 %v1032_v24, %v1031_v19  ;;  %v1034_v31 = vsel %vm263_vm1, %v995_v25, 0.0  ;;  %v734_v34 = vld [vmem:[#allocation2 + $0x58] sm:$0xff]  ;;  %v1696_v52 = vpop.f32.mrb[15].mxu1  ;;  %v1038_v0 = vsel %vm263_vm1, %v997_v41, 0.0  ;;  %v1003_v21 = vmul.f32 %v1638_v55, %v1638_v55  ;;  %v317_v22 = vld [vmem:[#allocation2 + $0xa8] sm:$0xff] }
 0x105   : > { %892 = vst.msk [vmem:[%s1593_s29 + $0x20] sm:$0xf] %vm883_vm3, %v1306_v20  ;;  %v1309_v38 = vpack.c.bf16 %v734_v34, %v734_v34  ;;  %901 = vst.msk [vmem:[%s1593_s29 + $0x44] sm:$0xf] %vm883_vm3, %v1315_v35  ;;  %v998_v48 = vmul.f32 %v734_v34, %v734_v34  ;;  %v937_v1 = vsel %vm263_vm1, %v734_v34, 0.0  ;;  %v319_v16 = vld [vmem:[#allocation2 + $0xb8] sm:$0xff] }
 0x106   : > { %701 = vst.msk [vmem:[#allocation2 + $0x68] sm:$0xff] %vm263_vm1, %v668_v27  ;;  %v1035_v37 = vadd.f32 %v1034_v31, %v1033_v29  ;;  %v732_v39 = vld [vmem:[#allocation2 + $0x48] sm:$0xff]  ;;  %v947_v20 = vsel %vm263_vm1, %v1638_v55, 0.0  ;;  %v322_v24 = vld [vmem:[#allocation2 + $0xd0] sm:$0xff]  ;;  %v320_v25 = vld [vmem:[#allocation2 + $0xc0] sm:$0xff]  ;;  %v1318_v31 = vpack.c.bf16 %v1714_v10, %v1714_v10 }
 0x107   : > { %v1307_v42 = vpack.c.bf16 %v732_v39, %v732_v39  ;;  %v933_v43 = vsel %vm263_vm1, %v732_v39, 0.0  ;;  %v996_v45 = vmul.f32 %v732_v39, %v732_v39  ;;  %895 = vst.msk [vmem:[%s1593_s29 + $0x2c] sm:$0xf] %vm883_vm3, %v1309_v38  ;;  %v1040_v6 = vsel %vm263_vm1, %v998_v48, 0.0  ;;  %906 = vst.msk [vmem:[%s1593_s29 + $0x58] sm:$0xf] %vm883_vm3, %v1320_v15 }
 0x108   : > { %v737_v46 = vld [vmem:[#allocation2 + $0x70] sm:$0xff]  ;;  %v934_v49 = vadd.f32 %v933_v43, %v932_v30  ;;  %v323_v32 = vld [vmem:[#allocation2 + $0xd8] sm:$0xff]  ;;  %v321_v34 = vld [vmem:[#allocation2 + $0xc8] sm:$0xff]  ;;  %v678_v39 = vadd.f32 %v1617_v26, %v319_v16  ;;  %904 = vst.msk [vmem:[%s1593_s29 + $0x50] sm:$0xf] %vm883_vm3, %v1318_v31  ;;  %v681_v48 = vadd.f32 %v1644_v61, %v322_v24 }
 0x109   : > { %v1312_v50 = vpack.c.bf16 %v737_v46, %v737_v46  ;;  %v735_v51 = vld [vmem:[#allocation2 + $0x60] sm:$0xff]  ;;  %893 = vst.msk [vmem:[%s1593_s29 + $0x24] sm:$0xf] %vm883_vm3, %v1307_v42  ;;  %v1036_v54 = vsel %vm263_vm1, %v996_v45, 0.0  ;;  %v1001_v2 = vmul.f32 %v737_v46, %v737_v46  ;;  %v943_v27 = vsel %vm263_vm1, %v737_v46, 0.0  ;;  %v326_v35 = vld [vmem:[#allocation2 + $0xf0] sm:$0xff] }
 0x10a   : > { %v1310_v56 = vpack.c.bf16 %v735_v51, %v735_v51  ;;  %v936_v58 = vadd.f32 %v935_v53, %v934_v49  ;;  %v1037_v59 = vadd.f32 %v1036_v54, %v1035_v37  ;;  %v999_v60 = vmul.f32 %v735_v51, %v735_v51  ;;  %v324_v41 = vld [vmem:[#allocation2 + $0xe0] sm:$0xff]  ;;  %v327_v42 = vld [vmem:[#allocation2 + $0xf8] sm:$0xff]  ;;  %v325_v43 = vld [vmem:[#allocation2 + $0xe8] sm:$0xff]  ;;  %711 = vst.msk [vmem:[#allocation2 + $0xb8] sm:$0xff] %vm263_vm1, %v678_v39 }
 0x10b   : > { %v738_v57 = vld [vmem:[#allocation2 + $0x78] sm:$0xff]  ;;  %898 = vst.msk [vmem:[%s1593_s29 + $0x38] sm:$0xf] %vm883_vm3, %v1312_v50  ;;  %v939_v4 = vsel %vm263_vm1, %v735_v51, 0.0  ;;  %v1046_v29 = vsel %vm263_vm1, %v1001_v2, 0.0  ;;  %v676_v46 = vadd.f32 %v1623_v33, %v317_v22  ;;  %v679_v49 = vadd.f32 %v1649_v3, %v320_v25 }
 0x10c   : > { %v1313_v62 = vpack.c.bf16 %v738_v57, %v738_v57  ;;  %896 = vst.msk [vmem:[%s1593_s29 + $0x30] sm:$0xf] %vm883_vm3, %v1310_v56  ;;  %v1039_v7 = vadd.f32 %v1038_v0, %v1037_v59  ;;  %v938_v8 = vadd.f32 %v937_v1, %v936_v58  ;;  %v1042_v12 = vsel %vm263_vm1, %v999_v60, 0.0 }
 0x10d   : > { %v736_v5 = vld [vmem:[#allocation2 + $0x68] sm:$0xff]  ;;  %v945_v55 = vsel %vm263_vm1, %v738_v57, 0.0  ;;  %v1002_v45 = vmul.f32 %v738_v57, %v738_v57  ;;  %v682_v53 = vadd.f32 %v1656_v11, %v323_v32  ;;  %v680_v26 = vadd.f32 %v1661_v18, %v321_v34  ;;  %709 = vst.msk [vmem:[#allocation2 + $0xa8] sm:$0xff] %vm263_vm1, %v676_v46  ;;  %714 = vst.msk [vmem:[#allocation2 + $0xd0] sm:$0xff] %vm263_vm1, %v681_v48 }
 0x10e   : > { %899 = vst.msk [vmem:[%s1593_s29 + $0x3c] sm:$0xf] %vm883_vm3, %v1313_v62  ;;  %v1311_v9 = vpack.c.bf16 %v736_v5, %v736_v5  ;;  %v941_v13 = vsel %vm263_vm1, %v736_v5, 0.0  ;;  %v1000_v14 = vmul.f32 %v736_v5, %v736_v5  ;;  %v940_v17 = vadd.f32 %v939_v4, %v938_v8 }
 0x10f   : > { %v1041_v19 = vadd.f32 %v1040_v6, %v1039_v7  ;;  %712 = vst.msk [vmem:[#allocation2 + $0xc0] sm:$0xff] %vm263_vm1, %v679_v49  ;;  %v685_v33 = vadd.f32 %v1683_v36, %v326_v35  ;;  %v683_v61 = vadd.f32 %v1687_v40, %v324_v41  ;;  %v686_v3 = vadd.f32 %v1692_v47, %v327_v42 }
 0x110   : > { %897 = vst.msk [vmem:[%s1593_s29 + $0x34] sm:$0xf] %vm883_vm3, %v1311_v9  ;;  %v1044_v30 = vsel %vm263_vm1, %v1000_v14, 0.0  ;;  %v942_v38 = vadd.f32 %v941_v13, %v940_v17  ;;  %v684_v54 = vadd.f32 %v1696_v52, %v325_v43  ;;  %v1048_v11 = vsel %vm263_vm1, %v1002_v45, 0.0 }
 0x111   : > { %v1043_v37 = vadd.f32 %v1042_v12, %v1041_v19  ;;  %715 = vst.msk [vmem:[#allocation2 + $0xd8] sm:$0xff] %vm263_vm1, %v682_v53  ;;  %713 = vst.msk [vmem:[#allocation2 + $0xc8] sm:$0xff] %vm263_vm1, %v680_v26  ;;  %v1050_v18 = vsel %vm263_vm1, %v1003_v21, 0.0  ;;  %v1004_v58 = vmul.f32 %v1673_v28, %v1673_v28  ;;  %v1005_v47 = vmul.f32 %v1630_v44, %v1630_v44  ;;  %v746_v4 = vld [vmem:[#allocation2 + $0xb8] sm:$0xff] }
 0x112   : > { %v944_v50 = vadd.f32 %v943_v27, %v942_v38  ;;  %718 = vst.msk [vmem:[#allocation2 + $0xf0] sm:$0xff] %vm263_vm1, %v685_v33  ;;  %716 = vst.msk [vmem:[#allocation2 + $0xe0] sm:$0xff] %vm263_vm1, %v683_v61  ;;  %v949_v52 = vsel %vm263_vm1, %v1673_v28, 0.0  ;;  %v951_v62 = vsel %vm263_vm1, %v1630_v44, 0.0  ;;  %v1006_v0 = vmul.f32 %v1667_v23, %v1667_v23 }
 0x113   : > { %v1045_v51 = vadd.f32 %v1044_v30, %v1043_v37  ;;  %719 = vst.msk [vmem:[#allocation2 + $0xf8] sm:$0xff] %vm263_vm1, %v686_v3  ;;  %717 = vst.msk [vmem:[#allocation2 + $0xe8] sm:$0xff] %vm263_vm1, %v684_v54  ;;  %v1052_v1 = vsel %vm263_vm1, %v1004_v58, 0.0  ;;  %v1007_v2 = vmul.f32 %v1714_v10, %v1714_v10  ;;  %v1321_v7 = vpack.c.bf16 %v746_v4, %v746_v4 }
 0x114   : > { %v946_v57 = vadd.f32 %v945_v55, %v944_v50  ;;  %v744_v28 = vld [vmem:[#allocation2 + $0xa8] sm:$0xff]  ;;  %v749_v8 = vld [vmem:[#allocation2 + $0xd0] sm:$0xff]  ;;  %v1054_v12 = vsel %vm263_vm1, %v1005_v47, 0.0  ;;  %v953_v44 = vsel %vm263_vm1, %v1667_v23, 0.0  ;;  %v955_v13 = vsel %vm263_vm1, %v1714_v10, 0.0 }
 0x115   : > { %v1047_v56 = vadd.f32 %v1046_v29, %v1045_v51  ;;  %v1319_v14 = vpack.c.bf16 %v744_v28, %v744_v28  ;;  %907 = vst.msk [vmem:[%s1593_s29 + $0x5c] sm:$0xf] %vm883_vm3, %v1321_v7  ;;  %v1324_v17 = vpack.c.bf16 %v749_v8, %v749_v8  ;;  %v1058_v21 = vsel %vm263_vm1, %v1007_v2, 0.0 }
 0x116   : > { %v948_v36 = vadd.f32 %v947_v20, %v946_v57  ;;  %v747_v9 = vld [vmem:[#allocation2 + $0xc0] sm:$0xff]  ;;  %v1056_v20 = vsel %vm263_vm1, %v1006_v0, 0.0  ;;  %v1008_v22 = vmul.f32 %v744_v28, %v744_v28  ;;  %v1009_v29 = vmul.f32 %v1704_v63, %v1704_v63 }
 0x117   : > { %v1049_v40 = vadd.f32 %v1048_v11, %v1047_v56  ;;  %905 = vst.msk [vmem:[%s1593_s29 + $0x54] sm:$0xf] %vm883_vm3, %v1319_v14  ;;  %v1322_v23 = vpack.c.bf16 %v747_v9, %v747_v9  ;;  %910 = vst.msk [vmem:[%s1593_s29 + $0x68] sm:$0xf] %vm883_vm3, %v1324_v17  ;;  %v957_v30 = vsel %vm263_vm1, %v744_v28, 0.0  ;;  %v959_v32 = vsel %vm263_vm1, %v1704_v63, 0.0 }
 0x118   : > { %v950_v60 = vadd.f32 %v949_v52, %v948_v36  ;;  %v750_v19 = vld [vmem:[#allocation2 + $0xd8] sm:$0xff]  ;;  %v748_v24 = vld [vmem:[#allocation2 + $0xc8] sm:$0xff]  ;;  %v1010_v38 = vmul.f32 %v746_v4, %v746_v4  ;;  %v1060_v39 = vsel %vm263_vm1, %v1008_v22, 0.0  ;;  %v1011_v41 = vmul.f32 %v747_v9, %v747_v9 }
 0x119   : > { %v1051_v59 = vadd.f32 %v1050_v18, %v1049_v40  ;;  %v753_v27 = vld [vmem:[#allocation2 + $0xf0] sm:$0xff]  ;;  %908 = vst.msk [vmem:[%s1593_s29 + $0x60] sm:$0xf] %vm883_vm3, %v1322_v23  ;;  %v1325_v31 = vpack.c.bf16 %v750_v19, %v750_v19  ;;  %v1323_v37 = vpack.c.bf16 %v748_v24, %v748_v24  ;;  %v751_v55 = vld [vmem:[#allocation2 + $0xe0] sm:$0xff]  ;;  %v1062_v63 = vsel %vm263_vm1, %v1009_v29, 0.0 }
 0x11a   : > { %v952_v5 = vadd.f32 %v951_v62, %v950_v60  ;;  %v1328_v42 = vpack.c.bf16 %v753_v27, %v753_v27  ;;  %v754_v43 = vld [vmem:[#allocation2 + $0xf8] sm:$0xff]  ;;  %v752_v48 = vld [vmem:[#allocation2 + $0xe8] sm:$0xff]  ;;  %v961_v49 = vsel %vm263_vm1, %v746_v4, 0.0  ;;  %v963_v50 = vsel %vm263_vm1, %v747_v9, 0.0 }
 0x11b   : > { %v1053_v6 = vadd.f32 %v1052_v1, %v1051_v59  ;;  %911 = vst.msk [vmem:[%s1593_s29 + $0x6c] sm:$0xf] %vm883_vm3, %v1325_v31  ;;  %909 = vst.msk [vmem:[%s1593_s29 + $0x64] sm:$0xf] %vm883_vm3, %v1323_v37  ;;  %v1326_v51 = vpack.c.bf16 %v751_v55, %v751_v55  ;;  %v1329_v33 = vpack.c.bf16 %v754_v43, %v754_v43  ;;  %v1064_v61 = vsel %vm263_vm1, %v1010_v38, 0.0 }
 0x11c   : > { %v954_v16 = vadd.f32 %v953_v44, %v952_v5  ;;  %914 = vst.msk [vmem:[%s1593_s29 + $0x78] sm:$0xf] %vm883_vm3, %v1328_v42  ;;  %v1066_v3 = vsel %vm263_vm1, %v1011_v41, 0.0  ;;  %v1012_v54 = vmul.f32 %v748_v24, %v748_v24  ;;  %v1327_v56 = vpack.c.bf16 %v752_v48, %v752_v48 }
 0x11d   : > { %v1055_v15 = vadd.f32 %v1054_v12, %v1053_v6  ;;  %912 = vst.msk [vmem:[%s1593_s29 + $0x70] sm:$0xf] %vm883_vm3, %v1326_v51  ;;  %915 = vst.msk [vmem:[%s1593_s29 + $0x7c] sm:$0xf] %vm883_vm3, %v1329_v33  ;;  %v1013_v18 = vmul.f32 %v749_v8, %v749_v8  ;;  %v965_v58 = vsel %vm263_vm1, %v748_v24, 0.0  ;;  %v967_v47 = vsel %vm263_vm1, %v749_v8, 0.0 }
 0x11e   : > { %v956_v25 = vadd.f32 %v955_v13, %v954_v16  ;;  %913 = vst.msk [vmem:[%s1593_s29 + $0x74] sm:$0xf] %vm883_vm3, %v1327_v56  ;;  %v1014_v52 = vmul.f32 %v750_v19, %v750_v19  ;;  %v1068_v59 = vsel %vm263_vm1, %v1012_v54, 0.0  ;;  %v1015_v60 = vmul.f32 %v751_v55, %v751_v55 }
 0x11f   : > { %v1057_v10 = vadd.f32 %v1056_v20, %v1055_v15  ;;  %v1070_v1 = vsel %vm263_vm1, %v1013_v18, 0.0  ;;  %v969_v2 = vsel %vm263_vm1, %v750_v19, 0.0  ;;  %v971_v4 = vsel %vm263_vm1, %v751_v55, 0.0 }
 0x120   : > { %v958_v35 = vadd.f32 %v957_v30, %v956_v25  ;;  %v1072_v7 = vsel %vm263_vm1, %v1014_v52, 0.0  ;;  %v1074_v28 = vsel %vm263_vm1, %v1015_v60, 0.0  ;;  %v1016_v9 = vmul.f32 %v752_v48, %v752_v48 }
 0x121   : > { %v1059_v34 = vadd.f32 %v1058_v21, %v1057_v10  ;;  %v1017_v44 = vmul.f32 %v753_v27, %v753_v27  ;;  %v973_v13 = vsel %vm263_vm1, %v752_v48, 0.0  ;;  %v975_v16 = vsel %vm263_vm1, %v753_v27, 0.0 }
 0x122   : > { %v960_v45 = vadd.f32 %v959_v32, %v958_v35  ;;  %v1018_v17 = vmul.f32 %v754_v43, %v754_v43  ;;  %v1076_v19 = vsel %vm263_vm1, %v1016_v9, 0.0  ;;  %v977_v23 = vsel %vm263_vm1, %v754_v43, 0.0 }
 0x123   : > { %v1061_v46 = vadd.f32 %v1060_v39, %v1059_v34  ;;  %v1078_v22 = vsel %vm263_vm1, %v1017_v44, 0.0 }
 0x124   : > { %v962_v26 = vadd.f32 %v961_v49, %v960_v45  ;;  %v1080_v10 = vsel %vm263_vm1, %v1018_v17, 0.0 }
 0x125   : > { %v1063_v53 = vadd.f32 %v1062_v63, %v1061_v46 }
 0x126   : > { %v964_v57 = vadd.f32 %v963_v50, %v962_v26 }
 0x127   : > { %v1065_v11 = vadd.f32 %v1064_v61, %v1063_v53 }
 0x128   : > { %v966_v40 = vadd.f32 %v965_v58, %v964_v57 }
 0x129   : > { %v1067_v36 = vadd.f32 %v1066_v3, %v1065_v11 }
 0x12a   : > { %v968_v62 = vadd.f32 %v967_v47, %v966_v40 }
 0x12b   : > { %v1069_v0 = vadd.f32 %v1068_v59, %v1067_v36 }
 0x12c   : > { %v970_v6 = vadd.f32 %v969_v2, %v968_v62 }
 0x12d   : > { %v1071_v5 = vadd.f32 %v1070_v1, %v1069_v0 }
 0x12e   : > { %v972_v8 = vadd.f32 %v971_v4, %v970_v6 }
 0x12f   : > { %v1073_v12 = vadd.f32 %v1072_v7, %v1071_v5 }
 0x130   : > { %v974_v15 = vadd.f32 %v973_v13, %v972_v8 }
 0x131   : > { %v1075_v14 = vadd.f32 %v1074_v28, %v1073_v12 }
 0x132   : > { %v976_v20 = vadd.f32 %v975_v16, %v974_v15 }
 0x133   : > { %v1077_v21 = vadd.f32 %v1076_v19, %v1075_v14 }
 0x134   : > { %v978_v24 = vadd.f32 %v977_v23, %v976_v20 }
 0x135   : > { %v1079_v25 = vadd.f32 %v1078_v22, %v1077_v21 }
 0x136   : > { %v979_v29 = vrot.slane %v978_v24, 4 }
 0x137   : > { %v1081_v30 = vadd.f32 %v1080_v10, %v1079_v25 }
 0x138   : > { %v980_v31 = vadd.f32 %v979_v29, %v978_v24 }
 0x139   : > { %v1082_v32 = vrot.slane %v1081_v30, 4 }
 0x13a   : > { %v981_v27 = vrot.slane %v980_v31, 2 }
 0x13b   : > { %v1083_v34 = vadd.f32 %v1082_v32, %v1081_v30 }
 0x13c   : > { %v982_v35 = vadd.f32 %v981_v27, %v980_v31 }
 0x13d   : > { %v1084_v37 = vrot.slane %v1083_v34, 2 }
 0x13e   : > { %v983_v55 = vrot.slane %v982_v35, 1 }
 0x13f   : > { %v1085_v38 = vadd.f32 %v1084_v37, %v1083_v34 }
 0x140   : > { %v984_v39 = vadd.f32 %v983_v55, %v982_v35 }
 0x141   : > { %v1086_v41 = vrot.slane %v1085_v38, 1 }
 0x142   : > { %986 = vst.msk [vmem:[%s254_s6] sm:$0x1] %vm985_vm4, %v984_v39 }
 0x143   : > { %v1087_v42 = vadd.f32 %v1086_v41, %v1085_v38 }
 0x145   : > { %1088 = vst.msk [vmem:[%s257_s9] sm:$0x1] %vm985_vm4, %v1087_v42 }
 0x146 PF: > { %s15_s17 = sadd.s32 1, %s1448_s17   ;;  %s1846_s15 = smov %s1444_s16 }
 0x147   : > { %p12_p6 = scmp.ge.s32.totalorder %s15_s17, 4   ;;  %s1847_s16 = smov %s1849_s18 }
 0x149   :  { %14 = sbr.rel (!%p12_p6) target bundleno = 2 (0x2), region = 93 }

// kernel: residual_block_forward.7
= control target key start
LH: loop header
LB: loop body
LE: loop exit
PB: predicated region body
PF: predicated region fallthrough
CT: control target
= control target key end

     0   :  { %s471_s21 = smov 0   ;;  %s503_s0 = inlined_call_operand.vmem [shape: bf16[32,128], index: 0, kind: input, shape index: {}]   ;;  %s504_s1 = inlined_call_operand.vmem [shape: f32[1,128], index: 1, kind: input, shape index: {}]   ;;  %s505_s2 = inlined_call_operand.vmem [shape: f32[1,128], index: 2, kind: input, shape index: {}]   ;;  %s506_s3 = inlined_call_operand.vmem [shape: bf16[32,128], index: 3, kind: input, shape index: {}]   ;;  %s507_s4 = inlined_call_operand.vmem [shape: f32[1,128], index: 4, kind: input, shape index: {}]   ;;  %s508_s5 = inlined_call_operand.vmem [shape: f32[1,128], index: 5, kind: input, shape index: {}]   ;;  %s509_s6 = inlined_call_operand.vmem [shape: f32[32,128], index: 6, kind: output, shape index: {}]  }
   0x1 LB: > { %s395_s22 = sadd.s32 4294967295, %s434_s21   ;;  %p399_p0 = scmp.ge.s32.totalorder %s434_s21, 1  ;;  %s434_s21 = sphi %s471_s21, %s16_s21  }
   0x2   : > { %p224_p1 = scmp.lt.s32.totalorder %s434_s21, 3 }
   0x4   : > { %p225_p2 = pnand %p399_p0, %p224_p1 }
   0x5   : > { %s400_s23 = sshll.u32 (!%p225_p2), %s395_s22, 1  ;;  %v406_v0 = vld [vmem:[%s504_s1] ss:$0 sm:$0xff] (!%p225_p2) }
   0x6   : > { %228 = sbr.rel (%p225_p2) target bundleno = 30 (0x1e), region = 44  ;;  %p260_p3 = scmp.lt.s32.totalorder (!%p225_p2), %s400_s23, 3  ;;  %v408_v3 = vld [vmem:[%s507_s4] ss:$0 sm:$0xff] (!%p225_p2) }
   0x7   : > { %v407_v8 = vld [vmem:[%s505_s2] ss:$0 sm:$0xff] (!%p225_p2) }
   0x8   : > { %v409_v15 = vld [vmem:[%s508_s5] ss:$0 sm:$0xff] (!%p225_p2) }
   0xd   : > { %s511_s23 = smov (!%p260_p3, %s400_s23), 3 }
   0xe   : > { %s401_s24 = sshll.u32 %s511_s23, 2  ;;  %s405_s15 = sshll.u32 %s511_s23, 3 }
   0xf   : > { %s263_s27 = scalar_lea.vmem %s503_s0, %s401_s24  ;;  %s269_s30 = scalar_lea.vmem %s506_s3, %s401_s24 }
  0x10   : > { %v413_v1 = vld [vmem:[%s263_s27] sm:$0xff]   ;;  %s275_s18 = scalar_lea.vmem %s509_s6, %s405_s15 }
  0x11   : > { %v417_v2 = vld [vmem:[%s269_s30] sm:$0xff]   ;;  %v414_v4 = vunpack.c.l.bf16 %v413_v1  ;;  %v415_v5 = vunpack.c.h.bf16 %v413_v1 }
  0x12   : > { %v418_v6 = vunpack.c.l.bf16 %v417_v2  ;;  %v419_v7 = vunpack.c.h.bf16 %v417_v2 }
  0x13   : > { %v288_v9 = vmul.f32 %v414_v4, %v406_v0  ;;  %v289_v10 = vmul.f32 %v415_v5, %v406_v0 }
  0x14   : > { %v310_v11 = vmul.f32 %v418_v6, %v408_v3  ;;  %v311_v12 = vmul.f32 %v419_v7, %v408_v3 }
  0x15   : > { %v297_v13 = vadd.f32 %v407_v8, %v288_v9  ;;  %v298_v14 = vadd.f32 %v407_v8, %v289_v10 }
  0x17   : > { %v312_v16 = vadd.f32 %v310_v11, %v297_v13  ;;  %v313_v17 = vadd.f32 %v311_v12, %v298_v14 }
  0x19   : > { %v321_v18 = vadd.f32 %v409_v15, %v312_v16  ;;  %v322_v19 = vadd.f32 %v409_v15, %v313_v17 }
  0x1b   : > { %v323_v20 = vmax.f32 %v321_v18, 0.0  ;;  %v324_v21 = vmax.f32 %v322_v19, 0.0 }
  0x1d   : > { %325 = vst [vmem:[%s275_s18] sm:$0xff] %v323_v20  ;;  %326 = vst [vmem:[%s275_s18 + $0x8] sm:$0xff] %v324_v21 }
  0x1e PF: > { %s16_s21 = sadd.s32 1, %s434_s21  }
  0x1f   : > { %p13_p4 = scmp.ge.s32.totalorder %s16_s21, 4  }
  0x21   :  { %15 = sbr.rel (!%p13_p4) target bundleno = 1 (0x1), region = 77 }

// kernel: residual_block_forward.4
= control target key start
LH: loop header
LB: loop body
LE: loop exit
PB: predicated region body
PF: predicated region fallthrough
CT: control target
= control target key end

     0   :  { %s2459_s15 = smov 0   ;;  %s3098_s0 = inlined_call_operand.vmem [shape: bf16[2,16,16,4], index: 0, kind: input, shape index: {}]   ;;  %s3099_s1 = inlined_call_operand.vmem [shape: bf16[36,8], index: 1, kind: input, shape index: {}]   ;;  %s3100_s2 = inlined_call_operand.vmem [shape: bf16[512,8], index: 2, kind: output, shape index: {0}]   ;;  %s3101_s3 = inlined_call_operand.vmem [shape: f32[2,1,8], index: 3, kind: output, shape index: {1}]   ;;  %s3102_s4 = inlined_call_operand.vmem [shape: f32[2,1,8], index: 4, kind: output, shape index: {2}]  }
   0x1 LB: > { %s2465_s16 = sadd.s32 4294967295, %s2423_s15   ;;  %p2162_p0 = scmp.ge.s32.totalorder %s2423_s15, 1  ;;  %s2423_s15 = sphi %s2459_s15, %s15_s15  }
   0x2   : > { %p167_p1 = scmp.lt.s32.totalorder %s2423_s15, 3 }
   0x4   : > { %p168_p2 = pnand %p2162_p0, %p167_p1 }
   0x5   : > { %vm217_vm0 = vcmask (!%p168_p2), 31744   ;;  %vm220_vm1 = vcmask (!%p168_p2), 25600   ;;  %v2425_v0 = vmov (!%p168_p2), 0.0   ;;  %p199_p3 = scmp.lt.s32.totalorder (!%p168_p2), %s2465_s16, 1  ;;  %s2426_s22 = smov (!%p168_p2), 4   ;;  %vm1552_vm2 = vcmask (!%p168_p2), 1041408  }
   0x6   : > { %171 = sbr.rel (%p168_p2) target bundleno = 652 (0x28c), region = 28  ;;  %218 = vst.msk [vmem:[#allocation2] sm:$0xff] (!%p168_p2), %vm217_vm0, %v2425_v0  ;;  %219 = vst.msk [vmem:[#allocation2 + $0x8] sm:$0xff] (!%p168_p2), %vm217_vm0, %v2425_v0  ;;  %s2427_s23 = smov (!%p168_p2), 8   ;;  %vm546_vm3 = vcmask (!%p168_p2), 64544   ;;  %vm675_vm4 = vcmask (!%p168_p2), 97344  }
   0x7   : > { %221 = vst.msk [vmem:[#allocation2 + $0x10] sm:$0x3] (!%p168_p2), %vm220_vm1, %v2425_v0  ;;  %224 = vst.msk [vmem:[#allocation2 + $0x28] sm:$0x3] (!%p168_p2), %vm220_vm1, %v2425_v0  ;;  %s2428_s24 = smov (!%p168_p2), 12   ;;  %s2429_s25 = smov (!%p168_p2), 16  }
   0x8   : > { %222 = vst.msk [vmem:[#allocation2 + $0x18] sm:$0xff] (!%p168_p2), %vm217_vm0, %v2425_v0  ;;  %223 = vst.msk [vmem:[#allocation2 + $0x20] sm:$0xff] (!%p168_p2), %vm217_vm0, %v2425_v0  ;;  %s2430_s26 = smov (!%p168_p2), 20   ;;  %s2431_s27 = smov (!%p168_p2), 24   ;;  %vm804_vm5 = vcmask (!%p168_p2), 130144   ;;  %vm933_vm6 = vcmask (!%p168_p2), 162944  }
   0x9   : > { %225 = vst.msk [vmem:[#allocation2 + $0x30] sm:$0xff] (!%p168_p2), %vm217_vm0, %v2425_v0  ;;  %226 = vst.msk [vmem:[#allocation2 + $0x38] sm:$0xff] (!%p168_p2), %vm217_vm0, %v2425_v0  ;;  %s2432_s6 = smov (!%p168_p2), 28   ;;  %s2433_s9 = smov (!%p168_p2), 32   ;;  %vm1062_vm7 = vcmask (!%p168_p2), 195744   ;;  %vm1192_vm8 = vcmask (!%p168_p2), 228544  }
   0xa   : > { %227 = vst.msk [vmem:[#allocation2 + $0x40] sm:$0x3] (!%p168_p2), %vm220_vm1, %v2425_v0  ;;  %230 = vst.msk [vmem:[#allocation2 + $0x58] sm:$0x3] (!%p168_p2), %vm220_vm1, %v2425_v0  ;;  %vm1321_vm9 = vcmask (!%p168_p2), 261344   ;;  %vm1450_vm10 = vcmask (!%p168_p2), 294144  }
   0xb   : > { %228 = vst.msk [vmem:[#allocation2 + $0x48] sm:$0xff] (!%p168_p2), %vm217_vm0, %v2425_v0  ;;  %229 = vst.msk [vmem:[#allocation2 + $0x50] sm:$0xff] (!%p168_p2), %vm217_vm0, %v2425_v0  ;;  %vm1503_vm11 = vcmask (!%p168_p2), 293888   ;;  %s2165_s10 = sshll.u32 (!%p168_p2), %s2465_s16, 5  ;;  %vm1845_vm12 = vcmask (!%p168_p2), 60416   ;;  %vm1878_vm13 = vcmask (!%p168_p2), 64512  }
   0xc   : > { %231 = vst.msk [vmem:[#allocation2 + $0x60] sm:$0xff] (!%p168_p2), %vm217_vm0, %v2425_v0  ;;  %232 = vst.msk [vmem:[#allocation2 + $0x68] sm:$0xff] (!%p168_p2), %vm217_vm0, %v2425_v0  ;;  %p205_p4 = scmp.lt.s32.totalorder (!%p168_p2), %s2165_s10, 63  ;;  %vm1948_vm14 = vcmask (!%p168_p2), 57344  }
   0xd   : > { %233 = vst.msk [vmem:[#allocation2 + $0x70] sm:$0x3] %vm220_vm1, %v2425_v0  ;;  %236 = vst.msk [vmem:[#allocation2 + $0x88] sm:$0x3] %vm220_vm1, %v2425_v0  ;;  %s2525_s17 = scalar_select %p199_p3, %s2465_s16, 1  ;;  %v434_v4 = vld [vmem:[#allocation2 + $0x1] sm:$0xff] }
   0xe   : > { %234 = vst.msk [vmem:[#allocation2 + $0x78] sm:$0xff] %vm217_vm0, %v2425_v0  ;;  %235 = vst.msk [vmem:[#allocation2 + $0x80] sm:$0xff] %vm217_vm0, %v2425_v0  ;;  %v435_v5 = vld [vmem:[#allocation2 + $0x9] sm:$0xff]  ;;  %v370_v29 = vld [vmem:[#allocation2] sm:$0xff]  ;;  %s3104_s10 = smov (!%p205_p4, %s2165_s10), 63 }
   0xf   : > { %237 = vst.msk [vmem:[#allocation2 + $0x90] sm:$0xff] %vm217_vm0, %v2425_v0  ;;  %238 = vst.msk [vmem:[#allocation2 + $0x98] sm:$0xff] %vm217_vm0, %v2425_v0  ;;  %s2220_s18 = sshll.u32 %s2525_s17, 7  ;;  %v563_v6 = vld [vmem:[#allocation2 + $0x2] sm:$0xff]  ;;  %v466_v11 = vpack.c.bf16 %v435_v5, %v434_v4  ;;  %v564_v12 = vld [vmem:[#allocation2 + $0xa] sm:$0xff]  ;;  %s2166_s11 = sshll.u32 %s3104_s10, 2 }
  0x10   : > { %239 = vst.msk [vmem:[#allocation2 + $0xa0] sm:$0x3] %vm220_vm1, %v2425_v0  ;;  %242 = vst.msk [vmem:[#allocation2 + $0xb8] sm:$0x3] %vm220_vm1, %v2425_v0  ;;  %s2531_s21 = scalar_lea.vmem %s3098_s0, %s2220_s18  ;;  %v595_v17 = vpack.c.bf16 %v564_v12, %v563_v6  ;;  %v371_v28 = vld [vmem:[#allocation2 + $0x8] sm:$0xff]  ;;  %s2953_s14 = scalar_lea.vmem %s3100_s2, %s2166_s11 }
  0x11   : > { %240 = vst.msk [vmem:[#allocation2 + $0xa8] sm:$0xff] %vm217_vm0, %v2425_v0  ;;  %241 = vst.msk [vmem:[#allocation2 + $0xb0] sm:$0xff] %vm217_vm0, %v2425_v0  ;;  %v2254_v1 = vld [vmem:[%s2531_s21] sm:$0xff]   ;;  %v2317_v2 = vld [vmem:[%s2531_s21 + $0x8] sm:$0xff]   ;;  %498 = vrot.lane.b32.xlu0 %v466_v11, %s2426_s22  ;;  %v402_v34 = vpack.c.bf16 %v371_v28, %v370_v29  ;;  %s212_s19 = scalar_lea.vmem %s3101_s3, %s2525_s17 }
  0x12   : > { %243 = vst.msk [vmem:[#allocation2 + $0xc0] sm:$0xff] %vm217_vm0, %v2425_v0  ;;  %244 = vst.msk [vmem:[#allocation2 + $0xc8] sm:$0xff] %vm217_vm0, %v2425_v0  ;;  %v2318_v3 = vld [vmem:[%s2531_s21 + $0x10] sm:$0xff]   ;;  %v2255_v7 = vunpack.c.l.bf16 %v2254_v1  ;;  %v2256_v8 = vunpack.c.h.bf16 %v2254_v1  ;;  %v2259_v9 = vunpack.c.l.bf16 %v2317_v2  ;;  %v2260_v10 = vunpack.c.h.bf16 %v2317_v2  ;;  %v2319_v15 = vld [vmem:[%s2531_s21 + $0x18] sm:$0xff]   ;;  %627 = vrot.lane.b32.xlu1 %v595_v17, %s2427_s23 }
  0x13   : > { %245 = vst.msk [vmem:[#allocation2 + $0xd0] sm:$0x3] %vm220_vm1, %v2425_v0  ;;  %248 = vst.msk [vmem:[#allocation2 + $0xe8] sm:$0x3] %vm220_vm1, %v2425_v0  ;;  %v2263_v13 = vunpack.c.l.bf16 %v2318_v3  ;;  %v2264_v14 = vunpack.c.h.bf16 %v2318_v3  ;;  %v2320_v16 = vld [vmem:[%s2531_s21 + $0x20] sm:$0xff]   ;;  %v2267_v18 = vunpack.c.l.bf16 %v2319_v15  ;;  %v2268_v19 = vunpack.c.h.bf16 %v2319_v15  ;;  %v2321_v21 = vld [vmem:[%s2531_s21 + $0x28] sm:$0xff]  }
  0x14   : > { %246 = vst.msk [vmem:[#allocation2 + $0xd8] sm:$0xff] %vm217_vm0, %v2425_v0  ;;  %247 = vst.msk [vmem:[#allocation2 + $0xe0] sm:$0xff] %vm217_vm0, %v2425_v0  ;;  %v2271_v20 = vunpack.c.l.bf16 %v2320_v16  ;;  %v2322_v22 = vld [vmem:[%s2531_s21 + $0x30] sm:$0xff]   ;;  %v2323_v23 = vld [vmem:[%s2531_s21 + $0x38] sm:$0xff]   ;;  %v2272_v24 = vunpack.c.h.bf16 %v2320_v16  ;;  %v2275_v25 = vunpack.c.l.bf16 %v2321_v21  ;;  %v2276_v26 = vunpack.c.h.bf16 %v2321_v21 }
  0x15   : > { %249 = vst.msk [vmem:[#allocation2 + $0xf0] sm:$0xff] %vm217_vm0, %v2425_v0  ;;  %250 = vst.msk [vmem:[#allocation2 + $0xf8] sm:$0xff] %vm217_vm0, %v2425_v0  ;;  %v2279_v27 = vunpack.c.l.bf16 %v2322_v22  ;;  %v2324_v30 = vld [vmem:[%s2531_s21 + $0x40] sm:$0xff]   ;;  %v2280_v31 = vunpack.c.h.bf16 %v2322_v22  ;;  %v2283_v32 = vunpack.c.l.bf16 %v2323_v23  ;;  %v2284_v33 = vunpack.c.h.bf16 %v2323_v23  ;;  %v2325_v35 = vld [vmem:[%s2531_s21 + $0x48] sm:$0xff]  }
  0x16   : > { %251 = vst.msk [vmem:[#allocation2 + $0x100] sm:$0x3] %vm220_vm1, %v2425_v0  ;;  %254 = vst.msk [vmem:[#allocation2 + $0x118] sm:$0x3] %vm220_vm1, %v2425_v0  ;;  %v2287_v36 = vunpack.c.l.bf16 %v2324_v30  ;;  %v2288_v37 = vunpack.c.h.bf16 %v2324_v30  ;;  %v2291_v38 = vunpack.c.l.bf16 %v2325_v35  ;;  %v2292_v39 = vunpack.c.h.bf16 %v2325_v35  ;;  %v2415_v22 = vld [vmem:[%s3099_s1 + $0x8] sm:$0xff]   ;;  %v2326_v23 = vld [vmem:[%s2531_s21 + $0x50] sm:$0xff]  }
  0x17   : > { %252 = vst.msk [vmem:[#allocation2 + $0x108] sm:$0xff] %vm217_vm0, %v2425_v0  ;;  %253 = vst.msk [vmem:[#allocation2 + $0x110] sm:$0xff] %vm217_vm0, %v2425_v0 }
  0x18   : > { %255 = vst.msk [vmem:[#allocation2 + $0x120] sm:$0xff] %vm217_vm0, %v2425_v0  ;;  %256 = vst.msk [vmem:[#allocation2 + $0x128] sm:$0xff] %vm217_vm0, %v2425_v0 }
  0x19   : > { %257 = vst.msk [vmem:[#allocation2 + $0x130] sm:$0x3] %vm220_vm1, %v2425_v0  ;;  %260 = vst.msk [vmem:[#allocation2 + $0x148] sm:$0x3] %vm220_vm1, %v2425_v0 }
  0x1a   : > { %258 = vst.msk [vmem:[#allocation2 + $0x138] sm:$0xff] %vm217_vm0, %v2425_v0  ;;  %259 = vst.msk [vmem:[#allocation2 + $0x140] sm:$0xff] %vm217_vm0, %v2425_v0 }
  0x1b   : > { %261 = vst.msk [vmem:[#allocation2 + $0x150] sm:$0xff] %vm217_vm0, %v2425_v0  ;;  %262 = vst.msk [vmem:[#allocation2 + $0x158] sm:$0xff] %vm217_vm0, %v2425_v0 }
  0x1c   : > { %263 = vst.msk [vmem:[#allocation2 + $0x160] sm:$0x3] %vm220_vm1, %v2425_v0  ;;  %266 = vst.msk [vmem:[#allocation2 + $0x178] sm:$0x3] %vm220_vm1, %v2425_v0 }
  0x1d   : > { %264 = vst.msk [vmem:[#allocation2 + $0x168] sm:$0xff] %vm217_vm0, %v2425_v0  ;;  %265 = vst.msk [vmem:[#allocation2 + $0x170] sm:$0xff] %vm217_vm0, %v2425_v0 }
  0x1e   : > { %267 = vst.msk [vmem:[#allocation2 + $0x180] sm:$0xff] %vm217_vm0, %v2425_v0  ;;  %268 = vst.msk [vmem:[#allocation2 + $0x188] sm:$0xff] %vm217_vm0, %v2425_v0 }
  0x1f   : > { %269 = vst.msk [vmem:[#allocation2 + $0x190] sm:$0x3] %vm220_vm1, %v2425_v0  ;;  %272 = vst.msk [vmem:[#allocation2 + $0x1a8] sm:$0x3] %vm220_vm1, %v2425_v0 }
  0x20   : > { %270 = vst.msk [vmem:[#allocation2 + $0x198] sm:$0xff] %vm217_vm0, %v2425_v0  ;;  %271 = vst.msk [vmem:[#allocation2 + $0x1a0] sm:$0xff] %vm217_vm0, %v2425_v0 }
  0x21   : > { %338 = vst.msk [vmem:[#allocation2 + $0x19] sm:$0xff] %vm217_vm0, %v2255_v7  ;;  %339 = vst.msk [vmem:[#allocation2 + $0x21] sm:$0xff] %vm217_vm0, %v2256_v8 }
  0x22   : > { %340 = vst.msk [vmem:[#allocation2 + $0x31] sm:$0xff] %vm217_vm0, %v2259_v9  ;;  %341 = vst.msk [vmem:[#allocation2 + $0x39] sm:$0xff] %vm217_vm0, %v2260_v10 }
  0x23   : > { %342 = vst.msk [vmem:[#allocation2 + $0x49] sm:$0xff] %vm217_vm0, %v2263_v13  ;;  %343 = vst.msk [vmem:[#allocation2 + $0x51] sm:$0xff] %vm217_vm0, %v2264_v14 }
  0x24   : > { %344 = vst.msk [vmem:[#allocation2 + $0x61] sm:$0xff] %vm217_vm0, %v2267_v18  ;;  %345 = vst.msk [vmem:[#allocation2 + $0x69] sm:$0xff] %vm217_vm0, %v2268_v19 }
  0x25   : > { %346 = vst.msk [vmem:[#allocation2 + $0x79] sm:$0xff] %vm217_vm0, %v2271_v20  ;;  %347 = vst.msk [vmem:[#allocation2 + $0x81] sm:$0xff] %vm217_vm0, %v2272_v24  ;;  %v2414_v20 = vld [vmem:[%s3099_s1] sm:$0xff]   ;;  %v2295_v24 = vunpack.c.l.bf16 %v2326_v23 }
  0x26   : > { %348 = vst.msk [vmem:[#allocation2 + $0x91] sm:$0xff] %vm217_vm0, %v2275_v25  ;;  %349 = vst.msk [vmem:[#allocation2 + $0x99] sm:$0xff] %vm217_vm0, %v2276_v26  ;;  %2351 = vmatprep.subr.bf16.mxu0 %v2414_v20  ;;  %v2296_v25 = vunpack.c.h.bf16 %v2326_v23  ;;  %2389 = vmatprep.subr.bf16.mxu1 %v2414_v20  ;;  %v2416_v26 = vld [vmem:[%s3099_s1 + $0x10] ss:$0 sps:$4 sm:$0x33]   ;;  %v2331_v23 = vld [vmem:[%s2531_s21 + $0x78] sm:$0xff]  }
  0x27   : > { %350 = vst.msk [vmem:[#allocation2 + $0xa9] sm:$0xff] %vm217_vm0, %v2279_v27  ;;  %351 = vst.msk [vmem:[#allocation2 + $0xb1] sm:$0xff] %vm217_vm0, %v2280_v31  ;;  %2352 = vmatpush3.bf16.msra.mxu0 %v2414_v20  ;;  %2392 = vmatpush3.bf16.msra.mxu1 %v2414_v20  ;;  %v1554_v30 = vsel %vm1552_vm2, %v2416_v26, 0  ;;  %v2327_v31 = vld [vmem:[%s2531_s21 + $0x58] sm:$0xff]  }
  0x28   : > { %352 = vst.msk [vmem:[#allocation2 + $0xc1] sm:$0xff] %vm217_vm0, %v2283_v32  ;;  %353 = vst.msk [vmem:[#allocation2 + $0xc9] sm:$0xff] %vm217_vm0, %v2284_v33  ;;  %v436_v40 = vld [vmem:[#allocation2 + $0x19] sm:$0xff]  ;;  %v437_v41 = vld [vmem:[#allocation2 + $0x21] sm:$0xff]  ;;  %2353 = vmatprep.subr.bf16.mxu0 %v2415_v22  ;;  %2390 = vmatprep.subr.bf16.mxu1 %v2415_v22  ;;  %v2299_v32 = vunpack.c.l.bf16 %v2327_v31  ;;  %v2300_v33 = vunpack.c.h.bf16 %v2327_v31 }
  0x29   : > { %418 = vst.msk [vmem:[#allocation3] sm:$0xff] %vm217_vm0, %v402_v34  ;;  %354 = vst.msk [vmem:[#allocation2 + $0xd9] sm:$0xff] %vm217_vm0, %v2287_v36  ;;  %v565_v42 = vld [vmem:[#allocation2 + $0x1a] sm:$0xff]  ;;  %v467_v43 = vpack.c.bf16 %v437_v41, %v436_v40  ;;  %v566_v44 = vld [vmem:[#allocation2 + $0x22] sm:$0xff] }
  0x2a   : > { %355 = vst.msk [vmem:[#allocation2 + $0xe1] sm:$0xff] %vm217_vm0, %v2288_v37  ;;  %356 = vst.msk [vmem:[#allocation2 + $0xf1] sm:$0xff] %vm217_vm0, %v2291_v38  ;;  %v692_v45 = vld [vmem:[#allocation2 + $0x18] sm:$0xff]  ;;  %v693_v46 = vld [vmem:[#allocation2 + $0x20] sm:$0xff]  ;;  %v596_v47 = vpack.c.bf16 %v566_v44, %v565_v42 }
  0x2b   : > { %357 = vst.msk [vmem:[#allocation2 + $0xf9] sm:$0xff] %vm217_vm0, %v2292_v39  ;;  %v724_v48 = vpack.c.bf16 %v693_v46, %v692_v45  ;;  %v694_v49 = vld [vmem:[#allocation2 + $0x30] sm:$0xff]  ;;  %v695_v50 = vld [vmem:[#allocation2 + $0x38] sm:$0xff]  ;;  %500 = vrot.lane.b32.xlu0 %v467_v43, %s2426_s22  ;;  %v1082_v52 = vld [vmem:[#allocation2 + $0x48] sm:$0xff]  ;;  %2354 = vmatpush3.bf16.msra.mxu0 %v2415_v22 }
  0x2c   : > { %v725_v51 = vpack.c.bf16 %v695_v50, %v694_v49  ;;  %629 = vrot.lane.b32.xlu1 %v596_v47, %s2427_s23  ;;  %v1083_v53 = vld [vmem:[#allocation2 + $0x50] sm:$0xff]  ;;  %v824_v55 = vld [vmem:[#allocation2 + $0x39] sm:$0xff]  ;;  %v699_v58 = vld [vmem:[#allocation2 + $0x68] sm:$0xff]  ;;  %358 = vst.msk [vmem:[#allocation2 + $0x109] sm:$0xff] %vm217_vm0, %v2295_v24  ;;  %2393 = vmatpush3.bf16.msra.mxu1 %v2415_v22  ;;  %v2316_v24 = vunpack.c.h.bf16 %v2331_v23 }
  0x2d   : > { %419 = vst.msk [vmem:[#allocation3 + $0x8] sm:$0xff] %vm217_vm0, %v724_v48  ;;  %v823_v54 = vld [vmem:[#allocation2 + $0x31] sm:$0xff]  ;;  %v2569_v56 = vpack.c.bf16 %v1083_v53, %v1082_v52  ;;  %v698_v57 = vld [vmem:[#allocation2 + $0x60] sm:$0xff]  ;;  %v1211_v14 = vld [vmem:[#allocation2 + $0x49] sm:$0xff]  ;;  %2395 = vmatprep.subr.msk.bf16.mxu0 %vm1552_vm2, %v2416_v26  ;;  %2396 = vmatprep.subr.msk.bf16.mxu1 %vm1552_vm2, %v2416_v26 }
  0x2e   : > { %420 = vst.msk [vmem:[#allocation3 + $0x10] sm:$0xff] %vm217_vm0, %v725_v51  ;;  %v2573_v59 = vpack.c.bf16 %v699_v58, %v698_v57  ;;  %v2578_v60 = vpack.c.bf16 %v824_v55, %v823_v54  ;;  %v1086_v61 = vld [vmem:[#allocation2 + $0x78] sm:$0xff]  ;;  %v1087_v62 = vld [vmem:[#allocation2 + $0x80] sm:$0xff]  ;;  %v702_v2 = vld [vmem:[#allocation2 + $0x90] sm:$0xff] }
  0x2f   : > { %756 = vrot.lane.b32.xlu0 %v724_v48, %s2428_s24  ;;  %421 = vst.msk [vmem:[#allocation3 + $0x18] sm:$0xff] %vm217_vm0, %v2569_v56  ;;  %v952_v63 = vld [vmem:[#allocation2 + $0x32] sm:$0xff]  ;;  %v953_v0 = vld [vmem:[#allocation2 + $0x3a] sm:$0xff]  ;;  %v2580_v1 = vpack.c.bf16 %v1087_v62, %v1086_v61  ;;  %v1090_v6 = vld [vmem:[#allocation2 + $0xa8] sm:$0xff]  ;;  %2356 = vmatpush3.bf16.msra.mxu0 %v1554_v30 }
  0x30   : > { %758 = vrot.lane.b32.xlu1 %v725_v51, %s2428_s24  ;;  %422 = vst.msk [vmem:[#allocation3 + $0x20] sm:$0xff] %vm217_vm0, %v2573_v59  ;;  %v703_v3 = vld [vmem:[#allocation2 + $0x98] sm:$0xff]  ;;  %v2591_v5 = vpack.c.bf16 %v953_v0, %v952_v63  ;;  %v1091_v7 = vld [vmem:[#allocation2 + $0xb0] sm:$0xff]  ;;  %v706_v9 = vld [vmem:[#allocation2 + $0xc0] sm:$0xff]  ;;  %2394 = vmatpush3.bf16.msra.mxu1 %v1554_v30 }
  0x31   : > { %v2585_v4 = vpack.c.bf16 %v703_v3, %v702_v2  ;;  %423 = vst.msk [vmem:[#allocation3 + $0x28] sm:$0xff] %vm217_vm0, %v2580_v1  ;;  %v2593_v8 = vpack.c.bf16 %v1091_v7, %v1090_v6  ;;  %v707_v10 = vld [vmem:[#allocation2 + $0xc8] sm:$0xff]  ;;  %v1094_v12 = vld [vmem:[#allocation2 + $0xd8] sm:$0xff]  ;;  %v1095_v13 = vld [vmem:[#allocation2 + $0xe0] sm:$0xff] }
  0x32   : > { %v2598_v11 = vpack.c.bf16 %v707_v10, %v706_v9  ;;  %v1212_v15 = vld [vmem:[#allocation2 + $0x51] sm:$0xff]  ;;  %v2604_v16 = vpack.c.bf16 %v1095_v13, %v1094_v12  ;;  %359 = vst.msk [vmem:[#allocation2 + $0x111] sm:$0xff] %vm217_vm0, %v2296_v25  ;;  %360 = vst.msk [vmem:[#allocation2 + $0x121] sm:$0xff] %vm217_vm0, %v2299_v32  ;;  %v827_v37 = vld [vmem:[#allocation2 + $0x61] sm:$0xff] }
  0x33   : > { %885 = vrot.lane.b32.xlu0 %v467_v43, %s2429_s25  ;;  %424 = vst.msk [vmem:[#allocation3 + $0x30] sm:$0xff] %vm217_vm0, %v2585_v4  ;;  %425 = vst.msk [vmem:[#allocation3 + $0x38] sm:$0xff] %vm217_vm0, %v2593_v8  ;;  %v710_v17 = vld [vmem:[#allocation2 + $0xf0] sm:$0xff]  ;;  %v711_v18 = vld [vmem:[#allocation2 + $0xf8] sm:$0xff]  ;;  %v1242_v21 = vpack.c.bf16 %v1212_v15, %v1211_v14 }
  0x34   : > { %887 = vrot.lane.b32.xlu1 %v2578_v60, %s2429_s25  ;;  %426 = vst.msk [vmem:[#allocation3 + $0x40] sm:$0xff] %vm217_vm0, %v2598_v11  ;;  %v2609_v19 = vpack.c.bf16 %v711_v18, %v710_v17  ;;  %427 = vst.msk [vmem:[#allocation3 + $0x48] sm:$0xff] %vm217_vm0, %v2604_v16  ;;  %v1340_v27 = vld [vmem:[#allocation2 + $0x4a] sm:$0xff]  ;;  %v1341_v28 = vld [vmem:[#allocation2 + $0x52] sm:$0xff] }
  0x35   : > { %v1371_v29 = vpack.c.bf16 %v1341_v28, %v1340_v27  ;;  %v1098_v34 = vld [vmem:[#allocation2 + $0x108] sm:$0xff]  ;;  %361 = vst.msk [vmem:[#allocation2 + $0x129] sm:$0xff] %vm217_vm0, %v2300_v33  ;;  %v2328_v42 = vld [vmem:[%s2531_s21 + $0x60] sm:$0xff]   ;;  %v831_v61 = vld [vmem:[#allocation2 + $0x91] sm:$0xff] }
  0x36   : > { %428 = vst.msk [vmem:[#allocation3 + $0x50] sm:$0xff] %vm217_vm0, %v2609_v19  ;;  %v828_v38 = vld [vmem:[#allocation2 + $0x69] sm:$0xff]  ;;  %v2303_v44 = vunpack.c.l.bf16 %v2328_v42  ;;  %v2304_v45 = vunpack.c.h.bf16 %v2328_v42  ;;  %v1215_v49 = vld [vmem:[#allocation2 + $0x79] sm:$0xff]  ;;  %v1216_v50 = vld [vmem:[#allocation2 + $0x81] sm:$0xff] }
  0x37   : > { %1014 = vrot.lane.b32.xlu0 %v596_v47, %s2430_s26  ;;  %v856_v43 = vpack.c.bf16 %v828_v38, %v827_v37  ;;  %v956_v46 = vld [vmem:[#allocation2 + $0x62] sm:$0xff]  ;;  %v957_v47 = vld [vmem:[#allocation2 + $0x6a] sm:$0xff]  ;;  %v1244_v54 = vpack.c.bf16 %v1216_v50, %v1215_v49  ;;  %v1344_v55 = vld [vmem:[#allocation2 + $0x7a] sm:$0xff]  ;;  %369 = vst.msk [vmem:[#allocation2 + $0x189] sm:$0xff] %vm217_vm0, %v2316_v24 }
  0x38   : > { %1016 = vrot.lane.b32.xlu1 %v2591_v5, %s2430_s26  ;;  %362 = vst.msk [vmem:[#allocation2 + $0x139] sm:$0xff] %vm217_vm0, %v2303_v44  ;;  %363 = vst.msk [vmem:[#allocation2 + $0x141] sm:$0xff] %vm217_vm0, %v2304_v45  ;;  %v985_v48 = vpack.c.bf16 %v957_v47, %v956_v46  ;;  %v2329_v58 = vld [vmem:[%s2531_s21 + $0x68] sm:$0xff]   ;;  %v832_v62 = vld [vmem:[#allocation2 + $0x99] sm:$0xff] }
  0x39   : > { %v1099_v35 = vld [vmem:[#allocation2 + $0x110] sm:$0xff]  ;;  %v714_v39 = vld [vmem:[#allocation2 + $0x120] sm:$0xff] }
  0x3a   : > { %v2640_v36 = vpack.c.bf16 %v1099_v35, %v1098_v34  ;;  %v2330_v3 = vld [vmem:[%s2531_s21 + $0x70] sm:$0xff]   ;;  %v961_v10 = vld [vmem:[#allocation2 + $0x9a] sm:$0xff]  ;;  %v964_v28 = vld [vmem:[#allocation2 + $0xc2] sm:$0xff] }
  0x3b   : > { %1144 = vrot.lane.b32.xlu0 %v725_v51, %s2431_s27  ;;  %v2311_v6 = vunpack.c.l.bf16 %v2330_v3  ;;  %v2312_v7 = vunpack.c.h.bf16 %v2330_v3  ;;  %v960_v9 = vld [vmem:[#allocation2 + $0x92] sm:$0xff]  ;;  %v1219_v12 = vld [vmem:[#allocation2 + $0xa9] sm:$0xff]  ;;  %v835_v25 = vld [vmem:[#allocation2 + $0xc1] sm:$0xff] }
  0x3c   : > { %1146 = vrot.lane.b32.xlu1 %v2569_v56, %s2431_s27  ;;  %429 = vst.msk [vmem:[#allocation3 + $0x58] sm:$0xff] %vm217_vm0, %v2640_v36  ;;  %v715_v40 = vld [vmem:[#allocation2 + $0x128] sm:$0xff]  ;;  %v1220_v13 = vld [vmem:[#allocation2 + $0xb1] sm:$0xff]  ;;  %v1352_v38 = vld [vmem:[#allocation2 + $0xda] sm:$0xff] }
  0x3d   : > { %v2648_v41 = vpack.c.bf16 %v715_v40, %v714_v39  ;;  %366 = vst.msk [vmem:[#allocation2 + $0x169] sm:$0xff] %vm217_vm0, %v2311_v6  ;;  %367 = vst.msk [vmem:[#allocation2 + $0x171] sm:$0xff] %vm217_vm0, %v2312_v7  ;;  %v1246_v18 = vpack.c.bf16 %v1220_v13, %v1219_v12  ;;  %v1348_v20 = vld [vmem:[#allocation2 + $0xaa] sm:$0xff]  ;;  %v1224_v33 = vld [vmem:[#allocation2 + $0xe1] sm:$0xff] }
  0x3e   : > { %v836_v26 = vld [vmem:[#allocation2 + $0xc9] sm:$0xff]  ;;  %v840_v49 = vld [vmem:[#allocation2 + $0xf9] sm:$0xff] }
  0x3f   : > { %1273 = vrot.lane.b32.xlu0 %v2578_v60, %s2432_s6  ;;  %430 = vst.msk [vmem:[#allocation3 + $0x60] sm:$0xff] %vm217_vm0, %v2648_v41  ;;  %v1102_v51 = vld [vmem:[#allocation2 + $0x138] sm:$0xff]  ;;  %v1103_v52 = vld [vmem:[#allocation2 + $0x140] sm:$0xff]  ;;  %v860_v27 = vpack.c.bf16 %v836_v26, %v835_v25  ;;  %v1356_v6 = vld [vmem:[#allocation2 + $0x10a] sm:$0xff] }
  0x40   : > { %1275 = vrot.lane.b32.xlu1 %v1242_v21, %s2432_s6  ;;  %v2663_v53 = vpack.c.bf16 %v1103_v52, %v1102_v51  ;;  %v1353_v39 = vld [vmem:[#allocation2 + $0xe2] sm:$0xff]  ;;  %v973_v25 = vld [vmem:[#allocation2 + $0x12a] sm:$0xff] }
  0x41   : > { %v1377_v42 = vpack.c.bf16 %v1353_v39, %v1352_v38  ;;  %v972_v24 = vld [vmem:[#allocation2 + $0x122] sm:$0xff] }
  0x42   : > { %431 = vst.msk [vmem:[#allocation3 + $0x68] sm:$0xff] %vm217_vm0, %v2663_v53  ;;  %v1361_v38 = vld [vmem:[#allocation2 + $0x142] sm:$0xff] }
  0x43   : > { %1402 = vrot.lane.b32.xlu0 %v2591_v5, %s2433_s9 }
  0x44   : > { %502 = vrot.lane.b32.xlu1 %v2578_v60, %s2426_s22  ;;  %v2308_v60 = vunpack.c.h.bf16 %v2329_v58  ;;  %v1106_v14 = vld [vmem:[#allocation2 + $0x168] sm:$0xff]  ;;  %v1107_v15 = vld [vmem:[#allocation2 + $0x170] sm:$0xff] }
  0x45   : > { %v2697_v17 = vpack.c.bf16 %v1107_v15, %v1106_v14 }
  0x46   : > { %365 = vst.msk [vmem:[#allocation2 + $0x159] sm:$0xff] %vm217_vm0, %v2308_v60  ;;  %v1227_v60 = vld [vmem:[#allocation2 + $0x109] sm:$0xff] }
  0x47   : > { %1404 = vrot.lane.b32.xlu0 %v1371_v29, %s2433_s9  ;;  %433 = vst.msk [vmem:[#allocation3 + $0x78] sm:$0xff] %vm217_vm0, %v2697_v17 }
  0x48   : > { %504 = vrot.lane.b32.xlu1 %v1242_v21, %s2426_s22 }
  0x4b   : > { %631 = vrot.lane.b32.xlu0 %v2591_v5, %s2427_s23  ;;  %v858_v5 = vpack.c.bf16 %v832_v62, %v831_v61  ;;  %v1228_v61 = vld [vmem:[#allocation2 + $0x111] sm:$0xff] }
  0x4c   : > { %633 = vrot.lane.b32.xlu1 %v1371_v29, %s2427_s23 }
  0x4f   : > { %760 = vrot.lane.b32.xlu0 %v2569_v56, %s2428_s24  ;;  %v1345_v56 = vld [vmem:[#allocation2 + $0x82] sm:$0xff] }
  0x50   : > { %762 = vrot.lane.b32.xlu1 %v2573_v59, %s2428_s24  ;;  %v1373_v57 = vpack.c.bf16 %v1345_v56, %v1344_v55  ;;  %v969_v55 = vld [vmem:[#allocation2 + $0xfa] sm:$0xff] }
  0x53   : > { %889 = vrot.lane.b32.xlu0 %v1242_v21, %s2429_s25  ;;  %v1349_v21 = vld [vmem:[#allocation2 + $0xb2] sm:$0xff] }
  0x54   : > { %891 = vrot.lane.b32.xlu1 %v856_v43, %s2429_s25  ;;  %v1375_v22 = vpack.c.bf16 %v1349_v21, %v1348_v20  ;;  %v843_v20 = vld [vmem:[#allocation2 + $0x121] sm:$0xff]  ;;  %v844_v21 = vld [vmem:[#allocation2 + $0x129] sm:$0xff] }
  0x57   : > { %1018 = vrot.lane.b32.xlu0 %v1371_v29, %s2430_s26  ;;  %v965_v29 = vld [vmem:[#allocation2 + $0xca] sm:$0xff] }
  0x58   : > { %1020 = vrot.lane.b32.xlu1 %v985_v48, %s2430_s26  ;;  %v989_v30 = vpack.c.bf16 %v965_v29, %v964_v28 }
  0x5b   : > { %1148 = vrot.lane.b32.xlu0 %v2573_v59, %s2431_s27  ;;  %v2307_v59 = vunpack.c.l.bf16 %v2329_v58 }
  0x5c   : > { %1150 = vrot.lane.b32.xlu1 %v2580_v1, %s2431_s27 }
  0x5d   : > { %364 = vst.msk [vmem:[#allocation2 + $0x151] sm:$0xff] %vm217_vm0, %v2307_v59 }
  0x5f   : > { %1277 = vrot.lane.b32.xlu0 %v856_v43, %s2432_s6 }
  0x60   : > { %1279 = vrot.lane.b32.xlu1 %v1244_v54, %s2432_s6 }
  0x63   : > { %1406 = vrot.lane.b32.xlu0 %v985_v48, %s2433_s9 }
  0x64   : > { %506 = vrot.lane.b32.xlu1 %v856_v43, %s2426_s22  ;;  %v718_v63 = vld [vmem:[#allocation2 + $0x150] sm:$0xff]  ;;  %v719_v0 = vld [vmem:[#allocation2 + $0x158] sm:$0xff] }
  0x65   : > { %v2682_v2 = vpack.c.bf16 %v719_v0, %v718_v63  ;;  %v1250_v63 = vpack.c.bf16 %v1228_v61, %v1227_v60 }
  0x67   : > { %1408 = vrot.lane.b32.xlu0 %v1373_v57, %s2433_s9  ;;  %432 = vst.msk [vmem:[#allocation3 + $0x70] sm:$0xff] %vm217_vm0, %v2682_v2 }
  0x68   : > { %508 = vrot.lane.b32.xlu1 %v1244_v54, %s2426_s22 }
  0x6b   : > { %635 = vrot.lane.b32.xlu0 %v985_v48, %s2427_s23  ;;  %v839_v48 = vld [vmem:[#allocation2 + $0xf1] sm:$0xff] }
  0x6c   : > { %637 = vrot.lane.b32.xlu1 %v1373_v57, %s2427_s23  ;;  %v862_v51 = vpack.c.bf16 %v840_v49, %v839_v48  ;;  %v848_v48 = vld [vmem:[#allocation2 + $0x159] sm:$0xff] }
  0x6f   : > { %764 = vrot.lane.b32.xlu0 %v2580_v1, %s2428_s24  ;;  %v987_v1 = vpack.c.bf16 %v961_v10, %v960_v9 }
  0x70   : > { %766 = vrot.lane.b32.xlu1 %v2585_v4, %s2428_s24 }
  0x73   : > { %893 = vrot.lane.b32.xlu0 %v1244_v54, %s2429_s25  ;;  %v968_v54 = vld [vmem:[#allocation2 + $0xf2] sm:$0xff] }
  0x74   : > { %895 = vrot.lane.b32.xlu1 %v858_v5, %s2429_s25 }
  0x77   : > { %1022 = vrot.lane.b32.xlu0 %v1373_v57, %s2430_s26  ;;  %v991_v57 = vpack.c.bf16 %v969_v55, %v968_v54  ;;  %v977_v54 = vld [vmem:[#allocation2 + $0x15a] sm:$0xff] }
  0x78   : > { %1024 = vrot.lane.b32.xlu1 %v987_v1, %s2430_s26 }
  0x7b   : > { %1152 = vrot.lane.b32.xlu0 %v2585_v4, %s2431_s27  ;;  %v2315_v4 = vunpack.c.l.bf16 %v2331_v23  ;;  %v864_v23 = vpack.c.bf16 %v844_v21, %v843_v20  ;;  %v852_v21 = vld [vmem:[#allocation2 + $0x189] sm:$0xff] }
  0x7c   : > { %1154 = vrot.lane.b32.xlu1 %v2593_v8, %s2431_s27 }
  0x7d   : > { %368 = vst.msk [vmem:[#allocation2 + $0x181] sm:$0xff] %vm217_vm0, %v2315_v4 }
  0x7f   : > { %1281 = vrot.lane.b32.xlu0 %v858_v5, %s2432_s6 }
  0x80   : > { %1283 = vrot.lane.b32.xlu1 %v1246_v18, %s2432_s6 }
  0x83   : > { %1410 = vrot.lane.b32.xlu0 %v987_v1, %s2433_s9  ;;  %v499_v31 = vpop.permute.xlu0 %498 }
  0x84   : > { %510 = vrot.lane.b32.xlu1 %v858_v5, %s2426_s22  ;;  %547 = vst.msk [vmem:[#allocation3] sm:$0xff] %vm546_vm3, %v499_v31  ;;  %v628_v32 = vpop.permute.xlu1 %627  ;;  %v1232_v31 = vld [vmem:[#allocation2 + $0x141] sm:$0xff] }
  0x85   : > { %676 = vst.msk [vmem:[#allocation3] sm:$0xff] %vm675_vm4, %v628_v32  ;;  %v851_v20 = vld [vmem:[#allocation2 + $0x181] sm:$0xff] }
  0x87   : > { %1412 = vrot.lane.b32.xlu0 %v1375_v22, %s2433_s9 }
  0x88   : > { %512 = vrot.lane.b32.xlu1 %v1246_v18, %s2426_s22 }
  0x8b   : > { %639 = vrot.lane.b32.xlu0 %v987_v1, %s2427_s23 }
  0x8c   : > { %641 = vrot.lane.b32.xlu1 %v1375_v22, %s2427_s23 }
  0x8f   : > { %768 = vrot.lane.b32.xlu0 %v2593_v8, %s2428_s24  ;;  %v1223_v8 = vld [vmem:[#allocation2 + $0xd9] sm:$0xff] }
  0x90   : > { %770 = vrot.lane.b32.xlu1 %v2598_v11, %s2428_s24  ;;  %v1248_v34 = vpack.c.bf16 %v1224_v33, %v1223_v8 }
  0x93   : > { %897 = vrot.lane.b32.xlu0 %v1246_v18, %s2429_s25 }
  0x94   : > { %899 = vrot.lane.b32.xlu1 %v860_v27, %s2429_s25 }
  0x97   : > { %1026 = vrot.lane.b32.xlu0 %v1375_v22, %s2430_s26 }
  0x98   : > { %1028 = vrot.lane.b32.xlu1 %v989_v30, %s2430_s26 }
  0x9b   : > { %1156 = vrot.lane.b32.xlu0 %v2598_v11, %s2431_s27 }
  0x9c   : > { %1158 = vrot.lane.b32.xlu1 %v2604_v16, %s2431_s27 }
  0x9d   : > { %v501_v35 = vpop.permute.xlu0 %500 }
  0x9e   : > { %548 = vst.msk [vmem:[#allocation3 + $0x8] sm:$0xff] %vm546_vm3, %v501_v35  ;;  %v630_v37 = vpop.permute.xlu1 %629 }
  0x9f   : > { %677 = vst.msk [vmem:[#allocation3 + $0x8] sm:$0xff] %vm675_vm4, %v630_v37  ;;  %1285 = vrot.lane.b32.xlu0 %v860_v27, %s2432_s6  ;;  %v1360_v37 = vld [vmem:[#allocation2 + $0x13a] sm:$0xff] }
  0xa0   : > { %1287 = vrot.lane.b32.xlu1 %v1248_v34, %s2432_s6 }
  0xa1   : > { %v757_v40 = vpop.permute.xlu0 %756 }
  0xa2   : > { %805 = vst.msk [vmem:[#allocation3] sm:$0xff] %vm804_vm5, %v757_v40  ;;  %v759_v11 = vpop.permute.xlu1 %758 }
  0xa3   : > { %806 = vst.msk [vmem:[#allocation3 + $0x8] sm:$0xff] %vm804_vm5, %v759_v11  ;;  %1414 = vrot.lane.b32.xlu0 %v989_v30, %s2433_s9  ;;  %v1381_v11 = vpack.c.bf16 %v1361_v38, %v1360_v37  ;;  %v1368_v38 = vld [vmem:[#allocation2 + $0x19a] sm:$0xff] }
  0xa4   : > { %514 = vrot.lane.b32.xlu1 %v860_v27, %s2426_s22  ;;  %v993_v27 = vpack.c.bf16 %v973_v25, %v972_v24  ;;  %v980_v24 = vld [vmem:[#allocation2 + $0x182] sm:$0xff]  ;;  %v981_v25 = vld [vmem:[#allocation2 + $0x18a] sm:$0xff] }
  0xa5   : > { %v886_v43 = vpop.permute.xlu0 %885 }
  0xa6   : > { %934 = vst.msk [vmem:[#allocation3] sm:$0xff] %vm933_vm6, %v886_v43  ;;  %v888_v44 = vpop.permute.xlu1 %887 }
  0xa7   : > { %935 = vst.msk [vmem:[#allocation3 + $0x8] sm:$0xff] %vm933_vm6, %v888_v44  ;;  %1416 = vrot.lane.b32.xlu0 %v1377_v42, %s2433_s9 }
  0xa8   : > { %516 = vrot.lane.b32.xlu1 %v1248_v34, %s2426_s22 }
  0xa9   : > { %v1015_v45 = vpop.permute.xlu0 %1014 }
  0xaa   : > { %1063 = vst.msk [vmem:[#allocation3] sm:$0xff] %vm1062_vm7, %v1015_v45  ;;  %v1017_v46 = vpop.permute.xlu1 %1016 }
  0xab   : > { %1064 = vst.msk [vmem:[#allocation3 + $0x8] sm:$0xff] %vm1062_vm7, %v1017_v46  ;;  %643 = vrot.lane.b32.xlu0 %v989_v30, %s2427_s23  ;;  %v1231_v30 = vld [vmem:[#allocation2 + $0x139] sm:$0xff] }
  0xac   : > { %645 = vrot.lane.b32.xlu1 %v1377_v42, %s2427_s23  ;;  %v1252_v8 = vpack.c.bf16 %v1232_v31, %v1231_v30 }
  0xad   : > { %v1145_v47 = vpop.permute.xlu0 %1144 }
  0xae   : > { %1193 = vst.msk [vmem:[#allocation3] sm:$0xff] %vm1192_vm8, %v1145_v47  ;;  %v1147_v50 = vpop.permute.xlu1 %1146  ;;  %v847_v47 = vld [vmem:[#allocation2 + $0x151] sm:$0xff] }
  0xaf   : > { %1194 = vst.msk [vmem:[#allocation3 + $0x8] sm:$0xff] %vm1192_vm8, %v1147_v50  ;;  %772 = vrot.lane.b32.xlu0 %v2604_v16, %s2428_s24  ;;  %v866_v50 = vpack.c.bf16 %v848_v48, %v847_v47 }
  0xb0   : > { %774 = vrot.lane.b32.xlu1 %v2609_v19, %s2428_s24 }
  0xb1   : > { %v1274_v52 = vpop.permute.xlu0 %1273 }
  0xb2   : > { %1322 = vst.msk [vmem:[#allocation3] sm:$0xff] %vm1321_vm9, %v1274_v52  ;;  %v1276_v56 = vpop.permute.xlu1 %1275  ;;  %v976_v52 = vld [vmem:[#allocation2 + $0x152] sm:$0xff] }
  0xb3   : > { %1323 = vst.msk [vmem:[#allocation3 + $0x8] sm:$0xff] %vm1321_vm9, %v1276_v56  ;;  %901 = vrot.lane.b32.xlu0 %v1248_v34, %s2429_s25  ;;  %v995_v56 = vpack.c.bf16 %v977_v54, %v976_v52 }
  0xb4   : > { %903 = vrot.lane.b32.xlu1 %v862_v51, %s2429_s25 }
  0xb5   : > { %v1403_v16 = vpop.permute.xlu0 %1402 }
  0xb6   : > { %1451 = vst.msk [vmem:[#allocation3] sm:$0xff] %vm1450_vm10, %v1403_v16  ;;  %v503_v58 = vpop.permute.xlu1 %502 }
  0xb7   : > { %549 = vst.msk [vmem:[#allocation3 + $0x10] sm:$0xff] %vm546_vm3, %v503_v58  ;;  %1030 = vrot.lane.b32.xlu0 %v1377_v42, %s2430_s26  ;;  %v1235_v58 = vld [vmem:[#allocation2 + $0x169] sm:$0xff] }
  0xb8   : > { %1032 = vrot.lane.b32.xlu1 %v991_v57, %s2430_s26 }
  0xb9   : > { %v1405_v59 = vpop.permute.xlu0 %1404 }
  0xba   : > { %1452 = vst.msk [vmem:[#allocation3 + $0x8] sm:$0xff] %vm1450_vm10, %v1405_v59  ;;  %v505_v62 = vpop.permute.xlu1 %504  ;;  %v1236_v59 = vld [vmem:[#allocation2 + $0x171] sm:$0xff] }
  0xbb   : > { %550 = vst.msk [vmem:[#allocation3 + $0x18] sm:$0xff] %vm546_vm3, %v505_v62  ;;  %1160 = vrot.lane.b32.xlu0 %v2609_v19, %s2431_s27  ;;  %v1357_v19 = vld [vmem:[#allocation2 + $0x112] sm:$0xff]  ;;  %v1254_v61 = vpack.c.bf16 %v1236_v59, %v1235_v58 }
  0xbc   : > { %1162 = vrot.lane.b32.xlu1 %v2640_v36, %s2431_s27  ;;  %v1379_v1 = vpack.c.bf16 %v1357_v19, %v1356_v6 }
  0xbd   : > { %v632_v0 = vpop.permute.xlu0 %631  ;;  %v1467_v3 = vld [vmem:[#allocation3] sm:$0xff] }
  0xbe   : > { %678 = vst.msk [vmem:[#allocation3 + $0x10] sm:$0xff] %vm675_vm4, %v632_v0  ;;  %v634_v5 = vpop.permute.xlu1 %633  ;;  %2357 = vmatprep.mubr.msk.bf16.mxu0 %vm1503_vm11, %v1467_v3  ;;  %v1364_v3 = vld [vmem:[#allocation2 + $0x16a] sm:$0xff] }
  0xbf   : > { %679 = vst.msk [vmem:[#allocation3 + $0x18] sm:$0xff] %vm675_vm4, %v634_v5  ;;  %1289 = vrot.lane.b32.xlu0 %v862_v51, %s2432_s6  ;;  %v1365_v5 = vld [vmem:[#allocation2 + $0x172] sm:$0xff] }
  0xc0   : > { %1291 = vrot.lane.b32.xlu1 %v1250_v63, %s2432_s6 }
  0xc1   : > { %v761_v7 = vpop.permute.xlu0 %760  ;;  %v1468_v9 = vld [vmem:[#allocation3 + $0x8] sm:$0xff] }
  0xc2   : > { %807 = vst.msk [vmem:[#allocation3 + $0x10] sm:$0xff] %vm804_vm5, %v761_v7  ;;  %v763_v10 = vpop.permute.xlu1 %762  ;;  %2358 = vmatmul.mubr.msk.bf16.vlgmr.msra.gmra.mrb[0].mxu0 %vm1503_vm11, %v1468_v9  ;;  %v1383_v7 = vpack.c.bf16 %v1365_v5, %v1364_v3 }
  0xc3   : > { %808 = vst.msk [vmem:[#allocation3 + $0x18] sm:$0xff] %vm804_vm5, %v763_v10  ;;  %1418 = vrot.lane.b32.xlu0 %v991_v57, %s2433_s9 }
  0xc4   : > { %518 = vrot.lane.b32.xlu1 %v862_v51, %s2426_s22 }
  0xc5   : > { %v890_v12 = vpop.permute.xlu0 %889 }
  0xc6   : > { %936 = vst.msk [vmem:[#allocation3 + $0x10] sm:$0xff] %vm933_vm6, %v890_v12  ;;  %v892_v13 = vpop.permute.xlu1 %891  ;;  %v722_v12 = vld [vmem:[#allocation2 + $0x180] sm:$0xff] }
  0xc7   : > { %937 = vst.msk [vmem:[#allocation3 + $0x18] sm:$0xff] %vm933_vm6, %v892_v13  ;;  %1420 = vrot.lane.b32.xlu0 %v1379_v1, %s2433_s9  ;;  %v723_v13 = vld [vmem:[#allocation2 + $0x188] sm:$0xff] }
  0xc8   : > { %520 = vrot.lane.b32.xlu1 %v1250_v63, %s2426_s22 }
  0xc9   : > { %v1019_v14 = vpop.permute.xlu0 %1018 }
  0xca   : > { %1065 = vst.msk [vmem:[#allocation3 + $0x10] sm:$0xff] %vm1062_vm7, %v1019_v14  ;;  %v1021_v15 = vpop.permute.xlu1 %1020 }
  0xcb   : > { %1066 = vst.msk [vmem:[#allocation3 + $0x18] sm:$0xff] %vm1062_vm7, %v1021_v15  ;;  %647 = vrot.lane.b32.xlu0 %v991_v57, %s2427_s23  ;;  %v739_v15 = vpack.c.bf16 %v723_v13, %v722_v12 }
  0xcc   : > { %649 = vrot.lane.b32.xlu1 %v1379_v1, %s2427_s23 }
  0xcd   : > { %v1149_v18 = vpop.permute.xlu0 %1148 }
  0xce   : > { %1195 = vst.msk [vmem:[#allocation3 + $0x10] sm:$0xff] %vm1192_vm8, %v1149_v18  ;;  %v1151_v22 = vpop.permute.xlu1 %1150 }
  0xcf   : > { %1196 = vst.msk [vmem:[#allocation3 + $0x18] sm:$0xff] %vm1192_vm8, %v1151_v22  ;;  %776 = vrot.lane.b32.xlu0 %v2640_v36, %s2428_s24 }
  0xd0   : > { %778 = vrot.lane.b32.xlu1 %v2648_v41, %s2428_s24 }
  0xd1   : > { %v1278_v4 = vpop.permute.xlu0 %1277 }
  0xd2   : > { %1324 = vst.msk [vmem:[#allocation3 + $0x10] sm:$0xff] %vm1321_vm9, %v1278_v4  ;;  %v1280_v26 = vpop.permute.xlu1 %1279 }
  0xd3   : > { %1325 = vst.msk [vmem:[#allocation3 + $0x18] sm:$0xff] %vm1321_vm9, %v1280_v26  ;;  %905 = vrot.lane.b32.xlu0 %v1250_v63, %s2429_s25 }
  0xd4   : > { %907 = vrot.lane.b32.xlu1 %v864_v23, %s2429_s25 }
  0xd5   : > { %v1407_v28 = vpop.permute.xlu0 %1406 }
  0xd6   : > { %1453 = vst.msk [vmem:[#allocation3 + $0x10] sm:$0xff] %vm1450_vm10, %v1407_v28  ;;  %v507_v36 = vpop.permute.xlu1 %506 }
  0xd7   : > { %551 = vst.msk [vmem:[#allocation3 + $0x20] sm:$0xff] %vm546_vm3, %v507_v36  ;;  %1034 = vrot.lane.b32.xlu0 %v1379_v1, %s2430_s26  ;;  %v1110_v36 = vld [vmem:[#allocation2 + $0x198] sm:$0xff] }
  0xd8   : > { %1036 = vrot.lane.b32.xlu1 %v993_v27, %s2430_s26 }
  0xd9   : > { %v1409_v29 = vpop.permute.xlu0 %1408 }
  0xda   : > { %1454 = vst.msk [vmem:[#allocation3 + $0x18] sm:$0xff] %vm1450_vm10, %v1409_v29  ;;  %v509_v32 = vpop.permute.xlu1 %508  ;;  %v1111_v29 = vld [vmem:[#allocation2 + $0x1a0] sm:$0xff] }
  0xdb   : > { %552 = vst.msk [vmem:[#allocation3 + $0x28] sm:$0xff] %vm546_vm3, %v509_v32  ;;  %1164 = vrot.lane.b32.xlu0 %v2648_v41, %s2431_s27  ;;  %v1127_v30 = vpack.c.bf16 %v1111_v29, %v1110_v36  ;;  %v1239_v32 = vld [vmem:[#allocation2 + $0x199] sm:$0xff] }
  0xdc   : > { %1166 = vrot.lane.b32.xlu1 %v2663_v53, %s2431_s27 }
  0xdd   : > { %v636_v33 = vpop.permute.xlu0 %635  ;;  %v1469_v34 = vld [vmem:[#allocation3 + $0x10] sm:$0xff] }
  0xde   : > { %680 = vst.msk [vmem:[#allocation3 + $0x20] sm:$0xff] %vm675_vm4, %v636_v33  ;;  %v638_v35 = vpop.permute.xlu1 %637  ;;  %2361 = vmatprep.mubr.msk.bf16.mxu0 %vm1503_vm11, %v1469_v34 }
  0xdf   : > { %681 = vst.msk [vmem:[#allocation3 + $0x28] sm:$0xff] %vm675_vm4, %v638_v35  ;;  %1293 = vrot.lane.b32.xlu0 %v864_v23, %s2432_s6 }
  0xe0   : > { %1295 = vrot.lane.b32.xlu1 %v1252_v8, %s2432_s6 }
  0xe1   : > { %v765_v41 = vpop.permute.xlu0 %764  ;;  %v1470_v39 = vld [vmem:[#allocation3 + $0x18] sm:$0xff] }
  0xe2   : > { %809 = vst.msk [vmem:[#allocation3 + $0x20] sm:$0xff] %vm804_vm5, %v765_v41  ;;  %v767_v40 = vpop.permute.xlu1 %766  ;;  %2362 = vmatmul.mubr.msk.bf16.gmra.mrb[4].mxu0 %vm1503_vm11, %v1470_v39  ;;  %v1369_v41 = vld [vmem:[#allocation2 + $0x1a2] sm:$0xff] }
  0xe3   : > { %810 = vst.msk [vmem:[#allocation3 + $0x28] sm:$0xff] %vm804_vm5, %v767_v40  ;;  %1422 = vrot.lane.b32.xlu0 %v993_v27, %s2433_s9  ;;  %v1385_v40 = vpack.c.bf16 %v1369_v41, %v1368_v38 }
  0xe4   : > { %522 = vrot.lane.b32.xlu1 %v864_v23, %s2426_s22  ;;  %v868_v23 = vpack.c.bf16 %v852_v21, %v851_v20 }
  0xe5   : > { %v894_v42 = vpop.permute.xlu0 %893 }
  0xe6   : > { %938 = vst.msk [vmem:[#allocation3 + $0x20] sm:$0xff] %vm933_vm6, %v894_v42  ;;  %v896_v43 = vpop.permute.xlu1 %895 }
  0xe7   : > { %939 = vst.msk [vmem:[#allocation3 + $0x28] sm:$0xff] %vm933_vm6, %v896_v43  ;;  %1424 = vrot.lane.b32.xlu0 %v1381_v11, %s2433_s9 }
  0xe8   : > { %524 = vrot.lane.b32.xlu1 %v1252_v8, %s2426_s22 }
  0xe9   : > { %v1023_v44 = vpop.permute.xlu0 %1022 }
  0xea   : > { %1067 = vst.msk [vmem:[#allocation3 + $0x20] sm:$0xff] %vm1062_vm7, %v1023_v44  ;;  %v1025_v45 = vpop.permute.xlu1 %1024 }
  0xeb   : > { %1068 = vst.msk [vmem:[#allocation3 + $0x28] sm:$0xff] %vm1062_vm7, %v1025_v45  ;;  %651 = vrot.lane.b32.xlu0 %v993_v27, %s2427_s23  ;;  %v997_v27 = vpack.c.bf16 %v981_v25, %v980_v24 }
  0xec   : > { %653 = vrot.lane.b32.xlu1 %v1381_v11, %s2427_s23 }
  0xed   : > { %v1153_v46 = vpop.permute.xlu0 %1152 }
  0xee   : > { %1197 = vst.msk [vmem:[#allocation3 + $0x20] sm:$0xff] %vm1192_vm8, %v1153_v46  ;;  %v1155_v49 = vpop.permute.xlu1 %1154 }
  0xef   : > { %1198 = vst.msk [vmem:[#allocation3 + $0x28] sm:$0xff] %vm1192_vm8, %v1155_v49  ;;  %780 = vrot.lane.b32.xlu0 %v2663_v53, %s2428_s24 }
  0xf0   : > { %782 = vrot.lane.b32.xlu1 %v2682_v2, %s2428_s24 }
  0xf1   : > { %v1282_v51 = vpop.permute.xlu0 %1281 }
  0xf2   : > { %1326 = vst.msk [vmem:[#allocation3 + $0x20] sm:$0xff] %vm1321_vm9, %v1282_v51  ;;  %v1284_v55 = vpop.permute.xlu1 %1283 }
  0xf3   : > { %1327 = vst.msk [vmem:[#allocation3 + $0x28] sm:$0xff] %vm1321_vm9, %v1284_v55  ;;  %909 = vrot.lane.b32.xlu0 %v1252_v8, %s2429_s25  ;;  %v1240_v8 = vld [vmem:[#allocation2 + $0x1a1] sm:$0xff] }
  0xf4   : > { %911 = vrot.lane.b32.xlu1 %v866_v50, %s2429_s25  ;;  %v1256_v34 = vpack.c.bf16 %v1240_v8, %v1239_v32 }
  0xf5   : > { %v1411_v57 = vpop.permute.xlu0 %1410 }
  0xf6   : > { %1455 = vst.msk [vmem:[#allocation3 + $0x20] sm:$0xff] %vm1450_vm10, %v1411_v57  ;;  %v511_v53 = vpop.permute.xlu1 %510 }
  0xf7   : > { %553 = vst.msk [vmem:[#allocation3 + $0x30] sm:$0xff] %vm546_vm3, %v511_v53  ;;  %1038 = vrot.lane.b32.xlu0 %v1381_v11, %s2430_s26 }
  0xf8   : > { %1040 = vrot.lane.b32.xlu1 %v995_v56, %s2430_s26 }
  0xf9   : > { %v1413_v16 = vpop.permute.xlu0 %1412 }
  0xfa   : > { %1456 = vst.msk [vmem:[#allocation3 + $0x28] sm:$0xff] %vm1450_vm10, %v1413_v16  ;;  %v513_v60 = vpop.permute.xlu1 %512 }
  0xfb   : > { %554 = vst.msk [vmem:[#allocation3 + $0x38] sm:$0xff] %vm546_vm3, %v513_v60  ;;  %1168 = vrot.lane.b32.xlu0 %v2682_v2, %s2431_s27 }
  0xfc   : > { %1170 = vrot.lane.b32.xlu1 %v2697_v17, %s2431_s27 }
  0xfd   : > { %v640_v62 = vpop.permute.xlu0 %639  ;;  %v1471_v63 = vld [vmem:[#allocation3 + $0x20] sm:$0xff] }
  0xfe   : > { %682 = vst.msk [vmem:[#allocation3 + $0x30] sm:$0xff] %vm675_vm4, %v640_v62  ;;  %v642_v0 = vpop.permute.xlu1 %641  ;;  %2365 = vmatprep.mubr.msk.bf16.mxu0 %vm1503_vm11, %v1471_v63 }
  0xff   : > { %683 = vst.msk [vmem:[#allocation3 + $0x38] sm:$0xff] %vm675_vm4, %v642_v0  ;;  %1297 = vrot.lane.b32.xlu0 %v866_v50, %s2432_s6 }
 0x100   : > { %1299 = vrot.lane.b32.xlu1 %v1254_v61, %s2432_s6 }
 0x101   : > { %v769_v2 = vpop.permute.xlu0 %768  ;;  %v1472_v6 = vld [vmem:[#allocation3 + $0x28] sm:$0xff] }
 0x102   : > { %811 = vst.msk [vmem:[#allocation3 + $0x30] sm:$0xff] %vm804_vm5, %v769_v2  ;;  %v771_v19 = vpop.permute.xlu1 %770  ;;  %2366 = vmatmul.mubr.msk.bf16.gmra.mrb[8].mxu0 %vm1503_vm11, %v1472_v6 }
 0x103   : > { %812 = vst.msk [vmem:[#allocation3 + $0x38] sm:$0xff] %vm804_vm5, %v771_v19  ;;  %1426 = vrot.lane.b32.xlu0 %v995_v56, %s2433_s9 }
 0x104   : > { %526 = vrot.lane.b32.xlu1 %v866_v50, %s2426_s22 }
 0x105   : > { %v898_v9 = vpop.permute.xlu0 %897 }
 0x106   : > { %940 = vst.msk [vmem:[#allocation3 + $0x30] sm:$0xff] %vm933_vm6, %v898_v9  ;;  %v900_v10 = vpop.permute.xlu1 %899 }
 0x107   : > { %941 = vst.msk [vmem:[#allocation3 + $0x38] sm:$0xff] %vm933_vm6, %v900_v10  ;;  %1428 = vrot.lane.b32.xlu0 %v1383_v7, %s2433_s9 }
 0x108   : > { %528 = vrot.lane.b32.xlu1 %v1254_v61, %s2426_s22  ;;  %s215_s22 = scalar_lea.vmem %s3102_s4, %s2525_s17 }
 0x109   : > { %v1027_v1 = vpop.permute.xlu0 %1026 }
 0x10a   : > { %1069 = vst.msk [vmem:[#allocation3 + $0x30] sm:$0xff] %vm1062_vm7, %v1027_v1  ;;  %v1029_v14 = vpop.permute.xlu1 %1028 }
 0x10b   : > { %1070 = vst.msk [vmem:[#allocation3 + $0x38] sm:$0xff] %vm1062_vm7, %v1029_v14  ;;  %655 = vrot.lane.b32.xlu0 %v995_v56, %s2427_s23 }
 0x10c   : > { %657 = vrot.lane.b32.xlu1 %v1383_v7, %s2427_s23 }
 0x10d   : > { %v1157_v18 = vpop.permute.xlu0 %1156 }
 0x10e   : > { %1199 = vst.msk [vmem:[#allocation3 + $0x30] sm:$0xff] %vm1192_vm8, %v1157_v18  ;;  %v1159_v22 = vpop.permute.xlu1 %1158 }
 0x10f   : > { %1200 = vst.msk [vmem:[#allocation3 + $0x38] sm:$0xff] %vm1192_vm8, %v1159_v22  ;;  %784 = vrot.lane.b32.xlu0 %v2697_v17, %s2428_s24 }
 0x110   : > { %786 = vrot.lane.b32.xlu1 %v739_v15, %s2428_s24 }
 0x111   : > { %v1286_v4 = vpop.permute.xlu0 %1285 }
 0x112   : > { %1328 = vst.msk [vmem:[#allocation3 + $0x30] sm:$0xff] %vm1321_vm9, %v1286_v4  ;;  %v1288_v26 = vpop.permute.xlu1 %1287 }
 0x113   : > { %1329 = vst.msk [vmem:[#allocation3 + $0x38] sm:$0xff] %vm1321_vm9, %v1288_v26  ;;  %913 = vrot.lane.b32.xlu0 %v1254_v61, %s2429_s25 }
 0x114   : > { %915 = vrot.lane.b32.xlu1 %v868_v23, %s2429_s25 }
 0x115   : > { %v1415_v28 = vpop.permute.xlu0 %1414 }
 0x116   : > { %1457 = vst.msk [vmem:[#allocation3 + $0x30] sm:$0xff] %vm1450_vm10, %v1415_v28  ;;  %v515_v17 = vpop.permute.xlu1 %514 }
 0x117   : > { %555 = vst.msk [vmem:[#allocation3 + $0x40] sm:$0xff] %vm546_vm3, %v515_v17  ;;  %1042 = vrot.lane.b32.xlu0 %v1383_v7, %s2430_s26 }
 0x118   : > { %1044 = vrot.lane.b32.xlu1 %v997_v27, %s2430_s26 }
 0x119   : > { %v1417_v31 = vpop.permute.xlu0 %1416 }
 0x11a   : > { %1458 = vst.msk [vmem:[#allocation3 + $0x38] sm:$0xff] %vm1450_vm10, %v1417_v31  ;;  %v517_v33 = vpop.permute.xlu1 %516 }
 0x11b   : > { %556 = vst.msk [vmem:[#allocation3 + $0x48] sm:$0xff] %vm546_vm3, %v517_v33  ;;  %1172 = vrot.lane.b32.xlu0 %v739_v15, %s2431_s27 }
 0x11c   : > { %1174 = vrot.lane.b32.xlu1 %v1127_v30, %s2431_s27 }
 0x11d   : > { %v644_v35 = vpop.permute.xlu0 %643  ;;  %v1473_v37 = vld [vmem:[#allocation3 + $0x30] sm:$0xff] }
 0x11e   : > { %684 = vst.msk [vmem:[#allocation3 + $0x40] sm:$0xff] %vm675_vm4, %v644_v35  ;;  %v646_v39 = vpop.permute.xlu1 %645  ;;  %2369 = vmatprep.mubr.msk.bf16.mxu0 %vm1503_vm11, %v1473_v37 }
 0x11f   : > { %685 = vst.msk [vmem:[#allocation3 + $0x48] sm:$0xff] %vm675_vm4, %v646_v39  ;;  %1301 = vrot.lane.b32.xlu0 %v868_v23, %s2432_s6 }
 0x120   : > { %1303 = vrot.lane.b32.xlu1 %v1256_v34, %s2432_s6 }
 0x121   : > { %v773_v11 = vpop.permute.xlu0 %772  ;;  %v1474_v42 = vld [vmem:[#allocation3 + $0x38] sm:$0xff] }
 0x122   : > { %813 = vst.msk [vmem:[#allocation3 + $0x40] sm:$0xff] %vm804_vm5, %v773_v11  ;;  %v775_v43 = vpop.permute.xlu1 %774  ;;  %2370 = vmatmul.mubr.msk.bf16.gmra.mrb[12].mxu0 %vm1503_vm11, %v1474_v42 }
 0x123   : > { %814 = vst.msk [vmem:[#allocation3 + $0x48] sm:$0xff] %vm804_vm5, %v775_v43  ;;  %1430 = vrot.lane.b32.xlu0 %v997_v27, %s2433_s9 }
 0x124   : > { %1432 = vrot.lane.b32.xlu1 %v1385_v40, %s2433_s9 }
 0x125   : > { %v902_v44 = vpop.permute.xlu0 %901 }
 0x126   : > { %942 = vst.msk [vmem:[#allocation3 + $0x40] sm:$0xff] %vm933_vm6, %v902_v44  ;;  %v904_v45 = vpop.permute.xlu1 %903 }
 0x127   : > { %943 = vst.msk [vmem:[#allocation3 + $0x48] sm:$0xff] %vm933_vm6, %v904_v45 }
 0x129   : > { %v1031_v46 = vpop.permute.xlu0 %1030 }
 0x12a   : > { %1071 = vst.msk [vmem:[#allocation3 + $0x40] sm:$0xff] %vm1062_vm7, %v1031_v46  ;;  %v1033_v47 = vpop.permute.xlu1 %1032 }
 0x12b   : > { %1072 = vst.msk [vmem:[#allocation3 + $0x48] sm:$0xff] %vm1062_vm7, %v1033_v47 }
 0x12d   : > { %v1161_v48 = vpop.permute.xlu0 %1160 }
 0x12e   : > { %1201 = vst.msk [vmem:[#allocation3 + $0x40] sm:$0xff] %vm1192_vm8, %v1161_v48  ;;  %v1163_v49 = vpop.permute.xlu1 %1162 }
 0x12f   : > { %1202 = vst.msk [vmem:[#allocation3 + $0x48] sm:$0xff] %vm1192_vm8, %v1163_v49 }
 0x131   : > { %v1290_v50 = vpop.permute.xlu0 %1289 }
 0x132   : > { %1330 = vst.msk [vmem:[#allocation3 + $0x40] sm:$0xff] %vm1321_vm9, %v1290_v50  ;;  %v1292_v51 = vpop.permute.xlu1 %1291 }
 0x133   : > { %1331 = vst.msk [vmem:[#allocation3 + $0x48] sm:$0xff] %vm1321_vm9, %v1292_v51 }
 0x135   : > { %v1419_v52 = vpop.permute.xlu0 %1418 }
 0x136   : > { %1459 = vst.msk [vmem:[#allocation3 + $0x40] sm:$0xff] %vm1450_vm10, %v1419_v52  ;;  %v519_v54 = vpop.permute.xlu1 %518 }
 0x137   : > { %557 = vst.msk [vmem:[#allocation3 + $0x50] sm:$0xff] %vm546_vm3, %v519_v54 }
 0x139   : > { %v1421_v55 = vpop.permute.xlu0 %1420 }
 0x13a   : > { %1460 = vst.msk [vmem:[#allocation3 + $0x48] sm:$0xff] %vm1450_vm10, %v1421_v55  ;;  %v521_v56 = vpop.permute.xlu1 %520 }
 0x13b   : > { %558 = vst.msk [vmem:[#allocation3 + $0x58] sm:$0xff] %vm546_vm3, %v521_v56 }
 0x13d   : > { %v648_v57 = vpop.permute.xlu0 %647  ;;  %v1475_v53 = vld [vmem:[#allocation3 + $0x40] sm:$0xff] }
 0x13e   : > { %686 = vst.msk [vmem:[#allocation3 + $0x50] sm:$0xff] %vm675_vm4, %v648_v57  ;;  %v650_v16 = vpop.permute.xlu1 %649  ;;  %2373 = vmatprep.mubr.msk.bf16.mxu1 %vm1503_vm11, %v1475_v53 }
 0x13f   : > { %687 = vst.msk [vmem:[#allocation3 + $0x58] sm:$0xff] %vm675_vm4, %v650_v16 }
 0x141   : > { %v777_v58 = vpop.permute.xlu0 %776  ;;  %v1476_v59 = vld [vmem:[#allocation3 + $0x48] sm:$0xff] }
 0x142   : > { %815 = vst.msk [vmem:[#allocation3 + $0x50] sm:$0xff] %vm804_vm5, %v777_v58  ;;  %v779_v60 = vpop.permute.xlu1 %778  ;;  %2374 = vmatmul.mubr.msk.bf16.vlgmr.msra.gmra.mrb[0].mxu1 %vm1503_vm11, %v1476_v59 }
 0x143   : > { %816 = vst.msk [vmem:[#allocation3 + $0x58] sm:$0xff] %vm804_vm5, %v779_v60 }
 0x145   : > { %v906_v61 = vpop.permute.xlu0 %905 }
 0x146   : > { %944 = vst.msk [vmem:[#allocation3 + $0x50] sm:$0xff] %vm933_vm6, %v906_v61  ;;  %v908_v62 = vpop.permute.xlu1 %907 }
 0x147   : > { %945 = vst.msk [vmem:[#allocation3 + $0x58] sm:$0xff] %vm933_vm6, %v908_v62 }
 0x149   : > { %v1035_v63 = vpop.permute.xlu0 %1034 }
 0x14a   : > { %1073 = vst.msk [vmem:[#allocation3 + $0x50] sm:$0xff] %vm1062_vm7, %v1035_v63  ;;  %v1037_v0 = vpop.permute.xlu1 %1036 }
 0x14b   : > { %1074 = vst.msk [vmem:[#allocation3 + $0x58] sm:$0xff] %vm1062_vm7, %v1037_v0 }
 0x14d   : > { %v1165_v3 = vpop.permute.xlu0 %1164 }
 0x14e   : > { %1203 = vst.msk [vmem:[#allocation3 + $0x50] sm:$0xff] %vm1192_vm8, %v1165_v3  ;;  %v1167_v5 = vpop.permute.xlu1 %1166 }
 0x14f   : > { %1204 = vst.msk [vmem:[#allocation3 + $0x58] sm:$0xff] %vm1192_vm8, %v1167_v5 }
 0x151   : > { %v1294_v2 = vpop.permute.xlu0 %1293 }
 0x152   : > { %1332 = vst.msk [vmem:[#allocation3 + $0x50] sm:$0xff] %vm1321_vm9, %v1294_v2  ;;  %v1296_v6 = vpop.permute.xlu1 %1295 }
 0x153   : > { %1333 = vst.msk [vmem:[#allocation3 + $0x58] sm:$0xff] %vm1321_vm9, %v1296_v6 }
 0x155   : > { %v1423_v19 = vpop.permute.xlu0 %1422 }
 0x156   : > { %1461 = vst.msk [vmem:[#allocation3 + $0x50] sm:$0xff] %vm1450_vm10, %v1423_v19  ;;  %v523_v7 = vpop.permute.xlu1 %522 }
 0x157   : > { %559 = vst.msk [vmem:[#allocation3 + $0x60] sm:$0xff] %vm546_vm3, %v523_v7 }
 0x159   : > { %v1425_v9 = vpop.permute.xlu0 %1424 }
 0x15a   : > { %1462 = vst.msk [vmem:[#allocation3 + $0x58] sm:$0xff] %vm1450_vm10, %v1425_v9  ;;  %v525_v10 = vpop.permute.xlu1 %524 }
 0x15b   : > { %560 = vst.msk [vmem:[#allocation3 + $0x68] sm:$0xff] %vm546_vm3, %v525_v10 }
 0x15d   : > { %v652_v1 = vpop.permute.xlu0 %651  ;;  %v1477_v12 = vld [vmem:[#allocation3 + $0x50] sm:$0xff] }
 0x15e   : > { %688 = vst.msk [vmem:[#allocation3 + $0x60] sm:$0xff] %vm675_vm4, %v652_v1  ;;  %v654_v13 = vpop.permute.xlu1 %653  ;;  %2377 = vmatprep.mubr.msk.bf16.mxu1 %vm1503_vm11, %v1477_v12 }
 0x15f   : > { %689 = vst.msk [vmem:[#allocation3 + $0x68] sm:$0xff] %vm675_vm4, %v654_v13 }
 0x161   : > { %v781_v14 = vpop.permute.xlu0 %780  ;;  %v1478_v15 = vld [vmem:[#allocation3 + $0x58] sm:$0xff] }
 0x162   : > { %817 = vst.msk [vmem:[#allocation3 + $0x60] sm:$0xff] %vm804_vm5, %v781_v14  ;;  %v783_v18 = vpop.permute.xlu1 %782  ;;  %2378 = vmatmul.mubr.msk.bf16.gmra.mrb[4].mxu1 %vm1503_vm11, %v1478_v15 }
 0x163   : > { %818 = vst.msk [vmem:[#allocation3 + $0x68] sm:$0xff] %vm804_vm5, %v783_v18 }
 0x165   : > { %v910_v20 = vpop.permute.xlu0 %909 }
 0x166   : > { %946 = vst.msk [vmem:[#allocation3 + $0x60] sm:$0xff] %vm933_vm6, %v910_v20  ;;  %v912_v21 = vpop.permute.xlu1 %911 }
 0x167   : > { %947 = vst.msk [vmem:[#allocation3 + $0x68] sm:$0xff] %vm933_vm6, %v912_v21 }
 0x169   : > { %v1039_v22 = vpop.permute.xlu0 %1038 }
 0x16a   : > { %1075 = vst.msk [vmem:[#allocation3 + $0x60] sm:$0xff] %vm1062_vm7, %v1039_v22  ;;  %v1041_v23 = vpop.permute.xlu1 %1040 }
 0x16b   : > { %1076 = vst.msk [vmem:[#allocation3 + $0x68] sm:$0xff] %vm1062_vm7, %v1041_v23 }
 0x16d   : > { %v1169_v4 = vpop.permute.xlu0 %1168 }
 0x16e   : > { %1205 = vst.msk [vmem:[#allocation3 + $0x60] sm:$0xff] %vm1192_vm8, %v1169_v4  ;;  %v1171_v24 = vpop.permute.xlu1 %1170 }
 0x16f   : > { %1206 = vst.msk [vmem:[#allocation3 + $0x68] sm:$0xff] %vm1192_vm8, %v1171_v24 }
 0x171   : > { %v1298_v25 = vpop.permute.xlu0 %1297 }
 0x172   : > { %1334 = vst.msk [vmem:[#allocation3 + $0x60] sm:$0xff] %vm1321_vm9, %v1298_v25  ;;  %v1300_v26 = vpop.permute.xlu1 %1299 }
 0x173   : > { %1335 = vst.msk [vmem:[#allocation3 + $0x68] sm:$0xff] %vm1321_vm9, %v1300_v26 }
 0x175   : > { %v1427_v27 = vpop.permute.xlu0 %1426 }
 0x176   : > { %1463 = vst.msk [vmem:[#allocation3 + $0x60] sm:$0xff] %vm1450_vm10, %v1427_v27  ;;  %v527_v28 = vpop.permute.xlu1 %526 }
 0x177   : > { %561 = vst.msk [vmem:[#allocation3 + $0x70] sm:$0xff] %vm546_vm3, %v527_v28 }
 0x179   : > { %v1429_v36 = vpop.permute.xlu0 %1428 }
 0x17a   : > { %1464 = vst.msk [vmem:[#allocation3 + $0x68] sm:$0xff] %vm1450_vm10, %v1429_v36  ;;  %v529_v29 = vpop.permute.xlu1 %528 }
 0x17b   : > { %562 = vst.msk [vmem:[#allocation3 + $0x78] sm:$0xff] %vm546_vm3, %v529_v29 }
 0x17d   : > { %v656_v17 = vpop.permute.xlu0 %655  ;;  %v1479_v30 = vld [vmem:[#allocation3 + $0x60] sm:$0xff] }
 0x17e   : > { %690 = vst.msk [vmem:[#allocation3 + $0x70] sm:$0xff] %vm675_vm4, %v656_v17  ;;  %v658_v31 = vpop.permute.xlu1 %657  ;;  %2381 = vmatprep.mubr.msk.bf16.mxu1 %vm1503_vm11, %v1479_v30 }
 0x17f   : > { %691 = vst.msk [vmem:[#allocation3 + $0x78] sm:$0xff] %vm675_vm4, %v658_v31 }
 0x181   : > { %v785_v32 = vpop.permute.xlu0 %784  ;;  %v1480_v8 = vld [vmem:[#allocation3 + $0x68] sm:$0xff] }
 0x182   : > { %819 = vst.msk [vmem:[#allocation3 + $0x70] sm:$0xff] %vm804_vm5, %v785_v32  ;;  %v787_v33 = vpop.permute.xlu1 %786  ;;  %2382 = vmatmul.mubr.msk.bf16.gmra.mrb[8].mxu1 %vm1503_vm11, %v1480_v8 }
 0x183   : > { %820 = vst.msk [vmem:[#allocation3 + $0x78] sm:$0xff] %vm804_vm5, %v787_v33 }
 0x185   : > { %v914_v34 = vpop.permute.xlu0 %913 }
 0x186   : > { %948 = vst.msk [vmem:[#allocation3 + $0x70] sm:$0xff] %vm933_vm6, %v914_v34  ;;  %v916_v35 = vpop.permute.xlu1 %915 }
 0x187   : > { %949 = vst.msk [vmem:[#allocation3 + $0x78] sm:$0xff] %vm933_vm6, %v916_v35 }
 0x189   : > { %v1043_v37 = vpop.permute.xlu0 %1042 }
 0x18a   : > { %1077 = vst.msk [vmem:[#allocation3 + $0x70] sm:$0xff] %vm1062_vm7, %v1043_v37  ;;  %v1045_v38 = vpop.permute.xlu1 %1044 }
 0x18b   : > { %1078 = vst.msk [vmem:[#allocation3 + $0x78] sm:$0xff] %vm1062_vm7, %v1045_v38 }
 0x18d   : > { %v1173_v41 = vpop.permute.xlu0 %1172 }
 0x18e   : > { %1207 = vst.msk [vmem:[#allocation3 + $0x70] sm:$0xff] %vm1192_vm8, %v1173_v41  ;;  %v1175_v39 = vpop.permute.xlu1 %1174 }
 0x18f   : > { %1208 = vst.msk [vmem:[#allocation3 + $0x78] sm:$0xff] %vm1192_vm8, %v1175_v39 }
 0x191   : > { %v1302_v40 = vpop.permute.xlu0 %1301 }
 0x192   : > { %1336 = vst.msk [vmem:[#allocation3 + $0x70] sm:$0xff] %vm1321_vm9, %v1302_v40  ;;  %v1304_v11 = vpop.permute.xlu1 %1303 }
 0x193   : > { %1337 = vst.msk [vmem:[#allocation3 + $0x78] sm:$0xff] %vm1321_vm9, %v1304_v11 }
 0x195   : > { %v1431_v42 = vpop.permute.xlu0 %1430  ;;  %v2359_v43 = vpop.f32.mrb[0].mxu0 }
 0x196   : > { %1465 = vst.msk [vmem:[#allocation3 + $0x70] sm:$0xff] %vm1450_vm10, %v1431_v42  ;;  %v2223_v44 = vpack.c.bf16 %v2359_v43, %v2359_v43  ;;  %v1433_v45 = vpop.permute.xlu1 %1432  ;;  %v1590_v46 = vpop.f32.mrb[1].mxu0  ;;  %v1952_v50 = vmul.f32 %v2359_v43, %v2359_v43  ;;  %v1882_v16 = vsel %vm1878_vm13, %v2359_v43, 0.0 }
 0x197   : > { %1466 = vst.msk [vmem:[#allocation3 + $0x78] sm:$0xff] %vm1450_vm10, %v1433_v45  ;;  %v2221_v47 = vpack.c.bf16 %v1590_v46, %v1590_v46  ;;  %v1950_v48 = vmul.f32 %v1590_v46, %v1590_v46  ;;  %v2360_v49 = vpop.f32.mrb[2].mxu0  ;;  %v1879_v54 = vsel %vm1878_vm13, %v1590_v46, 0.0 }
 0x198   : > { %1848 = vst.msk [vmem:[%s2953_s14 + $0x8] sm:$0xf] %vm1845_vm12, %v2223_v44  ;;  %v2224_v51 = vpack.c.bf16 %v2360_v49, %v2360_v49  ;;  %v1593_v52 = vpop.f32.mrb[3].mxu0  ;;  %v1953_v59 = vmul.f32 %v2360_v49, %v2360_v49  ;;  %v1985_v63 = vsel %vm1878_vm13, %v1952_v50, 0.0  ;;  %v1884_v0 = vsel %vm1878_vm13, %v2360_v49, 0.0 }
 0x199   : > { %1846 = vst.msk [vmem:[%s2953_s14] sm:$0xf] %vm1845_vm12, %v2221_v47  ;;  %v2222_v55 = vpack.c.bf16 %v1593_v52, %v1593_v52  ;;  %v1880_v56 = vsel %vm1878_vm13, %v1593_v52, 0.0  ;;  %v1951_v57 = vmul.f32 %v1593_v52, %v1593_v52  ;;  %v1982_v58 = vsel %vm1878_vm13, %v1950_v48, 0.0 }
 0x19a   : > { %1849 = vst.msk [vmem:[%s2953_s14 + $0xc] sm:$0xf] %vm1845_vm12, %v2224_v51  ;;  %v1881_v53 = vadd.f32 %v1880_v56, %v1879_v54  ;;  %v1987_v19 = vsel %vm1878_vm13, %v1953_v59, 0.0 }
 0x19b   : > { %1847 = vst.msk [vmem:[%s2953_s14 + $0x4] sm:$0xf] %vm1845_vm12, %v2222_v55  ;;  %v1983_v60 = vsel %vm1878_vm13, %v1951_v57, 0.0 }
 0x19c   : > { %v1883_v61 = vadd.f32 %v1882_v16, %v1881_v53  ;;  %v1984_v62 = vadd.f32 %v1983_v60, %v1982_v58 }
 0x19d   : > { %v1481_v3 = vld [vmem:[#allocation3 + $0x70] sm:$0xff] }
 0x19e   : > { %v1986_v5 = vadd.f32 %v1985_v63, %v1984_v62  ;;  %2385 = vmatprep.mubr.msk.bf16.mxu1 %vm1503_vm11, %v1481_v3  ;;  %v1482_v2 = vld [vmem:[#allocation3 + $0x78] sm:$0xff]  ;;  %v1885_v6 = vadd.f32 %v1884_v0, %v1883_v61 }
 0x19f   : > { %2386 = vmatmul.mubr.msk.bf16.gmra.mrb[12].mxu1 %vm1503_vm11, %v1482_v2 }
 0x1a0   : > { %v1988_v7 = vadd.f32 %v1987_v19, %v1986_v5 }
 0x1b5   : > { %v2363_v9 = vpop.f32.mrb[4].mxu0 }
 0x1b6   : > { %v2227_v10 = vpack.c.bf16 %v2363_v9, %v2363_v9  ;;  %v1606_v1 = vpop.f32.mrb[5].mxu0  ;;  %v1956_v24 = vmul.f32 %v2363_v9, %v2363_v9  ;;  %v1890_v28 = vsel %vm1878_vm13, %v2363_v9, 0.0 }
 0x1b7   : > { %v2225_v12 = vpack.c.bf16 %v1606_v1, %v1606_v1  ;;  %v1886_v13 = vsel %vm1878_vm13, %v1606_v1, 0.0  ;;  %v1954_v14 = vmul.f32 %v1606_v1, %v1606_v1  ;;  %v2364_v15 = vpop.f32.mrb[6].mxu0 }
 0x1b8   : > { %1852 = vst.msk [vmem:[%s2953_s14 + $0x18] sm:$0xf] %vm1845_vm12, %v2227_v10  ;;  %v1887_v18 = vadd.f32 %v1886_v13, %v1885_v6  ;;  %v2228_v20 = vpack.c.bf16 %v2364_v15, %v2364_v15  ;;  %v1609_v21 = vpop.f32.mrb[7].mxu0  ;;  %v1957_v36 = vmul.f32 %v2364_v15, %v2364_v15  ;;  %v1892_v30 = vsel %vm1878_vm13, %v2364_v15, 0.0 }
 0x1b9   : > { %1850 = vst.msk [vmem:[%s2953_s14 + $0x10] sm:$0xf] %vm1845_vm12, %v2225_v12  ;;  %v1989_v22 = vsel %vm1878_vm13, %v1954_v14, 0.0  ;;  %v2226_v23 = vpack.c.bf16 %v1609_v21, %v1609_v21  ;;  %v1888_v4 = vsel %vm1878_vm13, %v1609_v21, 0.0  ;;  %v1955_v27 = vmul.f32 %v1609_v21, %v1609_v21 }
 0x1ba   : > { %v1990_v25 = vadd.f32 %v1989_v22, %v1988_v7  ;;  %1853 = vst.msk [vmem:[%s2953_s14 + $0x1c] sm:$0xf] %vm1845_vm12, %v2228_v20  ;;  %v1889_v26 = vadd.f32 %v1888_v4, %v1887_v18  ;;  %v1993_v32 = vsel %vm1878_vm13, %v1956_v24, 0.0  ;;  %v1995_v34 = vsel %vm1878_vm13, %v1957_v36, 0.0 }
 0x1bb   : > { %1851 = vst.msk [vmem:[%s2953_s14 + $0x14] sm:$0xf] %vm1845_vm12, %v2226_v23  ;;  %v1991_v17 = vsel %vm1878_vm13, %v1955_v27, 0.0 }
 0x1bc   : > { %v1891_v29 = vadd.f32 %v1890_v28, %v1889_v26  ;;  %v1992_v31 = vadd.f32 %v1991_v17, %v1990_v25 }
 0x1be   : > { %v1893_v8 = vadd.f32 %v1892_v30, %v1891_v29  ;;  %v1994_v33 = vadd.f32 %v1993_v32, %v1992_v31 }
 0x1c0   : > { %v1996_v35 = vadd.f32 %v1995_v34, %v1994_v33 }
 0x1d5   : > { %v2367_v37 = vpop.f32.mrb[8].mxu0 }
 0x1d6   : > { %v2231_v38 = vpack.c.bf16 %v2367_v37, %v2367_v37  ;;  %v1622_v41 = vpop.f32.mrb[9].mxu0  ;;  %v1960_v49 = vmul.f32 %v2367_v37, %v2367_v37  ;;  %v1898_v54 = vsel %vm1878_vm13, %v2367_v37, 0.0 }
 0x1d7   : > { %v2229_v39 = vpack.c.bf16 %v1622_v41, %v1622_v41  ;;  %v1894_v40 = vsel %vm1878_vm13, %v1622_v41, 0.0  ;;  %v1958_v11 = vmul.f32 %v1622_v41, %v1622_v41  ;;  %v2368_v42 = vpop.f32.mrb[10].mxu0 }
 0x1d8   : > { %1856 = vst.msk [vmem:[%s2953_s14 + $0x28] sm:$0xf] %vm1845_vm12, %v2231_v38  ;;  %v1895_v43 = vadd.f32 %v1894_v40, %v1893_v8  ;;  %v2232_v44 = vpack.c.bf16 %v2368_v42, %v2368_v42  ;;  %v1625_v45 = vpop.f32.mrb[11].mxu0  ;;  %v1961_v55 = vmul.f32 %v2368_v42, %v2368_v42  ;;  %v1900_v53 = vsel %vm1878_vm13, %v2368_v42, 0.0 }
 0x1d9   : > { %1854 = vst.msk [vmem:[%s2953_s14 + $0x20] sm:$0xf] %vm1845_vm12, %v2229_v39  ;;  %v1997_v46 = vsel %vm1878_vm13, %v1958_v11, 0.0  ;;  %v2230_v47 = vpack.c.bf16 %v1625_v45, %v1625_v45  ;;  %v1896_v48 = vsel %vm1878_vm13, %v1625_v45, 0.0  ;;  %v1959_v52 = vmul.f32 %v1625_v45, %v1625_v45 }
 0x1da   : > { %v1998_v50 = vadd.f32 %v1997_v46, %v1996_v35  ;;  %1857 = vst.msk [vmem:[%s2953_s14 + $0x2c] sm:$0xf] %vm1845_vm12, %v2232_v44  ;;  %v1897_v51 = vadd.f32 %v1896_v48, %v1895_v43  ;;  %v2001_v58 = vsel %vm1878_vm13, %v1960_v49, 0.0  ;;  %v2003_v61 = vsel %vm1878_vm13, %v1961_v55, 0.0 }
 0x1db   : > { %1855 = vst.msk [vmem:[%s2953_s14 + $0x24] sm:$0xf] %vm1845_vm12, %v2230_v47  ;;  %v1999_v57 = vsel %vm1878_vm13, %v1959_v52, 0.0 }
 0x1dc   : > { %v1899_v56 = vadd.f32 %v1898_v54, %v1897_v51  ;;  %v2000_v16 = vadd.f32 %v1999_v57, %v1998_v50 }
 0x1de   : > { %v1901_v59 = vadd.f32 %v1900_v53, %v1899_v56  ;;  %v2002_v60 = vadd.f32 %v2001_v58, %v2000_v16 }
 0x1e0   : > { %v2004_v62 = vadd.f32 %v2003_v61, %v2002_v60 }
 0x1f5   : > { %v2371_v63 = vpop.f32.mrb[12].mxu0 }
 0x1f6   : > { %v2235_v0 = vpack.c.bf16 %v2371_v63, %v2371_v63  ;;  %v1638_v3 = vpop.f32.mrb[13].mxu0  ;;  %v1964_v14 = vmul.f32 %v2371_v63, %v2371_v63  ;;  %v1906_v21 = vsel %vm1878_vm13, %v2371_v63, 0.0 }
 0x1f7   : > { %v2233_v5 = vpack.c.bf16 %v1638_v3, %v1638_v3  ;;  %v1902_v2 = vsel %vm1878_vm13, %v1638_v3, 0.0  ;;  %v1962_v6 = vmul.f32 %v1638_v3, %v1638_v3  ;;  %v2372_v19 = vpop.f32.mrb[14].mxu0 }
 0x1f8   : > { %1860 = vst.msk [vmem:[%s2953_s14 + $0x38] sm:$0xf] %vm1845_vm12, %v2235_v0  ;;  %v1903_v7 = vadd.f32 %v1902_v2, %v1901_v59  ;;  %v2236_v9 = vpack.c.bf16 %v2372_v19, %v2372_v19  ;;  %v1641_v10 = vpop.f32.mrb[15].mxu0  ;;  %v1965_v22 = vmul.f32 %v2372_v19, %v2372_v19  ;;  %v1908_v24 = vsel %vm1878_vm13, %v2372_v19, 0.0 }
 0x1f9   : > { %1858 = vst.msk [vmem:[%s2953_s14 + $0x30] sm:$0xf] %vm1845_vm12, %v2233_v5  ;;  %v2005_v1 = vsel %vm1878_vm13, %v1962_v6, 0.0  ;;  %v2234_v12 = vpack.c.bf16 %v1641_v10, %v1641_v10  ;;  %v1904_v13 = vsel %vm1878_vm13, %v1641_v10, 0.0  ;;  %v1963_v20 = vmul.f32 %v1641_v10, %v1641_v10 }
 0x1fa   : > { %v2006_v15 = vadd.f32 %v2005_v1, %v2004_v62  ;;  %1861 = vst.msk [vmem:[%s2953_s14 + $0x3c] sm:$0xf] %vm1845_vm12, %v2236_v9  ;;  %v1905_v18 = vadd.f32 %v1904_v13, %v1903_v7  ;;  %v2009_v26 = vsel %vm1878_vm13, %v1964_v14, 0.0  ;;  %v2011_v36 = vsel %vm1878_vm13, %v1965_v22, 0.0 }
 0x1fb   : > { %1859 = vst.msk [vmem:[%s2953_s14 + $0x34] sm:$0xf] %vm1845_vm12, %v2234_v12  ;;  %v2007_v4 = vsel %vm1878_vm13, %v1963_v20, 0.0 }
 0x1fc   : > { %v1907_v23 = vadd.f32 %v1906_v21, %v1905_v18  ;;  %v2008_v25 = vadd.f32 %v2007_v4, %v2006_v15 }
 0x1fe   : > { %v1909_v27 = vadd.f32 %v1908_v24, %v1907_v23  ;;  %v2010_v28 = vadd.f32 %v2009_v26, %v2008_v25 }
 0x200   : > { %v2012_v29 = vadd.f32 %v2011_v36, %v2010_v28 }
 0x215   : > { %v2375_v17 = vpop.f32.mrb[0].mxu1 }
 0x216   : > { %v2239_v30 = vpack.c.bf16 %v2375_v17, %v2375_v17  ;;  %v1654_v31 = vpop.f32.mrb[1].mxu1  ;;  %v1968_v11 = vmul.f32 %v2375_v17, %v2375_v17  ;;  %v1914_v45 = vsel %vm1878_vm13, %v2375_v17, 0.0 }
 0x217   : > { %v2237_v32 = vpack.c.bf16 %v1654_v31, %v1654_v31  ;;  %v1910_v8 = vsel %vm1878_vm13, %v1654_v31, 0.0  ;;  %v1966_v33 = vmul.f32 %v1654_v31, %v1654_v31  ;;  %v2376_v34 = vpop.f32.mrb[2].mxu1 }
 0x218   : > { %1864 = vst.msk [vmem:[%s2953_s14 + $0x48] sm:$0xf] %vm1845_vm12, %v2239_v30  ;;  %v1911_v35 = vadd.f32 %v1910_v8, %v1909_v27  ;;  %v2240_v37 = vpack.c.bf16 %v2376_v34, %v2376_v34  ;;  %v1657_v38 = vpop.f32.mrb[3].mxu1  ;;  %v1969_v46 = vmul.f32 %v2376_v34, %v2376_v34  ;;  %v1916_v49 = vsel %vm1878_vm13, %v2376_v34, 0.0 }
 0x219   : > { %1862 = vst.msk [vmem:[%s2953_s14 + $0x40] sm:$0xf] %vm1845_vm12, %v2237_v32  ;;  %v2013_v41 = vsel %vm1878_vm13, %v1966_v33, 0.0  ;;  %v2238_v39 = vpack.c.bf16 %v1657_v38, %v1657_v38  ;;  %v1912_v40 = vsel %vm1878_vm13, %v1657_v38, 0.0  ;;  %v1967_v44 = vmul.f32 %v1657_v38, %v1657_v38 }
 0x21a   : > { %v2014_v42 = vadd.f32 %v2013_v41, %v2012_v29  ;;  %1865 = vst.msk [vmem:[%s2953_s14 + $0x4c] sm:$0xf] %vm1845_vm12, %v2240_v37  ;;  %v1913_v43 = vadd.f32 %v1912_v40, %v1911_v35  ;;  %v2017_v51 = vsel %vm1878_vm13, %v1968_v11, 0.0  ;;  %v2019_v55 = vsel %vm1878_vm13, %v1969_v46, 0.0 }
 0x21b   : > { %1863 = vst.msk [vmem:[%s2953_s14 + $0x44] sm:$0xf] %vm1845_vm12, %v2238_v39  ;;  %v2015_v48 = vsel %vm1878_vm13, %v1967_v44, 0.0 }
 0x21c   : > { %v1915_v47 = vadd.f32 %v1914_v45, %v1913_v43  ;;  %v2016_v50 = vadd.f32 %v2015_v48, %v2014_v42 }
 0x21e   : > { %v1917_v52 = vadd.f32 %v1916_v49, %v1915_v47  ;;  %v2018_v54 = vadd.f32 %v2017_v51, %v2016_v50 }
 0x220   : > { %v2020_v56 = vadd.f32 %v2019_v55, %v2018_v54 }
 0x235   : > { %v2379_v57 = vpop.f32.mrb[4].mxu1 }
 0x236   : > { %v2243_v53 = vpack.c.bf16 %v2379_v57, %v2379_v57  ;;  %v1670_v16 = vpop.f32.mrb[5].mxu1  ;;  %v1972_v6 = vmul.f32 %v2379_v57, %v2379_v57  ;;  %v1922_v10 = vsel %vm1878_vm13, %v2379_v57, 0.0 }
 0x237   : > { %v2241_v58 = vpack.c.bf16 %v1670_v16, %v1670_v16  ;;  %v1918_v59 = vsel %vm1878_vm13, %v1670_v16, 0.0  ;;  %v1970_v60 = vmul.f32 %v1670_v16, %v1670_v16  ;;  %v2380_v61 = vpop.f32.mrb[6].mxu1 }
 0x238   : > { %1868 = vst.msk [vmem:[%s2953_s14 + $0x58] sm:$0xf] %vm1845_vm12, %v2243_v53  ;;  %v1919_v62 = vadd.f32 %v1918_v59, %v1917_v52  ;;  %v2244_v63 = vpack.c.bf16 %v2380_v61, %v2380_v61  ;;  %v1673_v0 = vpop.f32.mrb[7].mxu1  ;;  %v1973_v1 = vmul.f32 %v2380_v61, %v2380_v61  ;;  %v1924_v14 = vsel %vm1878_vm13, %v2380_v61, 0.0 }
 0x239   : > { %1866 = vst.msk [vmem:[%s2953_s14 + $0x50] sm:$0xf] %vm1845_vm12, %v2241_v58  ;;  %v2021_v3 = vsel %vm1878_vm13, %v1970_v60, 0.0  ;;  %v2242_v5 = vpack.c.bf16 %v1673_v0, %v1673_v0  ;;  %v1920_v2 = vsel %vm1878_vm13, %v1673_v0, 0.0  ;;  %v1971_v9 = vmul.f32 %v1673_v0, %v1673_v0 }
 0x23a   : > { %v2022_v19 = vadd.f32 %v2021_v3, %v2020_v56  ;;  %1869 = vst.msk [vmem:[%s2953_s14 + $0x5c] sm:$0xf] %vm1845_vm12, %v2244_v63  ;;  %v1921_v7 = vadd.f32 %v1920_v2, %v1919_v62  ;;  %v2025_v18 = vsel %vm1878_vm13, %v1972_v6, 0.0  ;;  %v2027_v22 = vsel %vm1878_vm13, %v1973_v1, 0.0 }
 0x23b   : > { %1867 = vst.msk [vmem:[%s2953_s14 + $0x54] sm:$0xf] %vm1845_vm12, %v2242_v5  ;;  %v2023_v13 = vsel %vm1878_vm13, %v1971_v9, 0.0 }
 0x23c   : > { %v1923_v12 = vadd.f32 %v1922_v10, %v1921_v7  ;;  %v2024_v15 = vadd.f32 %v2023_v13, %v2022_v19 }
 0x23e   : > { %v1925_v20 = vadd.f32 %v1924_v14, %v1923_v12  ;;  %v2026_v21 = vadd.f32 %v2025_v18, %v2024_v15 }
 0x240   : > { %v2028_v23 = vadd.f32 %v2027_v22, %v2026_v21 }
 0x255   : > { %v2383_v4 = vpop.f32.mrb[8].mxu1 }
 0x256   : > { %v2247_v24 = vpack.c.bf16 %v2383_v4, %v2383_v4  ;;  %v1686_v25 = vpop.f32.mrb[9].mxu1  ;;  %v1976_v33 = vmul.f32 %v2383_v4, %v2383_v4  ;;  %v1930_v38 = vsel %vm1878_vm13, %v2383_v4, 0.0 }
 0x257   : > { %v2245_v26 = vpack.c.bf16 %v1686_v25, %v1686_v25  ;;  %v1926_v27 = vsel %vm1878_vm13, %v1686_v25, 0.0  ;;  %v1974_v28 = vmul.f32 %v1686_v25, %v1686_v25  ;;  %v2384_v36 = vpop.f32.mrb[10].mxu1 }
 0x258   : > { %1872 = vst.msk [vmem:[%s2953_s14 + $0x68] sm:$0xf] %vm1845_vm12, %v2247_v24  ;;  %v1927_v29 = vadd.f32 %v1926_v27, %v1925_v20  ;;  %v2248_v17 = vpack.c.bf16 %v2384_v36, %v2384_v36  ;;  %v1689_v30 = vpop.f32.mrb[11].mxu1  ;;  %v1977_v41 = vmul.f32 %v2384_v36, %v2384_v36  ;;  %v1932_v11 = vsel %vm1878_vm13, %v2384_v36, 0.0 }
 0x259   : > { %1870 = vst.msk [vmem:[%s2953_s14 + $0x60] sm:$0xf] %vm1845_vm12, %v2245_v26  ;;  %v2029_v31 = vsel %vm1878_vm13, %v1974_v28, 0.0  ;;  %v2246_v32 = vpack.c.bf16 %v1689_v30, %v1689_v30  ;;  %v1928_v8 = vsel %vm1878_vm13, %v1689_v30, 0.0  ;;  %v1975_v37 = vmul.f32 %v1689_v30, %v1689_v30 }
 0x25a   : > { %v2030_v34 = vadd.f32 %v2029_v31, %v2028_v23  ;;  %1873 = vst.msk [vmem:[%s2953_s14 + $0x6c] sm:$0xf] %vm1845_vm12, %v2248_v17  ;;  %v1929_v35 = vadd.f32 %v1928_v8, %v1927_v29  ;;  %v2033_v43 = vsel %vm1878_vm13, %v1976_v33, 0.0  ;;  %v2035_v46 = vsel %vm1878_vm13, %v1977_v41, 0.0 }
 0x25b   : > { %1871 = vst.msk [vmem:[%s2953_s14 + $0x64] sm:$0xf] %vm1845_vm12, %v2246_v32  ;;  %v2031_v40 = vsel %vm1878_vm13, %v1975_v37, 0.0 }
 0x25c   : > { %v1931_v39 = vadd.f32 %v1930_v38, %v1929_v35  ;;  %v2032_v42 = vadd.f32 %v2031_v40, %v2030_v34 }
 0x25e   : > { %v1933_v44 = vadd.f32 %v1932_v11, %v1931_v39  ;;  %v2034_v45 = vadd.f32 %v2033_v43, %v2032_v42 }
 0x260   : > { %v2036_v47 = vadd.f32 %v2035_v46, %v2034_v45 }
 0x272   : > { %v2387_v48 = vpop.f32.mrb[12].mxu1 }
 0x273   : > { %v2251_v49 = vpack.c.bf16 %v2387_v48, %v2387_v48  ;;  %v1702_v50 = vpop.f32.mrb[13].mxu1  ;;  %v1980_v60 = vmul.f32 %v2387_v48, %v2387_v48  ;;  %v1938_v0 = vsel %vm1878_vm13, %v2387_v48, 0.0 }
 0x274   : > { %v2249_v51 = vpack.c.bf16 %v1702_v50, %v1702_v50  ;;  %v1934_v52 = vsel %vm1878_vm13, %v1702_v50, 0.0  ;;  %v1978_v54 = vmul.f32 %v1702_v50, %v1702_v50  ;;  %v2388_v55 = vpop.f32.mrb[14].mxu1 }
 0x275   : > { %1876 = vst.msk [vmem:[%s2953_s14 + $0x78] sm:$0xf] %vm1845_vm12, %v2251_v49  ;;  %v1935_v56 = vadd.f32 %v1934_v52, %v1933_v44  ;;  %v2252_v57 = vpack.c.bf16 %v2388_v55, %v2388_v55  ;;  %v1705_v53 = vpop.f32.mrb[15].mxu1  ;;  %v1981_v3 = vmul.f32 %v2388_v55, %v2388_v55  ;;  %v1940_v6 = vsel %vm1878_vm13, %v2388_v55, 0.0 }
 0x276   : > { %1874 = vst.msk [vmem:[%s2953_s14 + $0x70] sm:$0xf] %vm1845_vm12, %v2249_v51  ;;  %v2037_v16 = vsel %vm1878_vm13, %v1978_v54, 0.0  ;;  %v2250_v58 = vpack.c.bf16 %v1705_v53, %v1705_v53  ;;  %v1936_v59 = vsel %vm1878_vm13, %v1705_v53, 0.0  ;;  %v1979_v63 = vmul.f32 %v1705_v53, %v1705_v53 }
 0x277   : > { %v2038_v61 = vadd.f32 %v2037_v16, %v2036_v47  ;;  %1877 = vst.msk [vmem:[%s2953_s14 + $0x7c] sm:$0xf] %vm1845_vm12, %v2252_v57  ;;  %v1937_v62 = vadd.f32 %v1936_v59, %v1935_v56  ;;  %v2041_v7 = vsel %vm1878_vm13, %v1980_v60, 0.0  ;;  %v2043_v1 = vsel %vm1878_vm13, %v1981_v3, 0.0 }
 0x278   : > { %1875 = vst.msk [vmem:[%s2953_s14 + $0x74] sm:$0xf] %vm1845_vm12, %v2250_v58  ;;  %v2039_v2 = vsel %vm1878_vm13, %v1979_v63, 0.0 }
 0x279   : > { %v1939_v5 = vadd.f32 %v1938_v0, %v1937_v62  ;;  %v2040_v19 = vadd.f32 %v2039_v2, %v2038_v61 }
 0x27b   : > { %v1941_v9 = vadd.f32 %v1940_v6, %v1939_v5  ;;  %v2042_v10 = vadd.f32 %v2041_v7, %v2040_v19 }
 0x27d   : > { %v1942_v12 = vrot.slane %v1941_v9, 4  ;;  %v2044_v13 = vadd.f32 %v2043_v1, %v2042_v10 }
 0x27f   : > { %v1943_v14 = vadd.f32 %v1942_v12, %v1941_v9  ;;  %v2045_v15 = vrot.slane %v2044_v13, 4 }
 0x281   : > { %v1944_v18 = vrot.slane %v1943_v14, 2  ;;  %v2046_v20 = vadd.f32 %v2045_v15, %v2044_v13 }
 0x283   : > { %v1945_v21 = vadd.f32 %v1944_v18, %v1943_v14  ;;  %v2047_v22 = vrot.slane %v2046_v20, 2 }
 0x285   : > { %v1946_v23 = vrot.slane %v1945_v21, 1  ;;  %v2048_v4 = vadd.f32 %v2047_v22, %v2046_v20 }
 0x287   : > { %v1947_v24 = vadd.f32 %v1946_v23, %v1945_v21  ;;  %v2049_v25 = vrot.slane %v2048_v4, 1 }
 0x289   : > { %1949 = vst.msk [vmem:[%s212_s19] sm:$0x1] %vm1948_vm14, %v1947_v24  ;;  %v2050_v26 = vadd.f32 %v2049_v25, %v2048_v4 }
 0x28b   : > { %2051 = vst.msk [vmem:[%s215_s22] sm:$0x1] %vm1948_vm14, %v2050_v26 }
 0x28c PF: > { %s15_s15 = sadd.s32 1, %s2423_s15  }
 0x28d   : > { %p12_p5 = scmp.ge.s32.totalorder %s15_s15, 4  }
 0x28f   :  { %14 = sbr.rel (!%p12_p5) target bundleno = 1 (0x1), region = 84 }

// kernel: residual_block_forward.5
= control target key start
LH: loop header
LB: loop body
LE: loop exit
PB: predicated region body
PF: predicated region fallthrough
CT: control target
= control target key end

     0   :  { %s2664_s21 = smov 0   ;;  %s3380_s0 = inlined_call_operand.vmem [shape: bf16[2,16,16,8], index: 0, kind: input, shape index: {}]   ;;  %s3381_s1 = inlined_call_operand.vmem [shape: bf16[72,8], index: 1, kind: input, shape index: {}]   ;;  %s3382_s2 = inlined_call_operand.vmem [shape: f32[1,8], index: 2, kind: input, shape index: {}]   ;;  %s3383_s3 = inlined_call_operand.vmem [shape: f32[1,8], index: 3, kind: input, shape index: {}]   ;;  %s3384_s4 = inlined_call_operand.vmem [shape: bf16[512,8], index: 4, kind: output, shape index: {0}]   ;;  %s3385_s5 = inlined_call_operand.vmem [shape: f32[2,1,8], index: 5, kind: output, shape index: {1}]   ;;  %s3386_s6 = inlined_call_operand.vmem [shape: f32[2,1,8], index: 6, kind: output, shape index: {2}]  }
   0x1 LB: > { %s2670_s22 = sadd.s32 4294967295, %s2618_s21   ;;  %p2341_p0 = scmp.ge.s32.totalorder %s2618_s21, 1  ;;  %s2618_s21 = sphi %s2664_s21, %s17_s21  }
   0x2   : > { %p217_p1 = scmp.lt.s32.totalorder %s2618_s21, 3 }
   0x4   : > { %p218_p2 = pnand %p2341_p0, %p217_p1 }
   0x5   : > { %vm271_vm0 = vcmask (!%p218_p2), 64512   ;;  %vm274_vm1 = vcmask (!%p218_p2), 58368   ;;  %v2620_v0 = vmov (!%p218_p2), 0.0   ;;  %p253_p3 = scmp.lt.s32.totalorder (!%p218_p2), %s2670_s22, 1  ;;  %v2741_v1 = vld [vmem:[%s3382_s2] ss:$0 sm:$0xff] (!%p218_p2) }
   0x6   : > { %221 = sbr.rel (%p218_p2) target bundleno = 652 (0x28c), region = 36  ;;  %272 = vst.msk [vmem:[#allocation2] sm:$0xff] (!%p218_p2), %vm271_vm0, %v2620_v0  ;;  %273 = vst.msk [vmem:[#allocation2 + $0x8] sm:$0xff] (!%p218_p2), %vm271_vm0, %v2620_v0  ;;  %v2749_v14 = vld [vmem:[%s3383_s3] ss:$0 sm:$0xff] (!%p218_p2)  ;;  %s2621_s8 = smov (!%p218_p2), 8  }
   0x7   : > { %275 = vst.msk [vmem:[#allocation2 + $0x10] sm:$0x3] (!%p218_p2), %vm274_vm1, %v2620_v0  ;;  %278 = vst.msk [vmem:[#allocation2 + $0x28] sm:$0x3] (!%p218_p2), %vm274_vm1, %v2620_v0  ;;  %s2622_s9 = smov (!%p218_p2), 16   ;;  %s2623_s10 = smov (!%p218_p2), 24  }
   0x8   : > { %276 = vst.msk [vmem:[#allocation2 + $0x18] sm:$0xff] (!%p218_p2), %vm271_vm0, %v2620_v0  ;;  %277 = vst.msk [vmem:[#allocation2 + $0x20] sm:$0xff] (!%p218_p2), %vm271_vm0, %v2620_v0  ;;  %s2624_s11 = smov (!%p218_p2), 32   ;;  %s2625_s12 = smov (!%p218_p2), 40   ;;  %vm1732_vm2 = vcmask (!%p218_p2), 1043456   ;;  %vm710_vm3 = vcmask (!%p218_p2), 130112  }
   0x9   : > { %279 = vst.msk [vmem:[#allocation2 + $0x30] sm:$0xff] (!%p218_p2), %vm271_vm0, %v2620_v0  ;;  %280 = vst.msk [vmem:[#allocation2 + $0x38] sm:$0xff] (!%p218_p2), %vm271_vm0, %v2620_v0  ;;  %s2626_s17 = smov (!%p218_p2), 48   ;;  %s2627_s20 = smov (!%p218_p2), 56   ;;  %vm839_vm4 = vcmask (!%p218_p2), 195712   ;;  %vm968_vm5 = vcmask (!%p218_p2), 261312  }
   0xa   : > { %281 = vst.msk [vmem:[#allocation2 + $0x40] sm:$0x3] (!%p218_p2), %vm274_vm1, %v2620_v0  ;;  %284 = vst.msk [vmem:[#allocation2 + $0x58] sm:$0x3] (!%p218_p2), %vm274_vm1, %v2620_v0  ;;  %s2628_s26 = smov (!%p218_p2), 64   ;;  %vm1097_vm6 = vcmask (!%p218_p2), 326912  }
   0xb   : > { %282 = vst.msk [vmem:[#allocation2 + $0x48] sm:$0xff] (!%p218_p2), %vm271_vm0, %v2620_v0  ;;  %283 = vst.msk [vmem:[#allocation2 + $0x50] sm:$0xff] (!%p218_p2), %vm271_vm0, %v2620_v0  ;;  %vm1226_vm7 = vcmask (!%p218_p2), 392512   ;;  %vm1356_vm8 = vcmask (!%p218_p2), 458112   ;;  %vm1485_vm9 = vcmask (!%p218_p2), 523712   ;;  %vm1614_vm10 = vcmask (!%p218_p2), 589312  }
   0xc   : > { %285 = vst.msk [vmem:[#allocation2 + $0x60] sm:$0xff] (!%p218_p2), %vm271_vm0, %v2620_v0  ;;  %286 = vst.msk [vmem:[#allocation2 + $0x68] sm:$0xff] (!%p218_p2), %vm271_vm0, %v2620_v0  ;;  %vm1683_vm11 = vcmask (!%p218_p2), 588800   ;;  %vm2025_vm12 = vcmask (!%p218_p2), 60416   ;;  %vm2127_vm13 = vcmask (!%p218_p2), 57344  }
   0xd   : > { %287 = vst.msk [vmem:[#allocation2 + $0x70] sm:$0x3] %vm274_vm1, %v2620_v0  ;;  %290 = vst.msk [vmem:[#allocation2 + $0x88] sm:$0x3] %vm274_vm1, %v2620_v0  ;;  %s2730_s23 = scalar_select %p253_p3, %s2670_s22, 1  ;;  %v598_v5 = vld [vmem:[#allocation2 + $0x1] sm:$0xff] }
   0xe   : > { %288 = vst.msk [vmem:[#allocation2 + $0x78] sm:$0xff] %vm271_vm0, %v2620_v0  ;;  %289 = vst.msk [vmem:[#allocation2 + $0x80] sm:$0xff] %vm271_vm0, %v2620_v0  ;;  %v599_v6 = vld [vmem:[#allocation2 + $0x9] sm:$0xff] }
   0xf   : > { %291 = vst.msk [vmem:[#allocation2 + $0x90] sm:$0xff] %vm271_vm0, %v2620_v0  ;;  %292 = vst.msk [vmem:[#allocation2 + $0x98] sm:$0xff] %vm271_vm0, %v2620_v0  ;;  %s2403_s24 = sshll.u32 %s2730_s23, 7  ;;  %v727_v7 = vld [vmem:[#allocation2 + $0x2] sm:$0xff]  ;;  %v630_v12 = vpack.c.bf16 %v599_v6, %v598_v5  ;;  %v728_v13 = vld [vmem:[#allocation2 + $0xa] sm:$0xff]  ;;  %s269_s14 = scalar_lea.vmem %s3386_s6, %s2730_s23 }
  0x10   : > { %293 = vst.msk [vmem:[#allocation2 + $0xa0] sm:$0x3] %vm274_vm1, %v2620_v0  ;;  %296 = vst.msk [vmem:[#allocation2 + $0xb8] sm:$0x3] %vm274_vm1, %v2620_v0  ;;  %s2736_s27 = scalar_lea.vmem %s3380_s0, %s2403_s24  ;;  %v759_v18 = vpack.c.bf16 %v728_v13, %v727_v7  ;;  %v535_v7 = vld [vmem:[#allocation2 + $0x8] sm:$0xff] }
  0x11   : > { %294 = vst.msk [vmem:[#allocation2 + $0xa8] sm:$0xff] %vm271_vm0, %v2620_v0  ;;  %295 = vst.msk [vmem:[#allocation2 + $0xb0] sm:$0xff] %vm271_vm0, %v2620_v0  ;;  %v2437_v2 = vld [vmem:[%s2736_s27] sm:$0xff]   ;;  %v2500_v3 = vld [vmem:[%s2736_s27 + $0x8] sm:$0xff]   ;;  %662 = vrot.lane.b32.xlu0 %v630_v12, %s2621_s8 }
  0x12   : > { %297 = vst.msk [vmem:[#allocation2 + $0xc0] sm:$0xff] %vm271_vm0, %v2620_v0  ;;  %298 = vst.msk [vmem:[#allocation2 + $0xc8] sm:$0xff] %vm271_vm0, %v2620_v0  ;;  %v2501_v4 = vld [vmem:[%s2736_s27 + $0x10] sm:$0xff]   ;;  %v2438_v8 = vunpack.c.l.bf16 %v2437_v2  ;;  %v2439_v9 = vunpack.c.h.bf16 %v2437_v2  ;;  %v2442_v10 = vunpack.c.l.bf16 %v2500_v3  ;;  %v2443_v11 = vunpack.c.h.bf16 %v2500_v3  ;;  %v2502_v17 = vld [vmem:[%s2736_s27 + $0x18] sm:$0xff]   ;;  %791 = vrot.lane.b32.xlu1 %v759_v18, %s2622_s9 }
  0x13   : > { %299 = vst.msk [vmem:[#allocation2 + $0xd0] sm:$0x3] %vm274_vm1, %v2620_v0  ;;  %302 = vst.msk [vmem:[#allocation2 + $0xe8] sm:$0x3] %vm274_vm1, %v2620_v0  ;;  %v2446_v15 = vunpack.c.l.bf16 %v2501_v4  ;;  %v2447_v16 = vunpack.c.h.bf16 %v2501_v4  ;;  %v2450_v25 = vunpack.c.l.bf16 %v2502_v17  ;;  %v2451_v29 = vunpack.c.h.bf16 %v2502_v17  ;;  %v2503_v34 = vld [vmem:[%s2736_s27 + $0x20] sm:$0xff]   ;;  %v2504_v35 = vld [vmem:[%s2736_s27 + $0x28] sm:$0xff]  }
  0x14   : > { %300 = vst.msk [vmem:[#allocation2 + $0xd8] sm:$0xff] %vm271_vm0, %v2620_v0  ;;  %301 = vst.msk [vmem:[#allocation2 + $0xe0] sm:$0xff] %vm271_vm0, %v2620_v0  ;;  %v398_v19 = vmul.f32 %v2438_v8, %v2741_v1  ;;  %v399_v20 = vmul.f32 %v2439_v9, %v2741_v1  ;;  %v400_v21 = vmul.f32 %v2442_v10, %v2741_v1  ;;  %v2505_v40 = vld [vmem:[%s2736_s27 + $0x30] sm:$0xff]   ;;  %v2454_v46 = vunpack.c.l.bf16 %v2503_v34  ;;  %v2506_v49 = vld [vmem:[%s2736_s27 + $0x38] sm:$0xff]  }
  0x15   : > { %303 = vst.msk [vmem:[#allocation2 + $0xf0] sm:$0xff] %vm271_vm0, %v2620_v0  ;;  %304 = vst.msk [vmem:[#allocation2 + $0xf8] sm:$0xff] %vm271_vm0, %v2620_v0  ;;  %v401_v22 = vmul.f32 %v2443_v11, %v2741_v1  ;;  %v402_v23 = vmul.f32 %v2446_v15, %v2741_v1  ;;  %v403_v24 = vmul.f32 %v2447_v16, %v2741_v1  ;;  %v2455_v47 = vunpack.c.h.bf16 %v2503_v34  ;;  %v534_v8 = vld [vmem:[#allocation2] sm:$0xff] }
  0x16   : > { %305 = vst.msk [vmem:[#allocation2 + $0x100] sm:$0x3] %vm274_vm1, %v2620_v0  ;;  %308 = vst.msk [vmem:[#allocation2 + $0x118] sm:$0x3] %vm274_vm1, %v2620_v0  ;;  %v437_v26 = vadd.f32 %v2749_v14, %v398_v19  ;;  %v438_v27 = vadd.f32 %v2749_v14, %v399_v20  ;;  %v439_v28 = vadd.f32 %v2749_v14, %v400_v21  ;;  %v2458_v48 = vunpack.c.l.bf16 %v2504_v35  ;;  %v2507_v9 = vld [vmem:[%s2736_s27 + $0x40] sm:$0xff]  }
  0x17   : > { %306 = vst.msk [vmem:[#allocation2 + $0x108] sm:$0xff] %vm271_vm0, %v2620_v0  ;;  %307 = vst.msk [vmem:[#allocation2 + $0x110] sm:$0xff] %vm271_vm0, %v2620_v0  ;;  %v440_v30 = vadd.f32 %v2749_v14, %v401_v22  ;;  %v441_v31 = vadd.f32 %v2749_v14, %v402_v23  ;;  %v442_v32 = vadd.f32 %v2749_v14, %v403_v24  ;;  %v2459_v51 = vunpack.c.h.bf16 %v2504_v35 }
  0x18   : > { %309 = vst.msk [vmem:[#allocation2 + $0x120] sm:$0xff] %vm271_vm0, %v2620_v0  ;;  %310 = vst.msk [vmem:[#allocation2 + $0x128] sm:$0xff] %vm271_vm0, %v2620_v0  ;;  %v404_v33 = vmul.f32 %v2450_v25, %v2741_v1  ;;  %v469_v36 = vmax.f32 %v437_v26, 0.0  ;;  %v470_v37 = vmax.f32 %v438_v27, 0.0  ;;  %v471_v38 = vmax.f32 %v439_v28, 0.0 }
  0x19   : > { %311 = vst.msk [vmem:[#allocation2 + $0x130] sm:$0x3] %vm274_vm1, %v2620_v0  ;;  %314 = vst.msk [vmem:[#allocation2 + $0x148] sm:$0x3] %vm274_vm1, %v2620_v0  ;;  %v405_v39 = vmul.f32 %v2451_v29, %v2741_v1  ;;  %v472_v41 = vmax.f32 %v440_v30, 0.0  ;;  %v473_v42 = vmax.f32 %v441_v31, 0.0  ;;  %v2462_v52 = vunpack.c.l.bf16 %v2505_v40 }
  0x1a   : > { %312 = vst.msk [vmem:[#allocation2 + $0x138] sm:$0xff] %vm271_vm0, %v2620_v0  ;;  %313 = vst.msk [vmem:[#allocation2 + $0x140] sm:$0xff] %vm271_vm0, %v2620_v0  ;;  %v474_v43 = vmax.f32 %v442_v32, 0.0  ;;  %v443_v44 = vadd.f32 %v2749_v14, %v404_v33  ;;  %v2463_v53 = vunpack.c.h.bf16 %v2505_v40  ;;  %v406_v55 = vmul.f32 %v2454_v46, %v2741_v1 }
  0x1b   : > { %315 = vst.msk [vmem:[#allocation2 + $0x150] sm:$0xff] %vm271_vm0, %v2620_v0  ;;  %316 = vst.msk [vmem:[#allocation2 + $0x158] sm:$0xff] %vm271_vm0, %v2620_v0  ;;  %v444_v45 = vadd.f32 %v2749_v14, %v405_v39  ;;  %v407_v56 = vmul.f32 %v2455_v47, %v2741_v1  ;;  %v408_v57 = vmul.f32 %v2458_v48, %v2741_v1  ;;  %v2466_v61 = vunpack.c.l.bf16 %v2506_v49 }
  0x1c   : > { %317 = vst.msk [vmem:[#allocation2 + $0x160] sm:$0x3] %vm274_vm1, %v2620_v0  ;;  %320 = vst.msk [vmem:[#allocation2 + $0x178] sm:$0x3] %vm274_vm1, %v2620_v0  ;;  %v475_v50 = vmax.f32 %v443_v44, 0.0  ;;  %v409_v58 = vmul.f32 %v2459_v51, %v2741_v1  ;;  %v410_v59 = vmul.f32 %v2462_v52, %v2741_v1  ;;  %v411_v60 = vmul.f32 %v2463_v53, %v2741_v1 }
  0x1d   : > { %318 = vst.msk [vmem:[#allocation2 + $0x168] sm:$0xff] %vm271_vm0, %v2620_v0  ;;  %319 = vst.msk [vmem:[#allocation2 + $0x170] sm:$0xff] %vm271_vm0, %v2620_v0  ;;  %v476_v54 = vmax.f32 %v444_v45, 0.0  ;;  %v445_v62 = vadd.f32 %v2749_v14, %v406_v55  ;;  %v446_v63 = vadd.f32 %v2749_v14, %v407_v56  ;;  %v2467_v2 = vunpack.c.h.bf16 %v2506_v49 }
  0x1e   : > { %321 = vst.msk [vmem:[#allocation2 + $0x180] sm:$0xff] %vm271_vm0, %v2620_v0  ;;  %322 = vst.msk [vmem:[#allocation2 + $0x188] sm:$0xff] %vm271_vm0, %v2620_v0  ;;  %v448_v3 = vadd.f32 %v2749_v14, %v409_v58  ;;  %v449_v4 = vadd.f32 %v2749_v14, %v410_v59  ;;  %v450_v5 = vadd.f32 %v2749_v14, %v411_v60  ;;  %v2470_v28 = vunpack.c.l.bf16 %v2507_v9 }
  0x1f   : > { %323 = vst.msk [vmem:[#allocation2 + $0x190] sm:$0x3] %vm274_vm1, %v2620_v0  ;;  %326 = vst.msk [vmem:[#allocation2 + $0x1a8] sm:$0x3] %vm274_vm1, %v2620_v0  ;;  %v412_v6 = vmul.f32 %v2466_v61, %v2741_v1  ;;  %v477_v10 = vmax.f32 %v445_v62, 0.0  ;;  %v478_v11 = vmax.f32 %v446_v63, 0.0  ;;  %v413_v13 = vmul.f32 %v2467_v2, %v2741_v1 }
  0x20   : > { %324 = vst.msk [vmem:[#allocation2 + $0x198] sm:$0xff] %vm271_vm0, %v2620_v0  ;;  %325 = vst.msk [vmem:[#allocation2 + $0x1a0] sm:$0xff] %vm271_vm0, %v2620_v0  ;;  %v447_v0 = vadd.f32 %v2749_v14, %v408_v57  ;;  %v480_v18 = vmax.f32 %v448_v3, 0.0  ;;  %v481_v19 = vmax.f32 %v449_v4, 0.0  ;;  %v482_v20 = vmax.f32 %v450_v5, 0.0 }
  0x21   : > { %502 = vst.msk [vmem:[#allocation2 + $0x19] sm:$0xff] %vm271_vm0, %v469_v36  ;;  %503 = vst.msk [vmem:[#allocation2 + $0x21] sm:$0xff] %vm271_vm0, %v470_v37  ;;  %v451_v21 = vadd.f32 %v2749_v14, %v412_v6  ;;  %v452_v26 = vadd.f32 %v2749_v14, %v413_v13  ;;  %v566_v27 = vpack.c.bf16 %v535_v7, %v534_v8  ;;  %v2471_v34 = vunpack.c.h.bf16 %v2507_v9  ;;  %v2607_v7 = vld [vmem:[%s3381_s1] sm:$0xff]   ;;  %v2609_v13 = vld [vmem:[%s3381_s1 + $0x10] sm:$0xff]  }
  0x22   : > { %504 = vst.msk [vmem:[#allocation2 + $0x31] sm:$0xff] %vm271_vm0, %v471_v38  ;;  %505 = vst.msk [vmem:[#allocation2 + $0x39] sm:$0xff] %vm271_vm0, %v472_v41  ;;  %v479_v12 = vmax.f32 %v447_v0, 0.0  ;;  %v414_v37 = vmul.f32 %v2470_v28, %v2741_v1  ;;  %v2508_v38 = vld [vmem:[%s2736_s27 + $0x48] sm:$0xff]   ;;  %2536 = vmatprep.subr.bf16.mxu0 %v2607_v7  ;;  %2578 = vmatprep.subr.bf16.mxu1 %v2607_v7 }
  0x23   : > { %506 = vst.msk [vmem:[#allocation2 + $0x49] sm:$0xff] %vm271_vm0, %v473_v42  ;;  %507 = vst.msk [vmem:[#allocation2 + $0x51] sm:$0xff] %vm271_vm0, %v474_v43  ;;  %v483_v33 = vmax.f32 %v451_v21, 0.0  ;;  %v484_v36 = vmax.f32 %v452_v26, 0.0  ;;  %v415_v41 = vmul.f32 %v2471_v34, %v2741_v1  ;;  %v2474_v49 = vunpack.c.l.bf16 %v2508_v38  ;;  %2537 = vmatpush3.bf16.msra.mxu0 %v2607_v7  ;;  %2583 = vmatpush3.bf16.msra.mxu1 %v2607_v7  ;;  %v2611_v34 = vld [vmem:[%s3381_s1 + $0x20] ss:$0 sps:$4 sm:$0xff]  }
  0x24   : > { %508 = vst.msk [vmem:[#allocation2 + $0x61] sm:$0xff] %vm271_vm0, %v475_v50  ;;  %509 = vst.msk [vmem:[#allocation2 + $0x69] sm:$0xff] %vm271_vm0, %v476_v54  ;;  %v453_v45 = vadd.f32 %v2749_v14, %v414_v37  ;;  %v2475_v52 = vunpack.c.h.bf16 %v2508_v38  ;;  %v1734_v37 = vsel %vm1732_vm2, %v2611_v34, 0  ;;  %v2511_v38 = vld [vmem:[%s2736_s27 + $0x60] sm:$0xff]  }
  0x25   : > { %510 = vst.msk [vmem:[#allocation2 + $0x79] sm:$0xff] %vm271_vm0, %v477_v10  ;;  %511 = vst.msk [vmem:[#allocation2 + $0x81] sm:$0xff] %vm271_vm0, %v478_v11  ;;  %v454_v48 = vadd.f32 %v2749_v14, %v415_v41  ;;  %v416_v57 = vmul.f32 %v2474_v49, %v2741_v1  ;;  %v2608_v10 = vld [vmem:[%s3381_s1 + $0x8] sm:$0xff]   ;;  %v2509_v11 = vld [vmem:[%s2736_s27 + $0x50] sm:$0xff]  }
  0x26   : > { %512 = vst.msk [vmem:[#allocation2 + $0x91] sm:$0xff] %vm271_vm0, %v479_v12  ;;  %513 = vst.msk [vmem:[#allocation2 + $0x99] sm:$0xff] %vm271_vm0, %v480_v18  ;;  %v485_v51 = vmax.f32 %v453_v45, 0.0  ;;  %v417_v61 = vmul.f32 %v2475_v52, %v2741_v1  ;;  %2538 = vmatprep.subr.bf16.mxu0 %v2608_v10  ;;  %2579 = vmatprep.subr.bf16.mxu1 %v2608_v10 }
  0x27   : > { %514 = vst.msk [vmem:[#allocation2 + $0xa9] sm:$0xff] %vm271_vm0, %v481_v19  ;;  %515 = vst.msk [vmem:[#allocation2 + $0xb1] sm:$0xff] %vm271_vm0, %v482_v20  ;;  %v486_v56 = vmax.f32 %v454_v48, 0.0  ;;  %v455_v62 = vadd.f32 %v2749_v14, %v416_v57  ;;  %2539 = vmatpush3.bf16.msra.mxu0 %v2608_v10  ;;  %2584 = vmatpush3.bf16.msra.mxu1 %v2608_v10 }
  0x28   : > { %v600_v15 = vld [vmem:[#allocation2 + $0x19] sm:$0xff]  ;;  %v601_v16 = vld [vmem:[#allocation2 + $0x21] sm:$0xff]  ;;  %582 = vst.msk [vmem:[#allocation3] sm:$0xff] %vm271_vm0, %v566_v27  ;;  %516 = vst.msk [vmem:[#allocation2 + $0xc1] sm:$0xff] %vm271_vm0, %v483_v33  ;;  %v456_v63 = vadd.f32 %v2749_v14, %v417_v61  ;;  %2540 = vmatprep.subr.bf16.mxu0 %v2609_v13  ;;  %2580 = vmatprep.subr.bf16.mxu1 %v2609_v13 }
  0x29   : > { %v729_v17 = vld [vmem:[#allocation2 + $0x1a] sm:$0xff]  ;;  %v631_v22 = vpack.c.bf16 %v601_v16, %v600_v15  ;;  %v730_v23 = vld [vmem:[#allocation2 + $0x22] sm:$0xff]  ;;  %v858_v31 = vld [vmem:[#allocation2 + $0x30] sm:$0xff]  ;;  %517 = vst.msk [vmem:[#allocation2 + $0xc9] sm:$0xff] %vm271_vm0, %v484_v36  ;;  %v487_v4 = vmax.f32 %v455_v62, 0.0  ;;  %v2478_v15 = vunpack.c.l.bf16 %v2509_v11  ;;  %v2479_v16 = vunpack.c.h.bf16 %v2509_v11 }
  0x2a   : > { %v856_v24 = vld [vmem:[#allocation2 + $0x18] sm:$0xff]  ;;  %v857_v25 = vld [vmem:[#allocation2 + $0x20] sm:$0xff]  ;;  %v2802_v29 = vpack.c.bf16 %v730_v23, %v729_v17  ;;  %v1246_v39 = vld [vmem:[#allocation2 + $0x48] sm:$0xff]  ;;  %518 = vst.msk [vmem:[#allocation2 + $0xd9] sm:$0xff] %vm271_vm0, %v485_v51  ;;  %v488_v6 = vmax.f32 %v456_v63, 0.0 }
  0x2b   : > { %v888_v30 = vpack.c.bf16 %v857_v25, %v856_v24  ;;  %v859_v32 = vld [vmem:[#allocation2 + $0x38] sm:$0xff]  ;;  %664 = vrot.lane.b32.xlu0 %v631_v22, %s2621_s8  ;;  %v1247_v40 = vld [vmem:[#allocation2 + $0x50] sm:$0xff]  ;;  %v862_v46 = vld [vmem:[#allocation2 + $0x60] sm:$0xff]  ;;  %519 = vst.msk [vmem:[#allocation2 + $0xe1] sm:$0xff] %vm271_vm0, %v486_v56  ;;  %v418_v18 = vmul.f32 %v2478_v15, %v2741_v1  ;;  %v419_v19 = vmul.f32 %v2479_v16, %v2741_v1 }
  0x2c   : > { %v2808_v35 = vpack.c.bf16 %v859_v32, %v858_v31  ;;  %793 = vrot.lane.b32.xlu1 %v2802_v29, %s2622_s9  ;;  %v987_v42 = vld [vmem:[#allocation2 + $0x31] sm:$0xff]  ;;  %v988_v43 = vld [vmem:[#allocation2 + $0x39] sm:$0xff]  ;;  %v2818_v44 = vpack.c.bf16 %v1247_v40, %v1246_v39  ;;  %v863_v47 = vld [vmem:[#allocation2 + $0x68] sm:$0xff]  ;;  %520 = vst.msk [vmem:[#allocation2 + $0xf1] sm:$0xff] %vm271_vm0, %v487_v4  ;;  %2541 = vmatpush3.bf16.msra.mxu0 %v2609_v13  ;;  %v2486_v39 = vunpack.c.l.bf16 %v2511_v38  ;;  %v2487_v40 = vunpack.c.h.bf16 %v2511_v38 }
  0x2d   : > { %583 = vst.msk [vmem:[#allocation3 + $0x8] sm:$0xff] %vm271_vm0, %v888_v30  ;;  %v2826_v50 = vpack.c.bf16 %v863_v47, %v862_v46  ;;  %v2832_v53 = vpack.c.bf16 %v988_v43, %v987_v42  ;;  %v1250_v54 = vld [vmem:[#allocation2 + $0x78] sm:$0xff]  ;;  %v1251_v55 = vld [vmem:[#allocation2 + $0x80] sm:$0xff]  ;;  %521 = vst.msk [vmem:[#allocation2 + $0xf9] sm:$0xff] %vm271_vm0, %v488_v6  ;;  %v457_v25 = vadd.f32 %v2749_v14, %v418_v18  ;;  %2585 = vmatpush3.bf16.msra.mxu1 %v2609_v13 }
  0x2e   : > { %584 = vst.msk [vmem:[#allocation3 + $0x10] sm:$0xff] %vm271_vm0, %v2808_v35  ;;  %585 = vst.msk [vmem:[#allocation3 + $0x18] sm:$0xff] %vm271_vm0, %v2818_v44  ;;  %v1116_v58 = vld [vmem:[#allocation2 + $0x32] sm:$0xff]  ;;  %v1117_v59 = vld [vmem:[#allocation2 + $0x3a] sm:$0xff]  ;;  %v2835_v60 = vpack.c.bf16 %v1251_v55, %v1250_v54  ;;  %v458_v26 = vadd.f32 %v2749_v14, %v419_v19  ;;  %v422_v45 = vmul.f32 %v2486_v39, %v2741_v1 }
  0x2f   : > { %920 = vrot.lane.b32.xlu0 %v888_v30, %s2623_s10  ;;  %586 = vst.msk [vmem:[#allocation3 + $0x20] sm:$0xff] %vm271_vm0, %v2826_v50  ;;  %v2849_v0 = vpack.c.bf16 %v1117_v59, %v1116_v58  ;;  %v1254_v2 = vld [vmem:[#allocation2 + $0xa8] sm:$0xff]  ;;  %v1255_v3 = vld [vmem:[#allocation2 + $0xb0] sm:$0xff]  ;;  %v2510_v17 = vld [vmem:[%s2736_s27 + $0x58] sm:$0xff]   ;;  %v423_v46 = vmul.f32 %v2487_v40, %v2741_v1 }
  0x30   : > { %922 = vrot.lane.b32.xlu1 %v2808_v35, %s2623_s10  ;;  %587 = vst.msk [vmem:[#allocation3 + $0x28] sm:$0xff] %vm271_vm0, %v2835_v60  ;;  %v2851_v5 = vpack.c.bf16 %v1255_v3, %v1254_v2  ;;  %v1375_v8 = vld [vmem:[#allocation2 + $0x49] sm:$0xff]  ;;  %v1376_v9 = vld [vmem:[#allocation2 + $0x51] sm:$0xff]  ;;  %v2482_v20 = vunpack.c.l.bf16 %v2510_v17  ;;  %v2483_v21 = vunpack.c.h.bf16 %v2510_v17  ;;  %v490_v30 = vmax.f32 %v458_v26, 0.0  ;;  %v991_v47 = vld [vmem:[#allocation2 + $0x61] sm:$0xff] }
  0x31   : > { %v2872_v12 = vpack.c.bf16 %v1376_v9, %v1375_v8  ;;  %v1505_v23 = vld [vmem:[#allocation2 + $0x52] sm:$0xff]  ;;  %v992_v48 = vld [vmem:[#allocation2 + $0x69] sm:$0xff]  ;;  %v461_v52 = vadd.f32 %v2749_v14, %v422_v45  ;;  %v1380_v62 = vld [vmem:[#allocation2 + $0x81] sm:$0xff] }
  0x32   : > { %589 = vst.msk [vmem:[#allocation3 + $0x38] sm:$0xff] %vm271_vm0, %v2851_v5  ;;  %v2610_v24 = vld [vmem:[%s3381_s1 + $0x18] sm:$0xff]   ;;  %v420_v27 = vmul.f32 %v2482_v20, %v2741_v1  ;;  %v421_v28 = vmul.f32 %v2483_v21, %v2741_v1  ;;  %523 = vst.msk [vmem:[#allocation2 + $0x111] sm:$0xff] %vm271_vm0, %v490_v30  ;;  %v1020_v55 = vpack.c.bf16 %v992_v48, %v991_v47  ;;  %v1120_v58 = vld [vmem:[#allocation2 + $0x62] sm:$0xff] }
  0x33   : > { %1049 = vrot.lane.b32.xlu0 %v631_v22, %s2624_s11  ;;  %v1504_v22 = vld [vmem:[#allocation2 + $0x4a] sm:$0xff]  ;;  %2542 = vmatprep.subr.bf16.mxu0 %v2610_v24  ;;  %v493_v56 = vmax.f32 %v461_v52, 0.0  ;;  %v1379_v61 = vld [vmem:[#allocation2 + $0x79] sm:$0xff]  ;;  %v1509_v9 = vld [vmem:[#allocation2 + $0x82] sm:$0xff] }
  0x34   : > { %1051 = vrot.lane.b32.xlu1 %v2832_v53, %s2624_s11  ;;  %v1535_v31 = vpack.c.bf16 %v1505_v23, %v1504_v22  ;;  %v459_v32 = vadd.f32 %v2749_v14, %v420_v27  ;;  %v460_v33 = vadd.f32 %v2749_v14, %v421_v28  ;;  %2581 = vmatprep.subr.bf16.mxu1 %v2610_v24  ;;  %v1121_v59 = vld [vmem:[#allocation2 + $0x6a] sm:$0xff]  ;;  %v1508_v8 = vld [vmem:[#allocation2 + $0x7a] sm:$0xff] }
  0x35   : > { %2543 = vmatpush3.bf16.msra.mxu0 %v2610_v24  ;;  %2586 = vmatpush3.bf16.msra.mxu1 %v2610_v24  ;;  %526 = vst.msk [vmem:[#allocation2 + $0x139] sm:$0xff] %vm271_vm0, %v493_v56  ;;  %v1408_v3 = vpack.c.bf16 %v1380_v62, %v1379_v61  ;;  %v2512_v4 = vld [vmem:[%s2736_s27 + $0x68] sm:$0xff]   ;;  %v1537_v13 = vpack.c.bf16 %v1509_v9, %v1508_v8  ;;  %v866_v17 = vld [vmem:[#allocation2 + $0x90] sm:$0xff]  ;;  %v867_v18 = vld [vmem:[#allocation2 + $0x98] sm:$0xff] }
  0x36   : > { %v492_v36 = vmax.f32 %v460_v33, 0.0  ;;  %2588 = vmatprep.subr.msk.bf16.mxu0 %vm1732_vm2, %v2611_v34  ;;  %2589 = vmatprep.subr.msk.bf16.mxu1 %vm1732_vm2, %v2611_v34  ;;  %v2490_v6 = vunpack.c.l.bf16 %v2512_v4  ;;  %v2491_v7 = vunpack.c.h.bf16 %v2512_v4  ;;  %v2513_v19 = vld [vmem:[%s2736_s27 + $0x70] sm:$0xff]   ;;  %v893_v22 = vpack.c.bf16 %v867_v18, %v866_v17  ;;  %v996_v26 = vld [vmem:[#allocation2 + $0x99] sm:$0xff]  ;;  %v871_v62 = vld [vmem:[#allocation2 + $0xc8] sm:$0xff] }
  0x37   : > { %1178 = vrot.lane.b32.xlu0 %v2802_v29, %s2625_s12  ;;  %v489_v29 = vmax.f32 %v457_v25, 0.0  ;;  %v2494_v20 = vunpack.c.l.bf16 %v2513_v19  ;;  %v2495_v21 = vunpack.c.h.bf16 %v2513_v19  ;;  %v995_v23 = vld [vmem:[#allocation2 + $0x91] sm:$0xff]  ;;  %v1383_v40 = vld [vmem:[#allocation2 + $0xa9] sm:$0xff]  ;;  %v550_v9 = vld [vmem:[#allocation2 + $0xc0] sm:$0xff] }
  0x38   : > { %1180 = vrot.lane.b32.xlu1 %v2849_v0, %s2625_s12  ;;  %525 = vst.msk [vmem:[#allocation2 + $0x129] sm:$0xff] %vm271_vm0, %v492_v36  ;;  %v424_v10 = vmul.f32 %v2490_v6, %v2741_v1  ;;  %v1125_v36 = vld [vmem:[#allocation2 + $0x9a] sm:$0xff]  ;;  %v1512_v52 = vld [vmem:[#allocation2 + $0xaa] sm:$0xff] }
  0x39   : > { %522 = vst.msk [vmem:[#allocation2 + $0x109] sm:$0xff] %vm271_vm0, %v489_v29  ;;  %2545 = vmatpush3.bf16.msra.mxu0 %v1734_v37  ;;  %2587 = vmatpush3.bf16.msra.mxu1 %v1734_v37  ;;  %v426_v24 = vmul.f32 %v2494_v20, %v2741_v1  ;;  %v427_v25 = vmul.f32 %v2495_v21, %v2741_v1  ;;  %v546_v37 = vld [vmem:[#allocation2 + $0x90] sm:$0xff]  ;;  %v547_v38 = vld [vmem:[#allocation2 + $0x98] sm:$0xff]  ;;  %v1388_v19 = vld [vmem:[#allocation2 + $0xe1] sm:$0xff] }
  0x3a   : > { %v463_v11 = vadd.f32 %v2749_v14, %v424_v10  ;;  %v572_v39 = vpack.c.bf16 %v547_v38, %v546_v37  ;;  %v2514_v48 = vld [vmem:[%s2736_s27 + $0x78] sm:$0xff]   ;;  %v1129_v8 = vld [vmem:[#allocation2 + $0xca] sm:$0xff]  ;;  %s2344_s27 = sshll.u32 %s2670_s22, 5 }
  0x3b   : > { %1308 = vrot.lane.b32.xlu0 %v2808_v35, %s2626_s17  ;;  %v491_v35 = vmax.f32 %v459_v32, 0.0  ;;  %v465_v30 = vadd.f32 %v2749_v14, %v426_v24  ;;  %v1022_v32 = vpack.c.bf16 %v996_v26, %v995_v23  ;;  %v551_v10 = vld [vmem:[#allocation2 + $0xc8] sm:$0xff]  ;;  %v1387_v18 = vld [vmem:[#allocation2 + $0xd9] sm:$0xff]  ;;  %v1003_v37 = vld [vmem:[#allocation2 + $0xf1] sm:$0xff]  ;;  %p259_p4 = scmp.lt.s32.totalorder %s2344_s27, 63 }
  0x3c   : > { %1310 = vrot.lane.b32.xlu1 %v2818_v44, %s2626_s17  ;;  %v1266_v63 = vld [vmem:[#allocation2 + $0x138] sm:$0xff]  ;;  %v495_v15 = vmax.f32 %v463_v11, 0.0  ;;  %588 = vst.msk [vmem:[#allocation3 + $0x30] sm:$0xff] %vm271_vm0, %v572_v39  ;;  %v574_v11 = vpack.c.bf16 %v551_v10, %v550_v9  ;;  %v1412_v20 = vpack.c.bf16 %v1388_v19, %v1387_v18  ;;  %v1517_v24 = vld [vmem:[#allocation2 + $0xe2] sm:$0xff] }
  0x3d   : > { %524 = vst.msk [vmem:[#allocation2 + $0x121] sm:$0xff] %vm271_vm0, %v491_v35  ;;  %v497_v33 = vmax.f32 %v465_v30, 0.0  ;;  %v1124_v35 = vld [vmem:[#allocation2 + $0x92] sm:$0xff]  ;;  %v1516_v23 = vld [vmem:[#allocation2 + $0xda] sm:$0xff]  ;;  %s3388_s27 = smov (!%p259_p4, %s2344_s27), 63 }
  0x3e   : > { %528 = vst.msk [vmem:[#allocation2 + $0x151] sm:$0xff] %vm271_vm0, %v495_v15  ;;  %590 = vst.msk [vmem:[#allocation3 + $0x40] sm:$0xff] %vm271_vm0, %v574_v11  ;;  %v553_v15 = vld [vmem:[#allocation2 + $0xe0] sm:$0xff]  ;;  %s2345_s30 = sshll.u32 %s3388_s27, 2 }
  0x3f   : > { %1437 = vrot.lane.b32.xlu0 %v2832_v53, %s2627_s20  ;;  %530 = vst.msk [vmem:[#allocation2 + $0x169] sm:$0xff] %vm271_vm0, %v497_v33  ;;  %v875_v33 = vld [vmem:[#allocation2 + $0xf8] sm:$0xff]  ;;  %v1008_v11 = vld [vmem:[#allocation2 + $0x129] sm:$0xff] }
  0x40   : > { %1439 = vrot.lane.b32.xlu1 %v2872_v12, %s2627_s20  ;;  %v1262_v41 = vld [vmem:[#allocation2 + $0x108] sm:$0xff]  ;;  %v1263_v42 = vld [vmem:[#allocation2 + $0x110] sm:$0xff]  ;;  %v1004_v38 = vld [vmem:[#allocation2 + $0xf9] sm:$0xff] }
  0x41   : > { %v2914_v43 = vpack.c.bf16 %v1263_v42, %v1262_v41  ;;  %v1384_v41 = vld [vmem:[#allocation2 + $0xb1] sm:$0xff]  ;;  %v1026_v39 = vpack.c.bf16 %v1004_v38, %v1003_v37 }
  0x42   : > { %v1410_v47 = vpack.c.bf16 %v1384_v41, %v1383_v40  ;;  %v1132_v41 = vld [vmem:[#allocation2 + $0xf2] sm:$0xff] }
  0x43   : > { %1566 = vrot.lane.b32.xlu0 %v2849_v0, %s2628_s26  ;;  %593 = vst.msk [vmem:[#allocation3 + $0x58] sm:$0xff] %vm271_vm0, %v2914_v43 }
  0x44   : > { %666 = vrot.lane.b32.xlu1 %v2832_v53, %s2621_s8  ;;  %v878_v49 = vld [vmem:[#allocation2 + $0x120] sm:$0xff]  ;;  %v879_v51 = vld [vmem:[#allocation2 + $0x128] sm:$0xff]  ;;  %v462_v53 = vadd.f32 %v2749_v14, %v423_v46 }
  0x45   : > { %v2924_v54 = vpack.c.bf16 %v879_v51, %v878_v49  ;;  %v882_v27 = vld [vmem:[#allocation2 + $0x150] sm:$0xff]  ;;  %v2498_v49 = vunpack.c.l.bf16 %v2514_v48  ;;  %v2499_v51 = vunpack.c.h.bf16 %v2514_v48  ;;  %v555_v48 = vld [vmem:[#allocation2 + $0xf8] sm:$0xff] }
  0x46   : > { %v494_v57 = vmax.f32 %v462_v53, 0.0  ;;  %v1270_v42 = vld [vmem:[#allocation2 + $0x168] sm:$0xff]  ;;  %v1513_v53 = vld [vmem:[#allocation2 + $0xb2] sm:$0xff] }
  0x47   : > { %1568 = vrot.lane.b32.xlu0 %v1535_v31, %s2628_s26  ;;  %594 = vst.msk [vmem:[#allocation3 + $0x60] sm:$0xff] %vm271_vm0, %v2924_v54  ;;  %v429_v56 = vmul.f32 %v2499_v51, %v2741_v1 }
  0x48   : > { %668 = vrot.lane.b32.xlu1 %v2872_v12, %s2621_s8  ;;  %527 = vst.msk [vmem:[#allocation2 + $0x141] sm:$0xff] %vm271_vm0, %v494_v57 }
  0x4b   : > { %795 = vrot.lane.b32.xlu0 %v2849_v0, %s2622_s9 }
  0x4c   : > { %797 = vrot.lane.b32.xlu1 %v1535_v31, %s2622_s9 }
  0x4f   : > { %924 = vrot.lane.b32.xlu0 %v2818_v44, %s2623_s10  ;;  %v1149_v44 = vpack.c.bf16 %v1121_v59, %v1120_v58  ;;  %v1267_v0 = vld [vmem:[#allocation2 + $0x140] sm:$0xff]  ;;  %v468_v58 = vadd.f32 %v2749_v14, %v429_v56  ;;  %v1539_v59 = vpack.c.bf16 %v1513_v53, %v1512_v52  ;;  %v1391_v56 = vld [vmem:[#allocation2 + $0x109] sm:$0xff] }
  0x50   : > { %926 = vrot.lane.b32.xlu1 %v2826_v50, %s2623_s10  ;;  %v2937_v2 = vpack.c.bf16 %v1267_v0, %v1266_v63  ;;  %v999_v63 = vld [vmem:[#allocation2 + $0xc1] sm:$0xff]  ;;  %v1000_v0 = vld [vmem:[#allocation2 + $0xc9] sm:$0xff] }
  0x51   : > { %v500_v61 = vmax.f32 %v468_v58, 0.0  ;;  %v1024_v6 = vpack.c.bf16 %v1000_v0, %v999_v63 }
  0x52   : > { %595 = vst.msk [vmem:[#allocation3 + $0x68] sm:$0xff] %vm271_vm0, %v2937_v2 }
  0x53   : > { %1053 = vrot.lane.b32.xlu0 %v2872_v12, %s2624_s11  ;;  %533 = vst.msk [vmem:[#allocation2 + $0x189] sm:$0xff] %vm271_vm0, %v500_v61 }
  0x54   : > { %1055 = vrot.lane.b32.xlu1 %v1020_v55, %s2624_s11 }
  0x57   : > { %1182 = vrot.lane.b32.xlu0 %v1535_v31, %s2625_s12  ;;  %v466_v31 = vadd.f32 %v2749_v14, %v427_v25 }
  0x58   : > { %1184 = vrot.lane.b32.xlu1 %v1149_v44, %s2625_s12 }
  0x59   : > { %v498_v34 = vmax.f32 %v466_v31, 0.0 }
  0x5b   : > { %1312 = vrot.lane.b32.xlu0 %v2826_v50, %s2626_s17  ;;  %v425_v50 = vmul.f32 %v2491_v7, %v2741_v1  ;;  %531 = vst.msk [vmem:[#allocation2 + $0x171] sm:$0xff] %vm271_vm0, %v498_v34  ;;  %v1128_v7 = vld [vmem:[#allocation2 + $0xc2] sm:$0xff] }
  0x5c   : > { %1314 = vrot.lane.b32.xlu1 %v2835_v60, %s2626_s17 }
  0x5d   : > { %v464_v12 = vadd.f32 %v2749_v14, %v425_v50  ;;  %v1153_v50 = vpack.c.bf16 %v1129_v8, %v1128_v7 }
  0x5f   : > { %1441 = vrot.lane.b32.xlu0 %v1020_v55, %s2627_s20  ;;  %v496_v16 = vmax.f32 %v464_v12, 0.0  ;;  %v1258_v12 = vld [vmem:[#allocation2 + $0xd8] sm:$0xff] }
  0x60   : > { %1443 = vrot.lane.b32.xlu1 %v1408_v3, %s2627_s20 }
  0x61   : > { %529 = vst.msk [vmem:[#allocation2 + $0x159] sm:$0xff] %vm271_vm0, %v496_v16 }
  0x62   : > { %v1271_v45 = vld [vmem:[#allocation2 + $0x170] sm:$0xff] }
  0x63   : > { %1570 = vrot.lane.b32.xlu0 %v1149_v44, %s2628_s26  ;;  %v2979_v46 = vpack.c.bf16 %v1271_v45, %v1270_v42  ;;  %v1133_v42 = vld [vmem:[#allocation2 + $0xfa] sm:$0xff] }
  0x64   : > { %670 = vrot.lane.b32.xlu1 %v1020_v55, %s2621_s8  ;;  %v428_v55 = vmul.f32 %v2498_v49, %v2741_v1  ;;  %v870_v1 = vld [vmem:[#allocation2 + $0xc0] sm:$0xff]  ;;  %v1155_v49 = vpack.c.bf16 %v1133_v42, %v1132_v41 }
  0x65   : > { %597 = vst.msk [vmem:[#allocation3 + $0x78] sm:$0xff] %vm271_vm0, %v2979_v46 }
  0x66   : > { %v467_v57 = vadd.f32 %v2749_v14, %v428_v55  ;;  %v895_v14 = vpack.c.bf16 %v871_v62, %v870_v1  ;;  %v1520_v62 = vld [vmem:[#allocation2 + $0x10a] sm:$0xff] }
  0x67   : > { %1572 = vrot.lane.b32.xlu0 %v1537_v13, %s2628_s26 }
  0x68   : > { %672 = vrot.lane.b32.xlu1 %v1408_v3, %s2621_s8  ;;  %v883_v28 = vld [vmem:[#allocation2 + $0x158] sm:$0xff] }
  0x69   : > { %v2963_v29 = vpack.c.bf16 %v883_v28, %v882_v27  ;;  %v1541_v27 = vpack.c.bf16 %v1517_v24, %v1516_v23 }
  0x6b   : > { %799 = vrot.lane.b32.xlu0 %v1149_v44, %s2622_s9  ;;  %596 = vst.msk [vmem:[#allocation3 + $0x70] sm:$0xff] %vm271_vm0, %v2963_v29  ;;  %v499_v44 = vmax.f32 %v467_v57, 0.0  ;;  %v1392_v57 = vld [vmem:[#allocation2 + $0x111] sm:$0xff] }
  0x6c   : > { %801 = vrot.lane.b32.xlu1 %v1537_v13, %s2622_s9 }
  0x6d   : > { %532 = vst.msk [vmem:[#allocation2 + $0x181] sm:$0xff] %vm271_vm0, %v499_v44 }
  0x6f   : > { %928 = vrot.lane.b32.xlu0 %v2835_v60, %s2623_s10  ;;  %v1151_v60 = vpack.c.bf16 %v1125_v36, %v1124_v35 }
  0x70   : > { %930 = vrot.lane.b32.xlu1 %v893_v22, %s2623_s10 }
  0x73   : > { %1057 = vrot.lane.b32.xlu0 %v1408_v3, %s2624_s11 }
  0x74   : > { %1059 = vrot.lane.b32.xlu1 %v1022_v32, %s2624_s11 }
  0x77   : > { %1186 = vrot.lane.b32.xlu0 %v1537_v13, %s2625_s12  ;;  %v552_v13 = vld [vmem:[#allocation2 + $0xd8] sm:$0xff] }
  0x78   : > { %1188 = vrot.lane.b32.xlu1 %v1151_v60, %s2625_s12  ;;  %v575_v17 = vpack.c.bf16 %v553_v15, %v552_v13  ;;  %v1136_v15 = vld [vmem:[#allocation2 + $0x122] sm:$0xff] }
  0x7a   : > { %591 = vst.msk [vmem:[#allocation3 + $0x48] sm:$0xff] %vm271_vm0, %v575_v17 }
  0x7b   : > { %1316 = vrot.lane.b32.xlu0 %v893_v22, %s2626_s17 }
  0x7c   : > { %1318 = vrot.lane.b32.xlu1 %v2851_v5, %s2626_s17 }
  0x7f   : > { %1445 = vrot.lane.b32.xlu0 %v1022_v32, %s2627_s20 }
  0x80   : > { %1447 = vrot.lane.b32.xlu1 %v1410_v47, %s2627_s20 }
  0x83   : > { %1574 = vrot.lane.b32.xlu0 %v1151_v60, %s2628_s26  ;;  %v663_v3 = vpop.permute.xlu0 %662 }
  0x84   : > { %674 = vrot.lane.b32.xlu1 %v1022_v32, %s2621_s8  ;;  %711 = vst.msk [vmem:[#allocation3] sm:$0xff] %vm710_vm3, %v663_v3  ;;  %v792_v4 = vpop.permute.xlu1 %791  ;;  %v874_v32 = vld [vmem:[#allocation2 + $0xf0] sm:$0xff] }
  0x85   : > { %840 = vst.msk [vmem:[#allocation3] sm:$0xff] %vm839_vm4, %v792_v4  ;;  %v897_v35 = vpack.c.bf16 %v875_v33, %v874_v32 }
  0x87   : > { %1576 = vrot.lane.b32.xlu0 %v1539_v59, %s2628_s26 }
  0x88   : > { %676 = vrot.lane.b32.xlu1 %v1410_v47, %s2621_s8 }
  0x8b   : > { %803 = vrot.lane.b32.xlu0 %v1151_v60, %s2622_s9 }
  0x8c   : > { %805 = vrot.lane.b32.xlu1 %v1539_v59, %s2622_s9 }
  0x8f   : > { %932 = vrot.lane.b32.xlu0 %v2851_v5, %s2623_s10  ;;  %v1259_v5 = vld [vmem:[#allocation2 + $0xe0] sm:$0xff] }
  0x90   : > { %934 = vrot.lane.b32.xlu1 %v895_v14, %s2623_s10  ;;  %v1283_v16 = vpack.c.bf16 %v1259_v5, %v1258_v12 }
  0x93   : > { %1061 = vrot.lane.b32.xlu0 %v1410_v47, %s2624_s11  ;;  %v554_v47 = vld [vmem:[#allocation2 + $0xf0] sm:$0xff] }
  0x94   : > { %1063 = vrot.lane.b32.xlu1 %v1024_v6, %s2624_s11  ;;  %v576_v51 = vpack.c.bf16 %v555_v48, %v554_v47  ;;  %v1141_v47 = vld [vmem:[#allocation2 + $0x15a] sm:$0xff] }
  0x96   : > { %592 = vst.msk [vmem:[#allocation3 + $0x50] sm:$0xff] %vm271_vm0, %v576_v51 }
  0x97   : > { %1190 = vrot.lane.b32.xlu0 %v1539_v59, %s2625_s12  ;;  %v1414_v59 = vpack.c.bf16 %v1392_v57, %v1391_v56 }
  0x98   : > { %1192 = vrot.lane.b32.xlu1 %v1153_v50, %s2625_s12 }
  0x9b   : > { %1320 = vrot.lane.b32.xlu0 %v895_v14, %s2626_s17  ;;  %v1521_v14 = vld [vmem:[#allocation2 + $0x112] sm:$0xff] }
  0x9c   : > { %1322 = vrot.lane.b32.xlu1 %v1283_v16, %s2626_s17  ;;  %v1543_v4 = vpack.c.bf16 %v1521_v14, %v1520_v62 }
  0x9d   : > { %v665_v21 = vpop.permute.xlu0 %664 }
  0x9e   : > { %712 = vst.msk [vmem:[#allocation3 + $0x8] sm:$0xff] %vm710_vm3, %v665_v21  ;;  %v794_v22 = vpop.permute.xlu1 %793  ;;  %v1395_v21 = vld [vmem:[#allocation2 + $0x139] sm:$0xff] }
  0x9f   : > { %841 = vst.msk [vmem:[#allocation3 + $0x8] sm:$0xff] %vm839_vm4, %v794_v22  ;;  %1449 = vrot.lane.b32.xlu0 %v1024_v6, %s2627_s20  ;;  %v1396_v22 = vld [vmem:[#allocation2 + $0x141] sm:$0xff] }
  0xa0   : > { %1451 = vrot.lane.b32.xlu1 %v1412_v20, %s2627_s20  ;;  %v1416_v24 = vpack.c.bf16 %v1396_v22, %v1395_v21 }
  0xa1   : > { %v921_v25 = vpop.permute.xlu0 %920 }
  0xa2   : > { %969 = vst.msk [vmem:[#allocation3] sm:$0xff] %vm968_vm5, %v921_v25  ;;  %v923_v26 = vpop.permute.xlu1 %922 }
  0xa3   : > { %970 = vst.msk [vmem:[#allocation3 + $0x8] sm:$0xff] %vm968_vm5, %v923_v26  ;;  %1578 = vrot.lane.b32.xlu0 %v1153_v50, %s2628_s26 }
  0xa4   : > { %678 = vrot.lane.b32.xlu1 %v1024_v6, %s2621_s8 }
  0xa5   : > { %v1050_v28 = vpop.permute.xlu0 %1049 }
  0xa6   : > { %1098 = vst.msk [vmem:[#allocation3] sm:$0xff] %vm1097_vm6, %v1050_v28  ;;  %v1052_v30 = vpop.permute.xlu1 %1051  ;;  %v1524_v28 = vld [vmem:[#allocation2 + $0x13a] sm:$0xff] }
  0xa7   : > { %1099 = vst.msk [vmem:[#allocation3 + $0x8] sm:$0xff] %vm1097_vm6, %v1052_v30  ;;  %1580 = vrot.lane.b32.xlu0 %v1541_v27, %s2628_s26  ;;  %v1525_v30 = vld [vmem:[#allocation2 + $0x142] sm:$0xff] }
  0xa8   : > { %680 = vrot.lane.b32.xlu1 %v1412_v20, %s2621_s8  ;;  %v1545_v33 = vpack.c.bf16 %v1525_v30, %v1524_v28  ;;  %v1532_v30 = vld [vmem:[#allocation2 + $0x19a] sm:$0xff] }
  0xa9   : > { %v1179_v31 = vpop.permute.xlu0 %1178 }
  0xaa   : > { %1227 = vst.msk [vmem:[#allocation3] sm:$0xff] %vm1226_vm7, %v1179_v31  ;;  %v1181_v34 = vpop.permute.xlu1 %1180 }
  0xab   : > { %1228 = vst.msk [vmem:[#allocation3 + $0x8] sm:$0xff] %vm1226_vm7, %v1181_v34  ;;  %807 = vrot.lane.b32.xlu0 %v1153_v50, %s2622_s9  ;;  %v1007_v50 = vld [vmem:[#allocation2 + $0x121] sm:$0xff] }
  0xac   : > { %809 = vrot.lane.b32.xlu1 %v1541_v27, %s2622_s9  ;;  %v1028_v5 = vpack.c.bf16 %v1008_v11, %v1007_v50  ;;  %v1015_v50 = vld [vmem:[#allocation2 + $0x181] sm:$0xff]  ;;  %v1016_v11 = vld [vmem:[#allocation2 + $0x189] sm:$0xff] }
  0xad   : > { %v1309_v36 = vpop.permute.xlu0 %1308 }
  0xae   : > { %1357 = vst.msk [vmem:[#allocation3] sm:$0xff] %vm1356_vm8, %v1309_v36  ;;  %v1311_v60 = vpop.permute.xlu1 %1310 }
  0xaf   : > { %1358 = vst.msk [vmem:[#allocation3 + $0x8] sm:$0xff] %vm1356_vm8, %v1311_v60  ;;  %936 = vrot.lane.b32.xlu0 %v1283_v16, %s2623_s10  ;;  %v1137_v16 = vld [vmem:[#allocation2 + $0x12a] sm:$0xff] }
  0xb0   : > { %938 = vrot.lane.b32.xlu1 %v897_v35, %s2623_s10  ;;  %v1157_v18 = vpack.c.bf16 %v1137_v16, %v1136_v15  ;;  %v1011_v60 = vld [vmem:[#allocation2 + $0x151] sm:$0xff]  ;;  %v1144_v15 = vld [vmem:[#allocation2 + $0x182] sm:$0xff] }
  0xb1   : > { %v1438_v40 = vpop.permute.xlu0 %1437  ;;  %v1145_v16 = vld [vmem:[#allocation2 + $0x18a] sm:$0xff] }
  0xb2   : > { %1486 = vst.msk [vmem:[#allocation3] sm:$0xff] %vm1485_vm9, %v1438_v40  ;;  %v1440_v45 = vpop.permute.xlu1 %1439 }
  0xb3   : > { %1487 = vst.msk [vmem:[#allocation3 + $0x8] sm:$0xff] %vm1485_vm9, %v1440_v45  ;;  %1065 = vrot.lane.b32.xlu0 %v1412_v20, %s2624_s11  ;;  %v1140_v45 = vld [vmem:[#allocation2 + $0x152] sm:$0xff] }
  0xb4   : > { %1067 = vrot.lane.b32.xlu1 %v1026_v39, %s2624_s11 }
  0xb5   : > { %v1567_v52 = vpop.permute.xlu0 %1566 }
  0xb6   : > { %1615 = vst.msk [vmem:[#allocation3] sm:$0xff] %vm1614_vm10, %v1567_v52  ;;  %v667_v53 = vpop.permute.xlu1 %666 }
  0xb7   : > { %713 = vst.msk [vmem:[#allocation3 + $0x10] sm:$0xff] %vm710_vm3, %v667_v53  ;;  %1194 = vrot.lane.b32.xlu0 %v1541_v27, %s2625_s12  ;;  %v1399_v53 = vld [vmem:[#allocation2 + $0x169] sm:$0xff] }
  0xb8   : > { %1196 = vrot.lane.b32.xlu1 %v1155_v49, %s2625_s12 }
  0xb9   : > { %v1569_v55 = vpop.permute.xlu0 %1568 }
  0xba   : > { %1616 = vst.msk [vmem:[#allocation3 + $0x8] sm:$0xff] %vm1614_vm10, %v1569_v55  ;;  %v669_v58 = vpop.permute.xlu1 %668  ;;  %v1400_v55 = vld [vmem:[#allocation2 + $0x171] sm:$0xff] }
  0xbb   : > { %714 = vst.msk [vmem:[#allocation3 + $0x18] sm:$0xff] %vm710_vm3, %v669_v58  ;;  %1324 = vrot.lane.b32.xlu0 %v897_v35, %s2626_s17  ;;  %v1418_v57 = vpack.c.bf16 %v1400_v55, %v1399_v53 }
  0xbc   : > { %1326 = vrot.lane.b32.xlu1 %v2914_v43, %s2626_s17 }
  0xbd   : > { %v796_v44 = vpop.permute.xlu0 %795  ;;  %v1631_v61 = vld [vmem:[#allocation3] sm:$0xff] }
  0xbe   : > { %842 = vst.msk [vmem:[#allocation3 + $0x10] sm:$0xff] %vm839_vm4, %v796_v44  ;;  %v798_v1 = vpop.permute.xlu1 %797  ;;  %2546 = vmatprep.mubr.msk.bf16.mxu0 %vm1683_vm11, %v1631_v61  ;;  %v1528_v61 = vld [vmem:[#allocation2 + $0x16a] sm:$0xff] }
  0xbf   : > { %843 = vst.msk [vmem:[#allocation3 + $0x18] sm:$0xff] %vm839_vm4, %v798_v1  ;;  %1453 = vrot.lane.b32.xlu0 %v1026_v39, %s2627_s20  ;;  %v1529_v1 = vld [vmem:[#allocation2 + $0x172] sm:$0xff] }
  0xc0   : > { %1455 = vrot.lane.b32.xlu1 %v1414_v59, %s2627_s20 }
  0xc1   : > { %v925_v63 = vpop.permute.xlu0 %924  ;;  %v1632_v0 = vld [vmem:[#allocation3 + $0x8] sm:$0xff] }
  0xc2   : > { %971 = vst.msk [vmem:[#allocation3 + $0x10] sm:$0xff] %vm968_vm5, %v925_v63  ;;  %v927_v3 = vpop.permute.xlu1 %926  ;;  %2547 = vmatmul.mubr.msk.bf16.vlgmr.msra.gmra.mrb[0].mxu0 %vm1683_vm11, %v1632_v0  ;;  %v1547_v63 = vpack.c.bf16 %v1529_v1, %v1528_v61 }
  0xc3   : > { %972 = vst.msk [vmem:[#allocation3 + $0x18] sm:$0xff] %vm968_vm5, %v927_v3  ;;  %1582 = vrot.lane.b32.xlu0 %v1155_v49, %s2628_s26 }
  0xc4   : > { %682 = vrot.lane.b32.xlu1 %v1026_v39, %s2621_s8  ;;  %v1012_v39 = vld [vmem:[#allocation2 + $0x159] sm:$0xff] }
  0xc5   : > { %v1054_v6 = vpop.permute.xlu0 %1053  ;;  %v1030_v41 = vpack.c.bf16 %v1012_v39, %v1011_v60 }
  0xc6   : > { %1100 = vst.msk [vmem:[#allocation3 + $0x10] sm:$0xff] %vm1097_vm6, %v1054_v6  ;;  %v1056_v7 = vpop.permute.xlu1 %1055  ;;  %v886_v6 = vld [vmem:[#allocation2 + $0x180] sm:$0xff] }
  0xc7   : > { %1101 = vst.msk [vmem:[#allocation3 + $0x18] sm:$0xff] %vm1097_vm6, %v1056_v7  ;;  %1584 = vrot.lane.b32.xlu0 %v1543_v4, %s2628_s26  ;;  %v887_v7 = vld [vmem:[#allocation2 + $0x188] sm:$0xff] }
  0xc8   : > { %684 = vrot.lane.b32.xlu1 %v1414_v59, %s2621_s8 }
  0xc9   : > { %v1183_v8 = vpop.permute.xlu0 %1182 }
  0xca   : > { %1229 = vst.msk [vmem:[#allocation3 + $0x10] sm:$0xff] %vm1226_vm7, %v1183_v8  ;;  %v1185_v9 = vpop.permute.xlu1 %1184 }
  0xcb   : > { %1230 = vst.msk [vmem:[#allocation3 + $0x18] sm:$0xff] %vm1226_vm7, %v1185_v9  ;;  %811 = vrot.lane.b32.xlu0 %v1155_v49, %s2622_s9  ;;  %v1159_v49 = vpack.c.bf16 %v1141_v47, %v1140_v45  ;;  %v903_v9 = vpack.c.bf16 %v887_v7, %v886_v6 }
  0xcc   : > { %813 = vrot.lane.b32.xlu1 %v1543_v4, %s2622_s9 }
  0xcd   : > { %v1313_v10 = vpop.permute.xlu0 %1312 }
  0xce   : > { %1359 = vst.msk [vmem:[#allocation3 + $0x10] sm:$0xff] %vm1356_vm8, %v1313_v10  ;;  %v1315_v12 = vpop.permute.xlu1 %1314 }
  0xcf   : > { %1360 = vst.msk [vmem:[#allocation3 + $0x18] sm:$0xff] %vm1356_vm8, %v1315_v12  ;;  %940 = vrot.lane.b32.xlu0 %v2914_v43, %s2623_s10 }
  0xd0   : > { %942 = vrot.lane.b32.xlu1 %v2924_v54, %s2623_s10 }
  0xd1   : > { %v1442_v13 = vpop.permute.xlu0 %1441 }
  0xd2   : > { %1488 = vst.msk [vmem:[#allocation3 + $0x10] sm:$0xff] %vm1485_vm9, %v1442_v13  ;;  %v1444_v17 = vpop.permute.xlu1 %1443 }
  0xd3   : > { %1489 = vst.msk [vmem:[#allocation3 + $0x18] sm:$0xff] %vm1485_vm9, %v1444_v17  ;;  %1069 = vrot.lane.b32.xlu0 %v1414_v59, %s2624_s11 }
  0xd4   : > { %1071 = vrot.lane.b32.xlu1 %v1028_v5, %s2624_s11 }
  0xd5   : > { %v1571_v19 = vpop.permute.xlu0 %1570 }
  0xd6   : > { %1617 = vst.msk [vmem:[#allocation3 + $0x10] sm:$0xff] %vm1614_vm10, %v1571_v19  ;;  %v671_v43 = vpop.permute.xlu1 %670 }
  0xd7   : > { %715 = vst.msk [vmem:[#allocation3 + $0x20] sm:$0xff] %vm710_vm3, %v671_v43  ;;  %1198 = vrot.lane.b32.xlu0 %v1543_v4, %s2625_s12  ;;  %v1274_v43 = vld [vmem:[#allocation2 + $0x198] sm:$0xff] }
  0xd8   : > { %1200 = vrot.lane.b32.xlu1 %v1157_v18, %s2625_s12 }
  0xd9   : > { %v1573_v20 = vpop.permute.xlu0 %1572 }
  0xda   : > { %1618 = vst.msk [vmem:[#allocation3 + $0x18] sm:$0xff] %vm1614_vm10, %v1573_v20  ;;  %v673_v23 = vpop.permute.xlu1 %672  ;;  %v1275_v20 = vld [vmem:[#allocation2 + $0x1a0] sm:$0xff] }
  0xdb   : > { %716 = vst.msk [vmem:[#allocation3 + $0x28] sm:$0xff] %vm710_vm3, %v673_v23  ;;  %1328 = vrot.lane.b32.xlu0 %v2924_v54, %s2626_s17  ;;  %v1291_v21 = vpack.c.bf16 %v1275_v20, %v1274_v43  ;;  %v1403_v23 = vld [vmem:[#allocation2 + $0x199] sm:$0xff] }
  0xdc   : > { %1330 = vrot.lane.b32.xlu1 %v2937_v2, %s2626_s17 }
  0xdd   : > { %v800_v25 = vpop.permute.xlu0 %799  ;;  %v1633_v26 = vld [vmem:[#allocation3 + $0x10] sm:$0xff] }
  0xde   : > { %844 = vst.msk [vmem:[#allocation3 + $0x20] sm:$0xff] %vm839_vm4, %v800_v25  ;;  %v802_v27 = vpop.permute.xlu1 %801  ;;  %2550 = vmatprep.mubr.msk.bf16.mxu0 %vm1683_vm11, %v1633_v26 }
  0xdf   : > { %845 = vst.msk [vmem:[#allocation3 + $0x28] sm:$0xff] %vm839_vm4, %v802_v27  ;;  %1457 = vrot.lane.b32.xlu0 %v1028_v5, %s2627_s20 }
  0xe0   : > { %1459 = vrot.lane.b32.xlu1 %v1416_v24, %s2627_s20 }
  0xe1   : > { %v929_v54 = vpop.permute.xlu0 %928  ;;  %v1634_v31 = vld [vmem:[#allocation3 + $0x18] sm:$0xff] }
  0xe2   : > { %973 = vst.msk [vmem:[#allocation3 + $0x20] sm:$0xff] %vm968_vm5, %v929_v54  ;;  %v931_v32 = vpop.permute.xlu1 %930  ;;  %2551 = vmatmul.mubr.msk.bf16.gmra.mrb[4].mxu0 %vm1683_vm11, %v1634_v31  ;;  %v1533_v54 = vld [vmem:[#allocation2 + $0x1a2] sm:$0xff] }
  0xe3   : > { %974 = vst.msk [vmem:[#allocation3 + $0x28] sm:$0xff] %vm968_vm5, %v931_v32  ;;  %1586 = vrot.lane.b32.xlu0 %v1157_v18, %s2628_s26  ;;  %v1549_v32 = vpack.c.bf16 %v1533_v54, %v1532_v30 }
  0xe4   : > { %686 = vrot.lane.b32.xlu1 %v1028_v5, %s2621_s8  ;;  %v1032_v5 = vpack.c.bf16 %v1016_v11, %v1015_v50 }
  0xe5   : > { %v1058_v34 = vpop.permute.xlu0 %1057 }
  0xe6   : > { %1102 = vst.msk [vmem:[#allocation3 + $0x20] sm:$0xff] %vm1097_vm6, %v1058_v34  ;;  %v1060_v35 = vpop.permute.xlu1 %1059 }
  0xe7   : > { %1103 = vst.msk [vmem:[#allocation3 + $0x28] sm:$0xff] %vm1097_vm6, %v1060_v35  ;;  %1588 = vrot.lane.b32.xlu0 %v1545_v33, %s2628_s26 }
  0xe8   : > { %688 = vrot.lane.b32.xlu1 %v1416_v24, %s2621_s8 }
  0xe9   : > { %v1187_v36 = vpop.permute.xlu0 %1186 }
  0xea   : > { %1231 = vst.msk [vmem:[#allocation3 + $0x20] sm:$0xff] %vm1226_vm7, %v1187_v36  ;;  %v1189_v37 = vpop.permute.xlu1 %1188 }
  0xeb   : > { %1232 = vst.msk [vmem:[#allocation3 + $0x28] sm:$0xff] %vm1226_vm7, %v1189_v37  ;;  %815 = vrot.lane.b32.xlu0 %v1157_v18, %s2622_s9  ;;  %v1161_v18 = vpack.c.bf16 %v1145_v16, %v1144_v15 }
  0xec   : > { %817 = vrot.lane.b32.xlu1 %v1545_v33, %s2622_s9 }
  0xed   : > { %v1317_v38 = vpop.permute.xlu0 %1316 }
  0xee   : > { %1361 = vst.msk [vmem:[#allocation3 + $0x20] sm:$0xff] %vm1356_vm8, %v1317_v38  ;;  %v1319_v40 = vpop.permute.xlu1 %1318 }
  0xef   : > { %1362 = vst.msk [vmem:[#allocation3 + $0x28] sm:$0xff] %vm1356_vm8, %v1319_v40  ;;  %944 = vrot.lane.b32.xlu0 %v2937_v2, %s2623_s10 }
  0xf0   : > { %946 = vrot.lane.b32.xlu1 %v2963_v29, %s2623_s10 }
  0xf1   : > { %v1446_v42 = vpop.permute.xlu0 %1445 }
  0xf2   : > { %1490 = vst.msk [vmem:[#allocation3 + $0x20] sm:$0xff] %vm1485_vm9, %v1446_v42  ;;  %v1448_v48 = vpop.permute.xlu1 %1447 }
  0xf3   : > { %1491 = vst.msk [vmem:[#allocation3 + $0x28] sm:$0xff] %vm1485_vm9, %v1448_v48  ;;  %1073 = vrot.lane.b32.xlu0 %v1416_v24, %s2624_s11  ;;  %v1404_v24 = vld [vmem:[#allocation2 + $0x1a1] sm:$0xff] }
  0xf4   : > { %1075 = vrot.lane.b32.xlu1 %v1030_v41, %s2624_s11  ;;  %v1420_v26 = vpack.c.bf16 %v1404_v24, %v1403_v23 }
  0xf5   : > { %v1575_v51 = vpop.permute.xlu0 %1574 }
  0xf6   : > { %1619 = vst.msk [vmem:[#allocation3 + $0x20] sm:$0xff] %vm1614_vm10, %v1575_v51  ;;  %v675_v2 = vpop.permute.xlu1 %674 }
  0xf7   : > { %717 = vst.msk [vmem:[#allocation3 + $0x30] sm:$0xff] %vm710_vm3, %v675_v2  ;;  %1202 = vrot.lane.b32.xlu0 %v1545_v33, %s2625_s12 }
  0xf8   : > { %1204 = vrot.lane.b32.xlu1 %v1159_v49, %s2625_s12 }
  0xf9   : > { %v1577_v52 = vpop.permute.xlu0 %1576 }
  0xfa   : > { %1620 = vst.msk [vmem:[#allocation3 + $0x28] sm:$0xff] %vm1614_vm10, %v1577_v52  ;;  %v677_v56 = vpop.permute.xlu1 %676 }
  0xfb   : > { %718 = vst.msk [vmem:[#allocation3 + $0x38] sm:$0xff] %vm710_vm3, %v677_v56  ;;  %1332 = vrot.lane.b32.xlu0 %v2963_v29, %s2626_s17 }
  0xfc   : > { %1334 = vrot.lane.b32.xlu1 %v2979_v46, %s2626_s17 }
  0xfd   : > { %v804_v58 = vpop.permute.xlu0 %803  ;;  %v1635_v59 = vld [vmem:[#allocation3 + $0x20] sm:$0xff] }
  0xfe   : > { %846 = vst.msk [vmem:[#allocation3 + $0x30] sm:$0xff] %vm839_vm4, %v804_v58  ;;  %v806_v44 = vpop.permute.xlu1 %805  ;;  %2554 = vmatprep.mubr.msk.bf16.mxu0 %vm1683_vm11, %v1635_v59 }
  0xff   : > { %847 = vst.msk [vmem:[#allocation3 + $0x38] sm:$0xff] %vm839_vm4, %v806_v44  ;;  %1461 = vrot.lane.b32.xlu0 %v1030_v41, %s2627_s20 }
 0x100   : > { %1463 = vrot.lane.b32.xlu1 %v1418_v57, %s2627_s20 }
 0x101   : > { %v933_v29 = vpop.permute.xlu0 %932  ;;  %v1636_v62 = vld [vmem:[#allocation3 + $0x28] sm:$0xff] }
 0x102   : > { %975 = vst.msk [vmem:[#allocation3 + $0x30] sm:$0xff] %vm968_vm5, %v933_v29  ;;  %v935_v14 = vpop.permute.xlu1 %934  ;;  %2555 = vmatmul.mubr.msk.bf16.gmra.mrb[8].mxu0 %vm1683_vm11, %v1636_v62 }
 0x103   : > { %976 = vst.msk [vmem:[#allocation3 + $0x38] sm:$0xff] %vm968_vm5, %v935_v14  ;;  %1590 = vrot.lane.b32.xlu0 %v1159_v49, %s2628_s26 }
 0x104   : > { %690 = vrot.lane.b32.xlu1 %v1030_v41, %s2621_s8 }
 0x105   : > { %v1062_v0 = vpop.permute.xlu0 %1061 }
 0x106   : > { %1104 = vst.msk [vmem:[#allocation3 + $0x30] sm:$0xff] %vm1097_vm6, %v1062_v0  ;;  %v1064_v3 = vpop.permute.xlu1 %1063 }
 0x107   : > { %1105 = vst.msk [vmem:[#allocation3 + $0x38] sm:$0xff] %vm1097_vm6, %v1064_v3  ;;  %1592 = vrot.lane.b32.xlu0 %v1547_v63, %s2628_s26 }
 0x108   : > { %692 = vrot.lane.b32.xlu1 %v1418_v57, %s2621_s8  ;;  %s3235_s8 = scalar_lea.vmem %s3384_s4, %s2345_s30 }
 0x109   : > { %v1191_v4 = vpop.permute.xlu0 %1190 }
 0x10a   : > { %1233 = vst.msk [vmem:[#allocation3 + $0x30] sm:$0xff] %vm1226_vm7, %v1191_v4  ;;  %v1193_v8 = vpop.permute.xlu1 %1192 }
 0x10b   : > { %1234 = vst.msk [vmem:[#allocation3 + $0x38] sm:$0xff] %vm1226_vm7, %v1193_v8  ;;  %819 = vrot.lane.b32.xlu0 %v1159_v49, %s2622_s9 }
 0x10c   : > { %821 = vrot.lane.b32.xlu1 %v1547_v63, %s2622_s9 }
 0x10d   : > { %v1321_v10 = vpop.permute.xlu0 %1320 }
 0x10e   : > { %1363 = vst.msk [vmem:[#allocation3 + $0x30] sm:$0xff] %vm1356_vm8, %v1321_v10  ;;  %v1323_v12 = vpop.permute.xlu1 %1322 }
 0x10f   : > { %1364 = vst.msk [vmem:[#allocation3 + $0x38] sm:$0xff] %vm1356_vm8, %v1323_v12  ;;  %948 = vrot.lane.b32.xlu0 %v2979_v46, %s2623_s10 }
 0x110   : > { %950 = vrot.lane.b32.xlu1 %v903_v9, %s2623_s10 }
 0x111   : > { %v1450_v13 = vpop.permute.xlu0 %1449 }
 0x112   : > { %1492 = vst.msk [vmem:[#allocation3 + $0x30] sm:$0xff] %vm1485_vm9, %v1450_v13  ;;  %v1452_v17 = vpop.permute.xlu1 %1451 }
 0x113   : > { %1493 = vst.msk [vmem:[#allocation3 + $0x38] sm:$0xff] %vm1485_vm9, %v1452_v17  ;;  %1077 = vrot.lane.b32.xlu0 %v1418_v57, %s2624_s11 }
 0x114   : > { %1079 = vrot.lane.b32.xlu1 %v1032_v5, %s2624_s11  ;;  %s266_s11 = scalar_lea.vmem %s3385_s5, %s2730_s23 }
 0x115   : > { %v1579_v19 = vpop.permute.xlu0 %1578 }
 0x116   : > { %1621 = vst.msk [vmem:[#allocation3 + $0x30] sm:$0xff] %vm1614_vm10, %v1579_v19  ;;  %v679_v46 = vpop.permute.xlu1 %678 }
 0x117   : > { %719 = vst.msk [vmem:[#allocation3 + $0x40] sm:$0xff] %vm710_vm3, %v679_v46  ;;  %1206 = vrot.lane.b32.xlu0 %v1547_v63, %s2625_s12 }
 0x118   : > { %1208 = vrot.lane.b32.xlu1 %v1161_v18, %s2625_s12 }
 0x119   : > { %v1581_v22 = vpop.permute.xlu0 %1580 }
 0x11a   : > { %1622 = vst.msk [vmem:[#allocation3 + $0x38] sm:$0xff] %vm1614_vm10, %v1581_v22  ;;  %v681_v25 = vpop.permute.xlu1 %680 }
 0x11b   : > { %720 = vst.msk [vmem:[#allocation3 + $0x48] sm:$0xff] %vm710_vm3, %v681_v25  ;;  %1336 = vrot.lane.b32.xlu0 %v903_v9, %s2626_s17 }
 0x11c   : > { %1338 = vrot.lane.b32.xlu1 %v1291_v21, %s2626_s17 }
 0x11d   : > { %v808_v27 = vpop.permute.xlu0 %807  ;;  %v1637_v28 = vld [vmem:[#allocation3 + $0x30] sm:$0xff] }
 0x11e   : > { %848 = vst.msk [vmem:[#allocation3 + $0x40] sm:$0xff] %vm839_vm4, %v808_v27  ;;  %v810_v31 = vpop.permute.xlu1 %809  ;;  %2558 = vmatprep.mubr.msk.bf16.mxu0 %vm1683_vm11, %v1637_v28 }
 0x11f   : > { %849 = vst.msk [vmem:[#allocation3 + $0x48] sm:$0xff] %vm839_vm4, %v810_v31  ;;  %1465 = vrot.lane.b32.xlu0 %v1032_v5, %s2627_s20 }
 0x120   : > { %1467 = vrot.lane.b32.xlu1 %v1420_v26, %s2627_s20 }
 0x121   : > { %v937_v33 = vpop.permute.xlu0 %936  ;;  %v1638_v34 = vld [vmem:[#allocation3 + $0x38] sm:$0xff] }
 0x122   : > { %977 = vst.msk [vmem:[#allocation3 + $0x40] sm:$0xff] %vm968_vm5, %v937_v33  ;;  %v939_v35 = vpop.permute.xlu1 %938  ;;  %2559 = vmatmul.mubr.msk.bf16.gmra.mrb[12].mxu0 %vm1683_vm11, %v1638_v34 }
 0x123   : > { %978 = vst.msk [vmem:[#allocation3 + $0x48] sm:$0xff] %vm968_vm5, %v939_v35  ;;  %1594 = vrot.lane.b32.xlu0 %v1161_v18, %s2628_s26 }
 0x124   : > { %1596 = vrot.lane.b32.xlu1 %v1549_v32, %s2628_s26 }
 0x125   : > { %v1066_v36 = vpop.permute.xlu0 %1065 }
 0x126   : > { %1106 = vst.msk [vmem:[#allocation3 + $0x40] sm:$0xff] %vm1097_vm6, %v1066_v36  ;;  %v1068_v37 = vpop.permute.xlu1 %1067 }
 0x127   : > { %1107 = vst.msk [vmem:[#allocation3 + $0x48] sm:$0xff] %vm1097_vm6, %v1068_v37 }
 0x129   : > { %v1195_v38 = vpop.permute.xlu0 %1194 }
 0x12a   : > { %1235 = vst.msk [vmem:[#allocation3 + $0x40] sm:$0xff] %vm1226_vm7, %v1195_v38  ;;  %v1197_v60 = vpop.permute.xlu1 %1196 }
 0x12b   : > { %1236 = vst.msk [vmem:[#allocation3 + $0x48] sm:$0xff] %vm1226_vm7, %v1197_v60 }
 0x12d   : > { %v1325_v39 = vpop.permute.xlu0 %1324 }
 0x12e   : > { %1365 = vst.msk [vmem:[#allocation3 + $0x40] sm:$0xff] %vm1356_vm8, %v1325_v39  ;;  %v1327_v40 = vpop.permute.xlu1 %1326 }
 0x12f   : > { %1366 = vst.msk [vmem:[#allocation3 + $0x48] sm:$0xff] %vm1356_vm8, %v1327_v40 }
 0x131   : > { %v1454_v41 = vpop.permute.xlu0 %1453 }
 0x132   : > { %1494 = vst.msk [vmem:[#allocation3 + $0x40] sm:$0xff] %vm1485_vm9, %v1454_v41  ;;  %v1456_v42 = vpop.permute.xlu1 %1455 }
 0x133   : > { %1495 = vst.msk [vmem:[#allocation3 + $0x48] sm:$0xff] %vm1485_vm9, %v1456_v42 }
 0x135   : > { %v1583_v45 = vpop.permute.xlu0 %1582 }
 0x136   : > { %1623 = vst.msk [vmem:[#allocation3 + $0x40] sm:$0xff] %vm1614_vm10, %v1583_v45  ;;  %v683_v47 = vpop.permute.xlu1 %682 }
 0x137   : > { %721 = vst.msk [vmem:[#allocation3 + $0x50] sm:$0xff] %vm710_vm3, %v683_v47 }
 0x139   : > { %v1585_v48 = vpop.permute.xlu0 %1584 }
 0x13a   : > { %1624 = vst.msk [vmem:[#allocation3 + $0x48] sm:$0xff] %vm1614_vm10, %v1585_v48  ;;  %v685_v49 = vpop.permute.xlu1 %684 }
 0x13b   : > { %722 = vst.msk [vmem:[#allocation3 + $0x58] sm:$0xff] %vm710_vm3, %v685_v49 }
 0x13d   : > { %v812_v51 = vpop.permute.xlu0 %811  ;;  %v1639_v2 = vld [vmem:[#allocation3 + $0x40] sm:$0xff] }
 0x13e   : > { %850 = vst.msk [vmem:[#allocation3 + $0x50] sm:$0xff] %vm839_vm4, %v812_v51  ;;  %v814_v52 = vpop.permute.xlu1 %813  ;;  %2562 = vmatprep.mubr.msk.bf16.mxu1 %vm1683_vm11, %v1639_v2 }
 0x13f   : > { %851 = vst.msk [vmem:[#allocation3 + $0x58] sm:$0xff] %vm839_vm4, %v814_v52 }
 0x141   : > { %v941_v53 = vpop.permute.xlu0 %940  ;;  %v1640_v55 = vld [vmem:[#allocation3 + $0x48] sm:$0xff] }
 0x142   : > { %979 = vst.msk [vmem:[#allocation3 + $0x50] sm:$0xff] %vm968_vm5, %v941_v53  ;;  %v943_v56 = vpop.permute.xlu1 %942  ;;  %2563 = vmatmul.mubr.msk.bf16.vlgmr.msra.gmra.mrb[0].mxu1 %vm1683_vm11, %v1640_v55 }
 0x143   : > { %980 = vst.msk [vmem:[#allocation3 + $0x58] sm:$0xff] %vm968_vm5, %v943_v56 }
 0x145   : > { %v1070_v57 = vpop.permute.xlu0 %1069 }
 0x146   : > { %1108 = vst.msk [vmem:[#allocation3 + $0x50] sm:$0xff] %vm1097_vm6, %v1070_v57  ;;  %v1072_v58 = vpop.permute.xlu1 %1071 }
 0x147   : > { %1109 = vst.msk [vmem:[#allocation3 + $0x58] sm:$0xff] %vm1097_vm6, %v1072_v58 }
 0x149   : > { %v1199_v59 = vpop.permute.xlu0 %1198 }
 0x14a   : > { %1237 = vst.msk [vmem:[#allocation3 + $0x50] sm:$0xff] %vm1226_vm7, %v1199_v59  ;;  %v1201_v44 = vpop.permute.xlu1 %1200 }
 0x14b   : > { %1238 = vst.msk [vmem:[#allocation3 + $0x58] sm:$0xff] %vm1226_vm7, %v1201_v44 }
 0x14d   : > { %v1329_v61 = vpop.permute.xlu0 %1328 }
 0x14e   : > { %1367 = vst.msk [vmem:[#allocation3 + $0x50] sm:$0xff] %vm1356_vm8, %v1329_v61  ;;  %v1331_v1 = vpop.permute.xlu1 %1330 }
 0x14f   : > { %1368 = vst.msk [vmem:[#allocation3 + $0x58] sm:$0xff] %vm1356_vm8, %v1331_v1 }
 0x151   : > { %v1458_v29 = vpop.permute.xlu0 %1457 }
 0x152   : > { %1496 = vst.msk [vmem:[#allocation3 + $0x50] sm:$0xff] %vm1485_vm9, %v1458_v29  ;;  %v1460_v62 = vpop.permute.xlu1 %1459 }
 0x153   : > { %1497 = vst.msk [vmem:[#allocation3 + $0x58] sm:$0xff] %vm1485_vm9, %v1460_v62 }
 0x155   : > { %v1587_v14 = vpop.permute.xlu0 %1586 }
 0x156   : > { %1625 = vst.msk [vmem:[#allocation3 + $0x50] sm:$0xff] %vm1614_vm10, %v1587_v14  ;;  %v687_v63 = vpop.permute.xlu1 %686 }
 0x157   : > { %723 = vst.msk [vmem:[#allocation3 + $0x60] sm:$0xff] %vm710_vm3, %v687_v63 }
 0x159   : > { %v1589_v0 = vpop.permute.xlu0 %1588 }
 0x15a   : > { %1626 = vst.msk [vmem:[#allocation3 + $0x58] sm:$0xff] %vm1614_vm10, %v1589_v0  ;;  %v689_v3 = vpop.permute.xlu1 %688 }
 0x15b   : > { %724 = vst.msk [vmem:[#allocation3 + $0x68] sm:$0xff] %vm710_vm3, %v689_v3 }
 0x15d   : > { %v816_v4 = vpop.permute.xlu0 %815  ;;  %v1641_v6 = vld [vmem:[#allocation3 + $0x50] sm:$0xff] }
 0x15e   : > { %852 = vst.msk [vmem:[#allocation3 + $0x60] sm:$0xff] %vm839_vm4, %v816_v4  ;;  %v818_v7 = vpop.permute.xlu1 %817  ;;  %2566 = vmatprep.mubr.msk.bf16.mxu1 %vm1683_vm11, %v1641_v6 }
 0x15f   : > { %853 = vst.msk [vmem:[#allocation3 + $0x68] sm:$0xff] %vm839_vm4, %v818_v7 }
 0x161   : > { %v945_v8 = vpop.permute.xlu0 %944  ;;  %v1642_v9 = vld [vmem:[#allocation3 + $0x58] sm:$0xff] }
 0x162   : > { %981 = vst.msk [vmem:[#allocation3 + $0x60] sm:$0xff] %vm968_vm5, %v945_v8  ;;  %v947_v10 = vpop.permute.xlu1 %946  ;;  %2567 = vmatmul.mubr.msk.bf16.gmra.mrb[4].mxu1 %vm1683_vm11, %v1642_v9 }
 0x163   : > { %982 = vst.msk [vmem:[#allocation3 + $0x68] sm:$0xff] %vm968_vm5, %v947_v10 }
 0x165   : > { %v1074_v50 = vpop.permute.xlu0 %1073 }
 0x166   : > { %1110 = vst.msk [vmem:[#allocation3 + $0x60] sm:$0xff] %vm1097_vm6, %v1074_v50  ;;  %v1076_v11 = vpop.permute.xlu1 %1075 }
 0x167   : > { %1111 = vst.msk [vmem:[#allocation3 + $0x68] sm:$0xff] %vm1097_vm6, %v1076_v11 }
 0x169   : > { %v1203_v12 = vpop.permute.xlu0 %1202 }
 0x16a   : > { %1239 = vst.msk [vmem:[#allocation3 + $0x60] sm:$0xff] %vm1226_vm7, %v1203_v12  ;;  %v1205_v5 = vpop.permute.xlu1 %1204 }
 0x16b   : > { %1240 = vst.msk [vmem:[#allocation3 + $0x68] sm:$0xff] %vm1226_vm7, %v1205_v5 }
 0x16d   : > { %v1333_v13 = vpop.permute.xlu0 %1332 }
 0x16e   : > { %1369 = vst.msk [vmem:[#allocation3 + $0x60] sm:$0xff] %vm1356_vm8, %v1333_v13  ;;  %v1335_v15 = vpop.permute.xlu1 %1334 }
 0x16f   : > { %1370 = vst.msk [vmem:[#allocation3 + $0x68] sm:$0xff] %vm1356_vm8, %v1335_v15 }
 0x171   : > { %v1462_v16 = vpop.permute.xlu0 %1461 }
 0x172   : > { %1498 = vst.msk [vmem:[#allocation3 + $0x60] sm:$0xff] %vm1485_vm9, %v1462_v16  ;;  %v1464_v17 = vpop.permute.xlu1 %1463 }
 0x173   : > { %1499 = vst.msk [vmem:[#allocation3 + $0x68] sm:$0xff] %vm1485_vm9, %v1464_v17 }
 0x175   : > { %v1591_v18 = vpop.permute.xlu0 %1590 }
 0x176   : > { %1627 = vst.msk [vmem:[#allocation3 + $0x60] sm:$0xff] %vm1614_vm10, %v1591_v18  ;;  %v691_v19 = vpop.permute.xlu1 %690 }
 0x177   : > { %725 = vst.msk [vmem:[#allocation3 + $0x70] sm:$0xff] %vm710_vm3, %v691_v19 }
 0x179   : > { %v1593_v43 = vpop.permute.xlu0 %1592 }
 0x17a   : > { %1628 = vst.msk [vmem:[#allocation3 + $0x68] sm:$0xff] %vm1614_vm10, %v1593_v43  ;;  %v693_v20 = vpop.permute.xlu1 %692 }
 0x17b   : > { %726 = vst.msk [vmem:[#allocation3 + $0x78] sm:$0xff] %vm710_vm3, %v693_v20 }
 0x17d   : > { %v820_v46 = vpop.permute.xlu0 %819  ;;  %v1643_v21 = vld [vmem:[#allocation3 + $0x60] sm:$0xff] }
 0x17e   : > { %854 = vst.msk [vmem:[#allocation3 + $0x70] sm:$0xff] %vm839_vm4, %v820_v46  ;;  %v822_v22 = vpop.permute.xlu1 %821  ;;  %2570 = vmatprep.mubr.msk.bf16.mxu1 %vm1683_vm11, %v1643_v21 }
 0x17f   : > { %855 = vst.msk [vmem:[#allocation3 + $0x78] sm:$0xff] %vm839_vm4, %v822_v22 }
 0x181   : > { %v949_v23 = vpop.permute.xlu0 %948  ;;  %v1644_v24 = vld [vmem:[#allocation3 + $0x68] sm:$0xff] }
 0x182   : > { %983 = vst.msk [vmem:[#allocation3 + $0x70] sm:$0xff] %vm968_vm5, %v949_v23  ;;  %v951_v25 = vpop.permute.xlu1 %950  ;;  %2571 = vmatmul.mubr.msk.bf16.gmra.mrb[8].mxu1 %vm1683_vm11, %v1644_v24 }
 0x183   : > { %984 = vst.msk [vmem:[#allocation3 + $0x78] sm:$0xff] %vm968_vm5, %v951_v25 }
 0x185   : > { %v1078_v26 = vpop.permute.xlu0 %1077 }
 0x186   : > { %1112 = vst.msk [vmem:[#allocation3 + $0x70] sm:$0xff] %vm1097_vm6, %v1078_v26  ;;  %v1080_v27 = vpop.permute.xlu1 %1079 }
 0x187   : > { %1113 = vst.msk [vmem:[#allocation3 + $0x78] sm:$0xff] %vm1097_vm6, %v1080_v27 }
 0x189   : > { %v1207_v28 = vpop.permute.xlu0 %1206 }
 0x18a   : > { %1241 = vst.msk [vmem:[#allocation3 + $0x70] sm:$0xff] %vm1226_vm7, %v1207_v28  ;;  %v1209_v30 = vpop.permute.xlu1 %1208 }
 0x18b   : > { %1242 = vst.msk [vmem:[#allocation3 + $0x78] sm:$0xff] %vm1226_vm7, %v1209_v30 }
 0x18d   : > { %v1337_v54 = vpop.permute.xlu0 %1336 }
 0x18e   : > { %1371 = vst.msk [vmem:[#allocation3 + $0x70] sm:$0xff] %vm1356_vm8, %v1337_v54  ;;  %v1339_v31 = vpop.permute.xlu1 %1338 }
 0x18f   : > { %1372 = vst.msk [vmem:[#allocation3 + $0x78] sm:$0xff] %vm1356_vm8, %v1339_v31 }
 0x191   : > { %v1466_v32 = vpop.permute.xlu0 %1465 }
 0x192   : > { %1500 = vst.msk [vmem:[#allocation3 + $0x70] sm:$0xff] %vm1485_vm9, %v1466_v32  ;;  %v1468_v33 = vpop.permute.xlu1 %1467 }
 0x193   : > { %1501 = vst.msk [vmem:[#allocation3 + $0x78] sm:$0xff] %vm1485_vm9, %v1468_v33 }
 0x195   : > { %v1595_v34 = vpop.permute.xlu0 %1594  ;;  %v2548_v35 = vpop.f32.mrb[0].mxu0 }
 0x196   : > { %1629 = vst.msk [vmem:[#allocation3 + $0x70] sm:$0xff] %vm1614_vm10, %v1595_v34  ;;  %v2406_v36 = vpack.c.bf16 %v2548_v35, %v2548_v35  ;;  %v1597_v37 = vpop.permute.xlu1 %1596  ;;  %v1770_v38 = vpop.f32.mrb[1].mxu0  ;;  %v2131_v41 = vmul.f32 %v2548_v35, %v2548_v35  ;;  %v2061_v52 = vsel %vm271_vm0, %v2548_v35, 0.0 }
 0x197   : > { %1630 = vst.msk [vmem:[#allocation3 + $0x78] sm:$0xff] %vm1614_vm10, %v1597_v37  ;;  %v2404_v60 = vpack.c.bf16 %v1770_v38, %v1770_v38  ;;  %v2129_v39 = vmul.f32 %v1770_v38, %v1770_v38  ;;  %v2549_v40 = vpop.f32.mrb[2].mxu0  ;;  %v2058_v47 = vsel %vm271_vm0, %v1770_v38, 0.0 }
 0x198   : > { %2028 = vst.msk [vmem:[%s3235_s8 + $0x8] sm:$0xf] %vm2025_vm12, %v2406_v36  ;;  %v2407_v42 = vpack.c.bf16 %v2549_v40, %v2549_v40  ;;  %v1773_v45 = vpop.f32.mrb[3].mxu0  ;;  %v2132_v55 = vmul.f32 %v2549_v40, %v2549_v40  ;;  %v2164_v59 = vsel %vm271_vm0, %v2131_v41, 0.0  ;;  %v2063_v44 = vsel %vm271_vm0, %v2549_v40, 0.0 }
 0x199   : > { %2026 = vst.msk [vmem:[%s3235_s8] sm:$0xf] %vm2025_vm12, %v2404_v60  ;;  %v2405_v48 = vpack.c.bf16 %v1773_v45, %v1773_v45  ;;  %v2059_v49 = vsel %vm271_vm0, %v1773_v45, 0.0  ;;  %v2130_v51 = vmul.f32 %v1773_v45, %v1773_v45  ;;  %v2161_v53 = vsel %vm271_vm0, %v2129_v39, 0.0 }
 0x19a   : > { %2029 = vst.msk [vmem:[%s3235_s8 + $0xc] sm:$0xf] %vm2025_vm12, %v2407_v42  ;;  %v2060_v2 = vadd.f32 %v2059_v49, %v2058_v47  ;;  %v2166_v14 = vsel %vm271_vm0, %v2132_v55, 0.0 }
 0x19b   : > { %2027 = vst.msk [vmem:[%s3235_s8 + $0x4] sm:$0xf] %vm2025_vm12, %v2405_v48  ;;  %v2162_v56 = vsel %vm271_vm0, %v2130_v51, 0.0 }
 0x19c   : > { %v2062_v57 = vadd.f32 %v2061_v52, %v2060_v2  ;;  %v2163_v58 = vadd.f32 %v2162_v56, %v2161_v53 }
 0x19d   : > { %v1645_v61 = vld [vmem:[#allocation3 + $0x70] sm:$0xff] }
 0x19e   : > { %v2165_v1 = vadd.f32 %v2164_v59, %v2163_v58  ;;  %2574 = vmatprep.mubr.msk.bf16.mxu1 %vm1683_vm11, %v1645_v61  ;;  %v1646_v29 = vld [vmem:[#allocation3 + $0x78] sm:$0xff]  ;;  %v2064_v62 = vadd.f32 %v2063_v44, %v2062_v57 }
 0x19f   : > { %2575 = vmatmul.mubr.msk.bf16.gmra.mrb[12].mxu1 %vm1683_vm11, %v1646_v29 }
 0x1a0   : > { %v2167_v63 = vadd.f32 %v2166_v14, %v2165_v1 }
 0x1b5   : > { %v2552_v0 = vpop.f32.mrb[4].mxu0 }
 0x1b6   : > { %v2410_v3 = vpack.c.bf16 %v2552_v0, %v2552_v0  ;;  %v1786_v4 = vpop.f32.mrb[5].mxu0  ;;  %v2135_v15 = vmul.f32 %v2552_v0, %v2552_v0  ;;  %v2069_v19 = vsel %vm271_vm0, %v2552_v0, 0.0 }
 0x1b7   : > { %v2408_v6 = vpack.c.bf16 %v1786_v4, %v1786_v4  ;;  %v2065_v7 = vsel %vm271_vm0, %v1786_v4, 0.0  ;;  %v2133_v8 = vmul.f32 %v1786_v4, %v1786_v4  ;;  %v2553_v9 = vpop.f32.mrb[6].mxu0 }
 0x1b8   : > { %2032 = vst.msk [vmem:[%s3235_s8 + $0x18] sm:$0xf] %vm2025_vm12, %v2410_v3  ;;  %v2066_v10 = vadd.f32 %v2065_v7, %v2064_v62  ;;  %v2411_v50 = vpack.c.bf16 %v2553_v9, %v2553_v9  ;;  %v1789_v11 = vpop.f32.mrb[7].mxu0  ;;  %v2136_v43 = vmul.f32 %v2553_v9, %v2553_v9  ;;  %v2071_v21 = vsel %vm271_vm0, %v2553_v9, 0.0 }
 0x1b9   : > { %2030 = vst.msk [vmem:[%s3235_s8 + $0x10] sm:$0xf] %vm2025_vm12, %v2408_v6  ;;  %v2168_v12 = vsel %vm271_vm0, %v2133_v8, 0.0  ;;  %v2409_v5 = vpack.c.bf16 %v1789_v11, %v1789_v11  ;;  %v2067_v13 = vsel %vm271_vm0, %v1789_v11, 0.0  ;;  %v2134_v18 = vmul.f32 %v1789_v11, %v1789_v11 }
 0x1ba   : > { %v2169_v16 = vadd.f32 %v2168_v12, %v2167_v63  ;;  %2033 = vst.msk [vmem:[%s3235_s8 + $0x1c] sm:$0xf] %vm2025_vm12, %v2411_v50  ;;  %v2068_v17 = vadd.f32 %v2067_v13, %v2066_v10  ;;  %v2172_v23 = vsel %vm271_vm0, %v2135_v15, 0.0  ;;  %v2174_v26 = vsel %vm271_vm0, %v2136_v43, 0.0 }
 0x1bb   : > { %2031 = vst.msk [vmem:[%s3235_s8 + $0x14] sm:$0xf] %vm2025_vm12, %v2409_v5  ;;  %v2170_v46 = vsel %vm271_vm0, %v2134_v18, 0.0 }
 0x1bc   : > { %v2070_v20 = vadd.f32 %v2069_v19, %v2068_v17  ;;  %v2171_v22 = vadd.f32 %v2170_v46, %v2169_v16 }
 0x1be   : > { %v2072_v24 = vadd.f32 %v2071_v21, %v2070_v20  ;;  %v2173_v25 = vadd.f32 %v2172_v23, %v2171_v22 }
 0x1c0   : > { %v2175_v27 = vadd.f32 %v2174_v26, %v2173_v25 }
 0x1d5   : > { %v2556_v28 = vpop.f32.mrb[8].mxu0 }
 0x1d6   : > { %v2414_v30 = vpack.c.bf16 %v2556_v28, %v2556_v28  ;;  %v1802_v54 = vpop.f32.mrb[9].mxu0  ;;  %v2139_v40 = vmul.f32 %v2556_v28, %v2556_v28  ;;  %v2077_v47 = vsel %vm271_vm0, %v2556_v28, 0.0 }
 0x1d7   : > { %v2412_v31 = vpack.c.bf16 %v1802_v54, %v1802_v54  ;;  %v2073_v32 = vsel %vm271_vm0, %v1802_v54, 0.0  ;;  %v2137_v33 = vmul.f32 %v1802_v54, %v1802_v54  ;;  %v2557_v34 = vpop.f32.mrb[10].mxu0 }
 0x1d8   : > { %2036 = vst.msk [vmem:[%s3235_s8 + $0x28] sm:$0xf] %vm2025_vm12, %v2414_v30  ;;  %v2074_v35 = vadd.f32 %v2073_v32, %v2072_v24  ;;  %v2415_v36 = vpack.c.bf16 %v2557_v34, %v2557_v34  ;;  %v1805_v37 = vpop.f32.mrb[11].mxu0  ;;  %v2140_v48 = vmul.f32 %v2557_v34, %v2557_v34  ;;  %v2079_v2 = vsel %vm271_vm0, %v2557_v34, 0.0 }
 0x1d9   : > { %2034 = vst.msk [vmem:[%s3235_s8 + $0x20] sm:$0xf] %vm2025_vm12, %v2412_v31  ;;  %v2176_v38 = vsel %vm271_vm0, %v2137_v33, 0.0  ;;  %v2413_v60 = vpack.c.bf16 %v1805_v37, %v1805_v37  ;;  %v2075_v39 = vsel %vm271_vm0, %v1805_v37, 0.0  ;;  %v2138_v45 = vmul.f32 %v1805_v37, %v1805_v37 }
 0x1da   : > { %v2177_v41 = vadd.f32 %v2176_v38, %v2175_v27  ;;  %2037 = vst.msk [vmem:[%s3235_s8 + $0x2c] sm:$0xf] %vm2025_vm12, %v2415_v36  ;;  %v2076_v42 = vadd.f32 %v2075_v39, %v2074_v35  ;;  %v2180_v53 = vsel %vm271_vm0, %v2139_v40, 0.0  ;;  %v2182_v57 = vsel %vm271_vm0, %v2140_v48, 0.0 }
 0x1db   : > { %2035 = vst.msk [vmem:[%s3235_s8 + $0x24] sm:$0xf] %vm2025_vm12, %v2413_v60  ;;  %v2178_v51 = vsel %vm271_vm0, %v2138_v45, 0.0 }
 0x1dc   : > { %v2078_v49 = vadd.f32 %v2077_v47, %v2076_v42  ;;  %v2179_v52 = vadd.f32 %v2178_v51, %v2177_v41 }
 0x1de   : > { %v2080_v55 = vadd.f32 %v2079_v2, %v2078_v49  ;;  %v2181_v56 = vadd.f32 %v2180_v53, %v2179_v52 }
 0x1e0   : > { %v2183_v58 = vadd.f32 %v2182_v57, %v2181_v56 }
 0x1f5   : > { %v2560_v59 = vpop.f32.mrb[12].mxu0 }
 0x1f6   : > { %v2418_v44 = vpack.c.bf16 %v2560_v59, %v2560_v59  ;;  %v1818_v61 = vpop.f32.mrb[13].mxu0  ;;  %v2143_v8 = vmul.f32 %v2560_v59, %v2560_v59  ;;  %v2085_v11 = vsel %vm271_vm0, %v2560_v59, 0.0 }
 0x1f7   : > { %v2416_v1 = vpack.c.bf16 %v1818_v61, %v1818_v61  ;;  %v2081_v29 = vsel %vm271_vm0, %v1818_v61, 0.0  ;;  %v2141_v62 = vmul.f32 %v1818_v61, %v1818_v61  ;;  %v2561_v14 = vpop.f32.mrb[14].mxu0 }
 0x1f8   : > { %2040 = vst.msk [vmem:[%s3235_s8 + $0x38] sm:$0xf] %vm2025_vm12, %v2418_v44  ;;  %v2082_v63 = vadd.f32 %v2081_v29, %v2080_v55  ;;  %v2419_v0 = vpack.c.bf16 %v2561_v14, %v2561_v14  ;;  %v1821_v3 = vpop.f32.mrb[15].mxu0  ;;  %v2144_v12 = vmul.f32 %v2561_v14, %v2561_v14  ;;  %v2087_v15 = vsel %vm271_vm0, %v2561_v14, 0.0 }
 0x1f9   : > { %2038 = vst.msk [vmem:[%s3235_s8 + $0x30] sm:$0xf] %vm2025_vm12, %v2416_v1  ;;  %v2184_v4 = vsel %vm271_vm0, %v2141_v62, 0.0  ;;  %v2417_v6 = vpack.c.bf16 %v1821_v3, %v1821_v3  ;;  %v2083_v7 = vsel %vm271_vm0, %v1821_v3, 0.0  ;;  %v2142_v50 = vmul.f32 %v1821_v3, %v1821_v3 }
 0x1fa   : > { %v2185_v9 = vadd.f32 %v2184_v4, %v2183_v58  ;;  %2041 = vst.msk [vmem:[%s3235_s8 + $0x3c] sm:$0xf] %vm2025_vm12, %v2419_v0  ;;  %v2084_v10 = vadd.f32 %v2083_v7, %v2082_v63  ;;  %v2188_v17 = vsel %vm271_vm0, %v2143_v8, 0.0  ;;  %v2190_v43 = vsel %vm271_vm0, %v2144_v12, 0.0 }
 0x1fb   : > { %2039 = vst.msk [vmem:[%s3235_s8 + $0x34] sm:$0xf] %vm2025_vm12, %v2417_v6  ;;  %v2186_v13 = vsel %vm271_vm0, %v2142_v50, 0.0 }
 0x1fc   : > { %v2086_v5 = vadd.f32 %v2085_v11, %v2084_v10  ;;  %v2187_v16 = vadd.f32 %v2186_v13, %v2185_v9 }
 0x1fe   : > { %v2088_v18 = vadd.f32 %v2087_v15, %v2086_v5  ;;  %v2189_v19 = vadd.f32 %v2188_v17, %v2187_v16 }
 0x200   : > { %v2191_v20 = vadd.f32 %v2190_v43, %v2189_v19 }
 0x215   : > { %v2564_v46 = vpop.f32.mrb[0].mxu1 }
 0x216   : > { %v2422_v21 = vpack.c.bf16 %v2564_v46, %v2564_v46  ;;  %v1834_v22 = vpop.f32.mrb[1].mxu1  ;;  %v2147_v33 = vmul.f32 %v2564_v46, %v2564_v46  ;;  %v2093_v37 = vsel %vm271_vm0, %v2564_v46, 0.0 }
 0x217   : > { %v2420_v23 = vpack.c.bf16 %v1834_v22, %v1834_v22  ;;  %v2089_v24 = vsel %vm271_vm0, %v1834_v22, 0.0  ;;  %v2145_v25 = vmul.f32 %v1834_v22, %v1834_v22  ;;  %v2565_v26 = vpop.f32.mrb[2].mxu1 }
 0x218   : > { %2044 = vst.msk [vmem:[%s3235_s8 + $0x48] sm:$0xf] %vm2025_vm12, %v2422_v21  ;;  %v2090_v27 = vadd.f32 %v2089_v24, %v2088_v18  ;;  %v2423_v28 = vpack.c.bf16 %v2565_v26, %v2565_v26  ;;  %v1837_v30 = vpop.f32.mrb[3].mxu1  ;;  %v2148_v38 = vmul.f32 %v2565_v26, %v2565_v26  ;;  %v2095_v40 = vsel %vm271_vm0, %v2565_v26, 0.0 }
 0x219   : > { %2042 = vst.msk [vmem:[%s3235_s8 + $0x40] sm:$0xf] %vm2025_vm12, %v2420_v23  ;;  %v2192_v54 = vsel %vm271_vm0, %v2145_v25, 0.0  ;;  %v2421_v31 = vpack.c.bf16 %v1837_v30, %v1837_v30  ;;  %v2091_v32 = vsel %vm271_vm0, %v1837_v30, 0.0  ;;  %v2146_v36 = vmul.f32 %v1837_v30, %v1837_v30 }
 0x21a   : > { %v2193_v34 = vadd.f32 %v2192_v54, %v2191_v20  ;;  %2045 = vst.msk [vmem:[%s3235_s8 + $0x4c] sm:$0xf] %vm2025_vm12, %v2423_v28  ;;  %v2092_v35 = vadd.f32 %v2091_v32, %v2090_v27  ;;  %v2196_v42 = vsel %vm271_vm0, %v2147_v33, 0.0  ;;  %v2198_v48 = vsel %vm271_vm0, %v2148_v38, 0.0 }
 0x21b   : > { %2043 = vst.msk [vmem:[%s3235_s8 + $0x44] sm:$0xf] %vm2025_vm12, %v2421_v31  ;;  %v2194_v39 = vsel %vm271_vm0, %v2146_v36, 0.0 }
 0x21c   : > { %v2094_v60 = vadd.f32 %v2093_v37, %v2092_v35  ;;  %v2195_v41 = vadd.f32 %v2194_v39, %v2193_v34 }
 0x21e   : > { %v2096_v45 = vadd.f32 %v2095_v40, %v2094_v60  ;;  %v2197_v47 = vadd.f32 %v2196_v42, %v2195_v41 }
 0x220   : > { %v2199_v49 = vadd.f32 %v2198_v48, %v2197_v47 }
 0x235   : > { %v2568_v51 = vpop.f32.mrb[4].mxu1 }
 0x236   : > { %v2426_v2 = vpack.c.bf16 %v2568_v51, %v2568_v51  ;;  %v1850_v52 = vpop.f32.mrb[5].mxu1  ;;  %v2151_v62 = vmul.f32 %v2568_v51, %v2568_v51  ;;  %v2101_v3 = vsel %vm271_vm0, %v2568_v51, 0.0 }
 0x237   : > { %v2424_v53 = vpack.c.bf16 %v1850_v52, %v1850_v52  ;;  %v2097_v55 = vsel %vm271_vm0, %v1850_v52, 0.0  ;;  %v2149_v56 = vmul.f32 %v1850_v52, %v1850_v52  ;;  %v2569_v57 = vpop.f32.mrb[6].mxu1 }
 0x238   : > { %2048 = vst.msk [vmem:[%s3235_s8 + $0x58] sm:$0xf] %vm2025_vm12, %v2426_v2  ;;  %v2098_v58 = vadd.f32 %v2097_v55, %v2096_v45  ;;  %v2427_v59 = vpack.c.bf16 %v2569_v57, %v2569_v57  ;;  %v1853_v44 = vpop.f32.mrb[7].mxu1  ;;  %v2152_v4 = vmul.f32 %v2569_v57, %v2569_v57  ;;  %v2103_v8 = vsel %vm271_vm0, %v2569_v57, 0.0 }
 0x239   : > { %2046 = vst.msk [vmem:[%s3235_s8 + $0x50] sm:$0xf] %vm2025_vm12, %v2424_v53  ;;  %v2200_v61 = vsel %vm271_vm0, %v2149_v56, 0.0  ;;  %v2425_v1 = vpack.c.bf16 %v1853_v44, %v1853_v44  ;;  %v2099_v29 = vsel %vm271_vm0, %v1853_v44, 0.0  ;;  %v2150_v0 = vmul.f32 %v1853_v44, %v1853_v44 }
 0x23a   : > { %v2201_v14 = vadd.f32 %v2200_v61, %v2199_v49  ;;  %2049 = vst.msk [vmem:[%s3235_s8 + $0x5c] sm:$0xf] %vm2025_vm12, %v2427_v59  ;;  %v2100_v63 = vadd.f32 %v2099_v29, %v2098_v58  ;;  %v2204_v10 = vsel %vm271_vm0, %v2151_v62, 0.0  ;;  %v2206_v12 = vsel %vm271_vm0, %v2152_v4, 0.0 }
 0x23b   : > { %2047 = vst.msk [vmem:[%s3235_s8 + $0x54] sm:$0xf] %vm2025_vm12, %v2425_v1  ;;  %v2202_v7 = vsel %vm271_vm0, %v2150_v0, 0.0 }
 0x23c   : > { %v2102_v6 = vadd.f32 %v2101_v3, %v2100_v63  ;;  %v2203_v9 = vadd.f32 %v2202_v7, %v2201_v14 }
 0x23e   : > { %v2104_v50 = vadd.f32 %v2103_v8, %v2102_v6  ;;  %v2205_v11 = vadd.f32 %v2204_v10, %v2203_v9 }
 0x240   : > { %v2207_v5 = vadd.f32 %v2206_v12, %v2205_v11 }
 0x255   : > { %v2572_v13 = vpop.f32.mrb[8].mxu1 }
 0x256   : > { %v2430_v15 = vpack.c.bf16 %v2572_v13, %v2572_v13  ;;  %v1866_v16 = vpop.f32.mrb[9].mxu1  ;;  %v2155_v25 = vmul.f32 %v2572_v13, %v2572_v13  ;;  %v2109_v30 = vsel %vm271_vm0, %v2572_v13, 0.0 }
 0x257   : > { %v2428_v17 = vpack.c.bf16 %v1866_v16, %v1866_v16  ;;  %v2105_v18 = vsel %vm271_vm0, %v1866_v16, 0.0  ;;  %v2153_v19 = vmul.f32 %v1866_v16, %v1866_v16  ;;  %v2573_v43 = vpop.f32.mrb[10].mxu1 }
 0x258   : > { %2052 = vst.msk [vmem:[%s3235_s8 + $0x68] sm:$0xf] %vm2025_vm12, %v2430_v15  ;;  %v2106_v20 = vadd.f32 %v2105_v18, %v2104_v50  ;;  %v2431_v46 = vpack.c.bf16 %v2573_v43, %v2573_v43  ;;  %v1869_v21 = vpop.f32.mrb[11].mxu1  ;;  %v2156_v54 = vmul.f32 %v2573_v43, %v2573_v43  ;;  %v2111_v33 = vsel %vm271_vm0, %v2573_v43, 0.0 }
 0x259   : > { %2050 = vst.msk [vmem:[%s3235_s8 + $0x60] sm:$0xf] %vm2025_vm12, %v2428_v17  ;;  %v2208_v22 = vsel %vm271_vm0, %v2153_v19, 0.0  ;;  %v2429_v23 = vpack.c.bf16 %v1869_v21, %v1869_v21  ;;  %v2107_v24 = vsel %vm271_vm0, %v1869_v21, 0.0  ;;  %v2154_v28 = vmul.f32 %v1869_v21, %v1869_v21 }
 0x25a   : > { %v2209_v26 = vadd.f32 %v2208_v22, %v2207_v5  ;;  %2053 = vst.msk [vmem:[%s3235_s8 + $0x6c] sm:$0xf] %vm2025_vm12, %v2431_v46  ;;  %v2108_v27 = vadd.f32 %v2107_v24, %v2106_v20  ;;  %v2212_v35 = vsel %vm271_vm0, %v2155_v25, 0.0  ;;  %v2214_v38 = vsel %vm271_vm0, %v2156_v54, 0.0 }
 0x25b   : > { %2051 = vst.msk [vmem:[%s3235_s8 + $0x64] sm:$0xf] %vm2025_vm12, %v2429_v23  ;;  %v2210_v32 = vsel %vm271_vm0, %v2154_v28, 0.0 }
 0x25c   : > { %v2110_v31 = vadd.f32 %v2109_v30, %v2108_v27  ;;  %v2211_v34 = vadd.f32 %v2210_v32, %v2209_v26 }
 0x25e   : > { %v2112_v36 = vadd.f32 %v2111_v33, %v2110_v31  ;;  %v2213_v37 = vadd.f32 %v2212_v35, %v2211_v34 }
 0x260   : > { %v2215_v60 = vadd.f32 %v2214_v38, %v2213_v37 }
 0x272   : > { %v2576_v39 = vpop.f32.mrb[12].mxu1 }
 0x273   : > { %v2434_v40 = vpack.c.bf16 %v2576_v39, %v2576_v39  ;;  %v1882_v41 = vpop.f32.mrb[13].mxu1  ;;  %v2159_v56 = vmul.f32 %v2576_v39, %v2576_v39  ;;  %v2117_v44 = vsel %vm271_vm0, %v2576_v39, 0.0 }
 0x274   : > { %v2432_v42 = vpack.c.bf16 %v1882_v41, %v1882_v41  ;;  %v2113_v45 = vsel %vm271_vm0, %v1882_v41, 0.0  ;;  %v2157_v47 = vmul.f32 %v1882_v41, %v1882_v41  ;;  %v2577_v48 = vpop.f32.mrb[14].mxu1 }
 0x275   : > { %2056 = vst.msk [vmem:[%s3235_s8 + $0x78] sm:$0xf] %vm2025_vm12, %v2434_v40  ;;  %v2114_v49 = vadd.f32 %v2113_v45, %v2112_v36  ;;  %v2435_v51 = vpack.c.bf16 %v2577_v48, %v2577_v48  ;;  %v1885_v2 = vpop.f32.mrb[15].mxu1  ;;  %v2160_v61 = vmul.f32 %v2577_v48, %v2577_v48  ;;  %v2119_v62 = vsel %vm271_vm0, %v2577_v48, 0.0 }
 0x276   : > { %2054 = vst.msk [vmem:[%s3235_s8 + $0x70] sm:$0xf] %vm2025_vm12, %v2432_v42  ;;  %v2216_v52 = vsel %vm271_vm0, %v2157_v47, 0.0  ;;  %v2433_v53 = vpack.c.bf16 %v1885_v2, %v1885_v2  ;;  %v2115_v55 = vsel %vm271_vm0, %v1885_v2, 0.0  ;;  %v2158_v59 = vmul.f32 %v1885_v2, %v1885_v2 }
 0x277   : > { %v2217_v57 = vadd.f32 %v2216_v52, %v2215_v60  ;;  %2057 = vst.msk [vmem:[%s3235_s8 + $0x7c] sm:$0xf] %vm2025_vm12, %v2435_v51  ;;  %v2116_v58 = vadd.f32 %v2115_v55, %v2114_v49  ;;  %v2220_v63 = vsel %vm271_vm0, %v2159_v56, 0.0  ;;  %v2222_v4 = vsel %vm271_vm0, %v2160_v61, 0.0 }
 0x278   : > { %2055 = vst.msk [vmem:[%s3235_s8 + $0x74] sm:$0xf] %vm2025_vm12, %v2433_v53  ;;  %v2218_v29 = vsel %vm271_vm0, %v2158_v59, 0.0 }
 0x279   : > { %v2118_v1 = vadd.f32 %v2117_v44, %v2116_v58  ;;  %v2219_v14 = vadd.f32 %v2218_v29, %v2217_v57 }
 0x27b   : > { %v2120_v0 = vadd.f32 %v2119_v62, %v2118_v1  ;;  %v2221_v3 = vadd.f32 %v2220_v63, %v2219_v14 }
 0x27d   : > { %v2121_v6 = vrot.slane %v2120_v0, 4  ;;  %v2223_v7 = vadd.f32 %v2222_v4, %v2221_v3 }
 0x27f   : > { %v2122_v8 = vadd.f32 %v2121_v6, %v2120_v0  ;;  %v2224_v9 = vrot.slane %v2223_v7, 4 }
 0x281   : > { %v2123_v10 = vrot.slane %v2122_v8, 2  ;;  %v2225_v50 = vadd.f32 %v2224_v9, %v2223_v7 }
 0x283   : > { %v2124_v11 = vadd.f32 %v2123_v10, %v2122_v8  ;;  %v2226_v12 = vrot.slane %v2225_v50, 2 }
 0x285   : > { %v2125_v5 = vrot.slane %v2124_v11, 1  ;;  %v2227_v13 = vadd.f32 %v2226_v12, %v2225_v50 }
 0x287   : > { %v2126_v15 = vadd.f32 %v2125_v5, %v2124_v11  ;;  %v2228_v16 = vrot.slane %v2227_v13, 1 }
 0x289   : > { %2128 = vst.msk [vmem:[%s266_s11] sm:$0x1] %vm2127_vm13, %v2126_v15  ;;  %v2229_v17 = vadd.f32 %v2228_v16, %v2227_v13 }
 0x28b   : > { %2230 = vst.msk [vmem:[%s269_s14] sm:$0x1] %vm2127_vm13, %v2229_v17 }
 0x28c PF: > { %s17_s21 = sadd.s32 1, %s2618_s21  }
 0x28d   : > { %p14_p5 = scmp.ge.s32.totalorder %s17_s21, 4  }
 0x28f   :  { %16 = sbr.rel (!%p14_p5) target bundleno = 1 (0x1), region = 92 }

</bundles_post_ra>
